<compile_context>
chip_gen: v6e
topology: v6e:2x2x1
jax: 0.10.0
libtpu: 0.0.40
codegen_flags: <defaults>
</compile_context>

<pallas_src>
import numpy as np
import jax
import jax.numpy as jnp
from jax import lax
from jax.experimental import pallas as pl
from jax.experimental.pallas import tpu as pltpu

C_IN = 4      # conv1 in channels
C_MID = 6     # conv1 out channels
C2_IN = 4     # conv2 in channels
C_OUT = 6     # conv2 out channels
KH = KW = 3
STRIDE = 2


# ------------------------------ fused kernel ------------------------------ #
def _fused_kernel(x_ref, w1_ref, b1_ref, b2_ref, wf_ref, o_ref):
    """One batch element per grid step.

    x_ref : (1, C_IN, HW)   VMEM  input block for this batch
    w1_ref: (C_MID, C_IN)   SMEM  conv1 weight (read as scalars)
    b1_ref: (C_MID,)        SMEM  conv1 bias
    b2_ref: (1, Q)          VMEM  conv2 bias broadcast to flat output layout
    wf_ref: (C_MID, HW, Q)  VMEM  folded conv2 weights (view+im2col+stride)
    o_ref : (1, 1, Q)       VMEM  output block, Q = C_OUT*Hout*Wout
    """
    x = x_ref[0]                     # (C_IN, HW): load once, reuse for all 6 channels
    acc = b2_ref[...]                # (1, Q) f32 accumulator, bias-initialised

    for o in range(C_MID):
        # conv1 output channel o: pointwise channel mix on the VPU.
        y_o = x[0:1, :] * w1_ref[o, 0]
        for c in range(1, C_IN):
            y_o = y_o + x[c:c + 1, :] * w1_ref[o, c]
        y_o = y_o + b1_ref[o]
        # conv2 contribution of this channel: one lane-dense MXU matmul.
        acc = acc + jnp.dot(y_o, wf_ref[o], preferred_element_type=jnp.float32)

    o_ref[0] = acc                   # single lane-dense store


# ------------------------------ model wrapper ------------------------------ #
def model_forward(x, w1, b1, w2, b2):
    N, C, H, W = x.shape
    assert C == C_IN and H >= KH
    HW = H * W
    H2 = H
    assert (C_MID * HW) % (C2_IN * H2) == 0
    W2 = (C_MID * HW) // (C2_IN * H2)           # = 3*W//2
    assert W2 >= KW
    Hout = (H2 - KH) // STRIDE + 1
    Wout = (W2 - KW) // STRIDE + 1
    Q = C_OUT * Hout * Wout

    # ---------- x-independent weight prep (constant-folds under jit) ----------
    w1m = w1[:, :, 0]                           # (6, 4)

    # Selection tensors folding the stride-2 3x3 window gather into weights:
    #   Sh[kh, h2, ho] = [h2 == 2*ho + kh],  Sw[kw, w2, wo] = [w2 == 2*wo + kw]
    Sh = np.zeros((KH, H2, Hout), np.float32)
    for kh in range(KH):
        for ho in range(Hout):
            Sh[kh, STRIDE * ho + kh, ho] = 1.0
    Sw = np.zeros((KW, W2, Wout), np.float32)
    for kw in range(KW):
        for wo in range(Wout):
            Sw[kw, STRIDE * wo + kw, wo] = 1.0

    # wfold[(c2,h2,w2) flat == conv1-flat (o_mid,p), (co,ho,wo) flat]:
    #   out[n, q] = b2row[q] + sum_{o,p} conv1_out[n, o, p] * wfold[o, p, q]
    wfold = jnp.einsum('ocij,ihu,jwv->chwouv', w2,
                       jnp.asarray(Sh), jnp.asarray(Sw))
    wfold = wfold.reshape(C_MID, HW, Q)         # (6, H*W, 462)

    b2row = jnp.repeat(b2, Hout * Wout).reshape(1, Q)

    x3 = x.reshape(N, C_IN, HW)                 # metadata-only reshape

    flops = int(N * (2 * C_MID * C_IN * HW + 2 * C_MID * HW * Q))
    bytes_accessed = int(4 * (x3.size + wfold.size + b2row.size
                              + w1m.size + b1.size + N * Q))

    out = pl.pallas_call(
        _fused_kernel,
        out_shape=jax.ShapeDtypeStruct((N, 1, Q), jnp.float32),
        grid=(N,),
        in_specs=[
            pl.BlockSpec((1, C_IN, HW), lambda n: (n, 0, 0)),           # x
            pl.BlockSpec((C_MID, C_IN), lambda n: (0, 0),
                         memory_space=pltpu.MemorySpace.SMEM),          # w1m
            pl.BlockSpec((C_MID,), lambda n: (0,),
                         memory_space=pltpu.MemorySpace.SMEM),          # b1
            pl.BlockSpec((1, Q), lambda n: (0, 0)),                     # b2row
            pl.BlockSpec((C_MID, HW, Q), lambda n: (0, 0, 0)),          # wfold
        ],
        out_specs=pl.BlockSpec((1, 1, Q), lambda n: (n, 0, 0)),
        compiler_params=pltpu.CompilerParams(
            dimension_semantics=("parallel",),
            # resident per step: wfold ~2.8 MiB + double-buffered x/out/bias
            # blocks (few KiB) -> well under 16 MiB on every generation.
            vmem_limit_bytes=16 * 1024 * 1024),
        cost_estimate=pl.CostEstimate(flops=flops, transcendentals=0,
                                      bytes_accessed=bytes_accessed),
    )(x3, w1m, b1, b2row, wfold)

    # (N, 1, Q) -> (N, C_OUT, Hout, Wout): pure metadata, no transpose needed.
    return out.reshape(N, C_OUT, Hout, Wout)


# ----------------------------- pure-JAX reference -------------------------- #
def reference_forward(x, w1, b1, w2, b2):
    N, C, H, W = x.shape
    y = jnp.einsum('nchw,oc->nohw', x, w1[:, :, 0]) + b1[None, :, None, None]
    y = y.reshape(N, -1)
    H2, W2 = H, y.shape[1] // (4 * H)
    z = y.reshape(N, 4, H2, W2)
    out = lax.conv_general_dilated(
        z, w2, window_strides=(2, 2), padding='VALID',
        dimension_numbers=('NCHW', 'OIHW', 'NCHW'))
    return out + b2[None, :, None, None]


# ----------------------------------- main ----------------------------------- #
if __name__ == "__main__":
    key = jax.random.PRNGKey(0)
    kx, k1, k2, k3, k4 = jax.random.split(key, 5)

    N, C, H, W = 2, 4, 16, 16
    x = jax.random.normal(kx, (N, C, H, W), dtype=jnp.float32)

    # deterministic parameter init (shapes from the module's __init__)
    w1 = 0.2 * jax.random.normal(k1, (6, 4, 1), dtype=jnp.float32)     # Conv1d
    b1 = 0.1 * jax.random.normal(k2, (6,), dtype=jnp.float32)
    w2 = 0.2 * jax.random.normal(k3, (6, 4, 3, 3), dtype=jnp.float32)  # Conv2d
    b2 = 0.1 * jax.random.normal(k4, (6,), dtype=jnp.float32)

    out = jax.jit(model_forward)(x, w1, b1, w2, b2)
    out = jax.block_until_ready(out)

    ref = reference_forward(x, w1, b1, w2, b2)
    assert out.shape == ref.shape, (out.shape, ref.shape)
    assert jnp.allclose(out, ref, rtol=1e-2, atol=1e-2), float(
        jnp.max(jnp.abs(out - ref)))

    print("KERNEL_OK")
</pallas_src>

<mosaic_0001>
module attributes {stable_mosaic.version = 11 : i64} {
  func.func @_fused_kernel(%arg0: i32, %arg1: memref<1x4x256xf32, #tpu.memory_space<vmem>>, %arg2: memref<6x4xf32, #tpu.memory_space<smem>>, %arg3: memref<6xf32, #tpu.memory_space<smem>>, %arg4: memref<1x462xf32, #tpu.memory_space<vmem>>, %arg5: memref<6x256x462xf32, #tpu.memory_space<vmem>>, %arg6: memref<1x1x462xf32, #tpu.memory_space<vmem>>) attributes {dimension_semantics = [#tpu.dimension_semantics<parallel>], iteration_bounds = array<i64: 2>, scalar_prefetch = 0 : i64, scratch_operands = 0 : i64, tpu.core_type = #tpu.core_type<tc>, window_params = [{transform_indices = @transform_0, window_bounds = array<i64: 1, 4, 256>}, {transform_indices = @transform_1, window_bounds = array<i64: 6, 4>}, {transform_indices = @transform_2, window_bounds = array<i64: 6>}, {pipeline_mode = #tpu.pipeline_mode<synchronous>, transform_indices = @transform_3, window_bounds = array<i64: 1, 462>}, {pipeline_mode = #tpu.pipeline_mode<synchronous>, transform_indices = @transform_4, window_bounds = array<i64: 6, 256, 462>}, {transform_indices = @transform_5, window_bounds = array<i64: 1, 1, 462>}]} {
    %c0 = arith.constant 0 : index
    %c0_0 = arith.constant 0 : index
    %c0_1 = arith.constant 0 : index
    %0 = vector.load %arg1[%c0, %c0_0, %c0_1] : memref<1x4x256xf32, #tpu.memory_space<vmem>>, vector<1x4x256xf32>
    %1 = vector.shape_cast %0 : vector<1x4x256xf32> to vector<4x256xf32>
    %c0_2 = arith.constant 0 : index
    %c0_3 = arith.constant 0 : index
    %2 = vector.load %arg4[%c0_2, %c0_3] : memref<1x462xf32, #tpu.memory_space<vmem>>, vector<1x462xf32>
    %3 = vector.extract_strided_slice %1 {offsets = [0, 0], sizes = [1, 256], strides = [1, 1]} : vector<4x256xf32> to vector<1x256xf32>
    %c0_4 = arith.constant 0 : index
    %c0_5 = arith.constant 0 : index
    %4 = memref.load %arg2[%c0_4, %c0_5] : memref<6x4xf32, #tpu.memory_space<smem>>
    %5 = vector.broadcast %4 : f32 to vector<1x256xf32>
    %6 = arith.mulf %3, %5 : vector<1x256xf32>
    %7 = vector.extract_strided_slice %1 {offsets = [1, 0], sizes = [1, 256], strides = [1, 1]} : vector<4x256xf32> to vector<1x256xf32>
    %c0_6 = arith.constant 0 : index
    %c1 = arith.constant 1 : index
    %8 = memref.load %arg2[%c0_6, %c1] : memref<6x4xf32, #tpu.memory_space<smem>>
    %9 = vector.broadcast %8 : f32 to vector<1x256xf32>
    %10 = arith.mulf %7, %9 : vector<1x256xf32>
    %11 = arith.addf %6, %10 : vector<1x256xf32>
    %12 = vector.extract_strided_slice %1 {offsets = [2, 0], sizes = [1, 256], strides = [1, 1]} : vector<4x256xf32> to vector<1x256xf32>
    %c0_7 = arith.constant 0 : index
    %c2 = arith.constant 2 : index
    %13 = memref.load %arg2[%c0_7, %c2] : memref<6x4xf32, #tpu.memory_space<smem>>
    %14 = vector.broadcast %13 : f32 to vector<1x256xf32>
    %15 = arith.mulf %12, %14 : vector<1x256xf32>
    %16 = arith.addf %11, %15 : vector<1x256xf32>
    %17 = vector.extract_strided_slice %1 {offsets = [3, 0], sizes = [1, 256], strides = [1, 1]} : vector<4x256xf32> to vector<1x256xf32>
    %c0_8 = arith.constant 0 : index
    %c3 = arith.constant 3 : index
    %18 = memref.load %arg2[%c0_8, %c3] : memref<6x4xf32, #tpu.memory_space<smem>>
    %19 = vector.broadcast %18 : f32 to vector<1x256xf32>
    %20 = arith.mulf %17, %19 : vector<1x256xf32>
    %21 = arith.addf %16, %20 : vector<1x256xf32>
    %c0_9 = arith.constant 0 : index
    %22 = memref.load %arg3[%c0_9] : memref<6xf32, #tpu.memory_space<smem>>
    %23 = vector.broadcast %22 : f32 to vector<1x256xf32>
    %24 = arith.addf %21, %23 : vector<1x256xf32>
    %c0_10 = arith.constant 0 : index
    %c0_11 = arith.constant 0 : index
    %c0_12 = arith.constant 0 : index
    %25 = vector.load %arg5[%c0_10, %c0_11, %c0_12] : memref<6x256x462xf32, #tpu.memory_space<vmem>>, vector<1x256x462xf32>
    %26 = vector.shape_cast %25 : vector<1x256x462xf32> to vector<256x462xf32>
    %cst = arith.constant dense<0.000000e+00> : vector<1x462xf32>
    %27 = tpu.matmul %24, %26, %cst {dimension_numbers = #tpu.dot_dimension_numbers<[1], [0], [0], [1], [0, 0, 1, 1], [], []>} : vector<1x256xf32>, vector<256x462xf32>, vector<1x462xf32> -> vector<1x462xf32>
    %28 = arith.addf %2, %27 : vector<1x462xf32>
    %29 = vector.extract_strided_slice %1 {offsets = [0, 0], sizes = [1, 256], strides = [1, 1]} : vector<4x256xf32> to vector<1x256xf32>
    %c1_13 = arith.constant 1 : index
    %c0_14 = arith.constant 0 : index
    %30 = memref.load %arg2[%c1_13, %c0_14] : memref<6x4xf32, #tpu.memory_space<smem>>
    %31 = vector.broadcast %30 : f32 to vector<1x256xf32>
    %32 = arith.mulf %29, %31 : vector<1x256xf32>
    %33 = vector.extract_strided_slice %1 {offsets = [1, 0], sizes = [1, 256], strides = [1, 1]} : vector<4x256xf32> to vector<1x256xf32>
    %c1_15 = arith.constant 1 : index
    %c1_16 = arith.constant 1 : index
    %34 = memref.load %arg2[%c1_15, %c1_16] : memref<6x4xf32, #tpu.memory_space<smem>>
    %35 = vector.broadcast %34 : f32 to vector<1x256xf32>
    %36 = arith.mulf %33, %35 : vector<1x256xf32>
    %37 = arith.addf %32, %36 : vector<1x256xf32>
    %38 = vector.extract_strided_slice %1 {offsets = [2, 0], sizes = [1, 256], strides = [1, 1]} : vector<4x256xf32> to vector<1x256xf32>
    %c1_17 = arith.constant 1 : index
    %c2_18 = arith.constant 2 : index
    %39 = memref.load %arg2[%c1_17, %c2_18] : memref<6x4xf32, #tpu.memory_space<smem>>
    %40 = vector.broadcast %39 : f32 to vector<1x256xf32>
    %41 = arith.mulf %38, %40 : vector<1x256xf32>
    %42 = arith.addf %37, %41 : vector<1x256xf32>
    %43 = vector.extract_strided_slice %1 {offsets = [3, 0], sizes = [1, 256], strides = [1, 1]} : vector<4x256xf32> to vector<1x256xf32>
    %c1_19 = arith.constant 1 : index
    %c3_20 = arith.constant 3 : index
    %44 = memref.load %arg2[%c1_19, %c3_20] : memref<6x4xf32, #tpu.memory_space<smem>>
    %45 = vector.broadcast %44 : f32 to vector<1x256xf32>
    %46 = arith.mulf %43, %45 : vector<1x256xf32>
    %47 = arith.addf %42, %46 : vector<1x256xf32>
    %c1_21 = arith.constant 1 : index
    %48 = memref.load %arg3[%c1_21] : memref<6xf32, #tpu.memory_space<smem>>
    %49 = vector.broadcast %48 : f32 to vector<1x256xf32>
    %50 = arith.addf %47, %49 : vector<1x256xf32>
    %c1_22 = arith.constant 1 : index
    %c0_23 = arith.constant 0 : index
    %c0_24 = arith.constant 0 : index
    %51 = vector.load %arg5[%c1_22, %c0_23, %c0_24] : memref<6x256x462xf32, #tpu.memory_space<vmem>>, vector<1x256x462xf32>
    %52 = vector.shape_cast %51 : vector<1x256x462xf32> to vector<256x462xf32>
    %cst_25 = arith.constant dense<0.000000e+00> : vector<1x462xf32>
    %53 = tpu.matmul %50, %52, %cst_25 {dimension_numbers = #tpu.dot_dimension_numbers<[1], [0], [0], [1], [0, 0, 1, 1], [], []>} : vector<1x256xf32>, vector<256x462xf32>, vector<1x462xf32> -> vector<1x462xf32>
    %54 = arith.addf %28, %53 : vector<1x462xf32>
    %55 = vector.extract_strided_slice %1 {offsets = [0, 0], sizes = [1, 256], strides = [1, 1]} : vector<4x256xf32> to vector<1x256xf32>
    %c2_26 = arith.constant 2 : index
    %c0_27 = arith.constant 0 : index
    %56 = memref.load %arg2[%c2_26, %c0_27] : memref<6x4xf32, #tpu.memory_space<smem>>
    %57 = vector.broadcast %56 : f32 to vector<1x256xf32>
    %58 = arith.mulf %55, %57 : vector<1x256xf32>
    %59 = vector.extract_strided_slice %1 {offsets = [1, 0], sizes = [1, 256], strides = [1, 1]} : vector<4x256xf32> to vector<1x256xf32>
    %c2_28 = arith.constant 2 : index
    %c1_29 = arith.constant 1 : index
    %60 = memref.load %arg2[%c2_28, %c1_29] : memref<6x4xf32, #tpu.memory_space<smem>>
    %61 = vector.broadcast %60 : f32 to vector<1x256xf32>
    %62 = arith.mulf %59, %61 : vector<1x256xf32>
    %63 = arith.addf %58, %62 : vector<1x256xf32>
    %64 = vector.extract_strided_slice %1 {offsets = [2, 0], sizes = [1, 256], strides = [1, 1]} : vector<4x256xf32> to vector<1x256xf32>
    %c2_30 = arith.constant 2 : index
    %c2_31 = arith.constant 2 : index
    %65 = memref.load %arg2[%c2_30, %c2_31] : memref<6x4xf32, #tpu.memory_space<smem>>
    %66 = vector.broadcast %65 : f32 to vector<1x256xf32>
    %67 = arith.mulf %64, %66 : vector<1x256xf32>
    %68 = arith.addf %63, %67 : vector<1x256xf32>
    %69 = vector.extract_strided_slice %1 {offsets = [3, 0], sizes = [1, 256], strides = [1, 1]} : vector<4x256xf32> to vector<1x256xf32>
    %c2_32 = arith.constant 2 : index
    %c3_33 = arith.constant 3 : index
    %70 = memref.load %arg2[%c2_32, %c3_33] : memref<6x4xf32, #tpu.memory_space<smem>>
    %71 = vector.broadcast %70 : f32 to vector<1x256xf32>
    %72 = arith.mulf %69, %71 : vector<1x256xf32>
    %73 = arith.addf %68, %72 : vector<1x256xf32>
    %c2_34 = arith.constant 2 : index
    %74 = memref.load %arg3[%c2_34] : memref<6xf32, #tpu.memory_space<smem>>
    %75 = vector.broadcast %74 : f32 to vector<1x256xf32>
    %76 = arith.addf %73, %75 : vector<1x256xf32>
    %c2_35 = arith.constant 2 : index
    %c0_36 = arith.constant 0 : index
    %c0_37 = arith.constant 0 : index
    %77 = vector.load %arg5[%c2_35, %c0_36, %c0_37] : memref<6x256x462xf32, #tpu.memory_space<vmem>>, vector<1x256x462xf32>
    %78 = vector.shape_cast %77 : vector<1x256x462xf32> to vector<256x462xf32>
    %cst_38 = arith.constant dense<0.000000e+00> : vector<1x462xf32>
    %79 = tpu.matmul %76, %78, %cst_38 {dimension_numbers = #tpu.dot_dimension_numbers<[1], [0], [0], [1], [0, 0, 1, 1], [], []>} : vector<1x256xf32>, vector<256x462xf32>, vector<1x462xf32> -> vector<1x462xf32>
    %80 = arith.addf %54, %79 : vector<1x462xf32>
    %81 = vector.extract_strided_slice %1 {offsets = [0, 0], sizes = [1, 256], strides = [1, 1]} : vector<4x256xf32> to vector<1x256xf32>
    %c3_39 = arith.constant 3 : index
    %c0_40 = arith.constant 0 : index
    %82 = memref.load %arg2[%c3_39, %c0_40] : memref<6x4xf32, #tpu.memory_space<smem>>
    %83 = vector.broadcast %82 : f32 to vector<1x256xf32>
    %84 = arith.mulf %81, %83 : vector<1x256xf32>
    %85 = vector.extract_strided_slice %1 {offsets = [1, 0], sizes = [1, 256], strides = [1, 1]} : vector<4x256xf32> to vector<1x256xf32>
    %c3_41 = arith.constant 3 : index
    %c1_42 = arith.constant 1 : index
    %86 = memref.load %arg2[%c3_41, %c1_42] : memref<6x4xf32, #tpu.memory_space<smem>>
    %87 = vector.broadcast %86 : f32 to vector<1x256xf32>
    %88 = arith.mulf %85, %87 : vector<1x256xf32>
    %89 = arith.addf %84, %88 : vector<1x256xf32>
    %90 = vector.extract_strided_slice %1 {offsets = [2, 0], sizes = [1, 256], strides = [1, 1]} : vector<4x256xf32> to vector<1x256xf32>
    %c3_43 = arith.constant 3 : index
    %c2_44 = arith.constant 2 : index
    %91 = memref.load %arg2[%c3_43, %c2_44] : memref<6x4xf32, #tpu.memory_space<smem>>
    %92 = vector.broadcast %91 : f32 to vector<1x256xf32>
    %93 = arith.mulf %90, %92 : vector<1x256xf32>
    %94 = arith.addf %89, %93 : vector<1x256xf32>
    %95 = vector.extract_strided_slice %1 {offsets = [3, 0], sizes = [1, 256], strides = [1, 1]} : vector<4x256xf32> to vector<1x256xf32>
    %c3_45 = arith.constant 3 : index
    %c3_46 = arith.constant 3 : index
    %96 = memref.load %arg2[%c3_45, %c3_46] : memref<6x4xf32, #tpu.memory_space<smem>>
    %97 = vector.broadcast %96 : f32 to vector<1x256xf32>
    %98 = arith.mulf %95, %97 : vector<1x256xf32>
    %99 = arith.addf %94, %98 : vector<1x256xf32>
    %c3_47 = arith.constant 3 : index
    %100 = memref.load %arg3[%c3_47] : memref<6xf32, #tpu.memory_space<smem>>
    %101 = vector.broadcast %100 : f32 to vector<1x256xf32>
    %102 = arith.addf %99, %101 : vector<1x256xf32>
    %c3_48 = arith.constant 3 : index
    %c0_49 = arith.constant 0 : index
    %c0_50 = arith.constant 0 : index
    %103 = vector.load %arg5[%c3_48, %c0_49, %c0_50] : memref<6x256x462xf32, #tpu.memory_space<vmem>>, vector<1x256x462xf32>
    %104 = vector.shape_cast %103 : vector<1x256x462xf32> to vector<256x462xf32>
    %cst_51 = arith.constant dense<0.000000e+00> : vector<1x462xf32>
    %105 = tpu.matmul %102, %104, %cst_51 {dimension_numbers = #tpu.dot_dimension_numbers<[1], [0], [0], [1], [0, 0, 1, 1], [], []>} : vector<1x256xf32>, vector<256x462xf32>, vector<1x462xf32> -> vector<1x462xf32>
    %106 = arith.addf %80, %105 : vector<1x462xf32>
    %107 = vector.extract_strided_slice %1 {offsets = [0, 0], sizes = [1, 256], strides = [1, 1]} : vector<4x256xf32> to vector<1x256xf32>
    %c4 = arith.constant 4 : index
    %c0_52 = arith.constant 0 : index
    %108 = memref.load %arg2[%c4, %c0_52] : memref<6x4xf32, #tpu.memory_space<smem>>
    %109 = vector.broadcast %108 : f32 to vector<1x256xf32>
    %110 = arith.mulf %107, %109 : vector<1x256xf32>
    %111 = vector.extract_strided_slice %1 {offsets = [1, 0], sizes = [1, 256], strides = [1, 1]} : vector<4x256xf32> to vector<1x256xf32>
    %c4_53 = arith.constant 4 : index
    %c1_54 = arith.constant 1 : index
    %112 = memref.load %arg2[%c4_53, %c1_54] : memref<6x4xf32, #tpu.memory_space<smem>>
    %113 = vector.broadcast %112 : f32 to vector<1x256xf32>
    %114 = arith.mulf %111, %113 : vector<1x256xf32>
    %115 = arith.addf %110, %114 : vector<1x256xf32>
    %116 = vector.extract_strided_slice %1 {offsets = [2, 0], sizes = [1, 256], strides = [1, 1]} : vector<4x256xf32> to vector<1x256xf32>
    %c4_55 = arith.constant 4 : index
    %c2_56 = arith.constant 2 : index
    %117 = memref.load %arg2[%c4_55, %c2_56] : memref<6x4xf32, #tpu.memory_space<smem>>
    %118 = vector.broadcast %117 : f32 to vector<1x256xf32>
    %119 = arith.mulf %116, %118 : vector<1x256xf32>
    %120 = arith.addf %115, %119 : vector<1x256xf32>
    %121 = vector.extract_strided_slice %1 {offsets = [3, 0], sizes = [1, 256], strides = [1, 1]} : vector<4x256xf32> to vector<1x256xf32>
    %c4_57 = arith.constant 4 : index
    %c3_58 = arith.constant 3 : index
    %122 = memref.load %arg2[%c4_57, %c3_58] : memref<6x4xf32, #tpu.memory_space<smem>>
    %123 = vector.broadcast %122 : f32 to vector<1x256xf32>
    %124 = arith.mulf %121, %123 : vector<1x256xf32>
    %125 = arith.addf %120, %124 : vector<1x256xf32>
    %c4_59 = arith.constant 4 : index
    %126 = memref.load %arg3[%c4_59] : memref<6xf32, #tpu.memory_space<smem>>
    %127 = vector.broadcast %126 : f32 to vector<1x256xf32>
    %128 = arith.addf %125, %127 : vector<1x256xf32>
    %c4_60 = arith.constant 4 : index
    %c0_61 = arith.constant 0 : index
    %c0_62 = arith.constant 0 : index
    %129 = vector.load %arg5[%c4_60, %c0_61, %c0_62] : memref<6x256x462xf32, #tpu.memory_space<vmem>>, vector<1x256x462xf32>
    %130 = vector.shape_cast %129 : vector<1x256x462xf32> to vector<256x462xf32>
    %cst_63 = arith.constant dense<0.000000e+00> : vector<1x462xf32>
    %131 = tpu.matmul %128, %130, %cst_63 {dimension_numbers = #tpu.dot_dimension_numbers<[1], [0], [0], [1], [0, 0, 1, 1], [], []>} : vector<1x256xf32>, vector<256x462xf32>, vector<1x462xf32> -> vector<1x462xf32>
    %132 = arith.addf %106, %131 : vector<1x462xf32>
    %133 = vector.extract_strided_slice %1 {offsets = [0, 0], sizes = [1, 256], strides = [1, 1]} : vector<4x256xf32> to vector<1x256xf32>
    %c5 = arith.constant 5 : index
    %c0_64 = arith.constant 0 : index
    %134 = memref.load %arg2[%c5, %c0_64] : memref<6x4xf32, #tpu.memory_space<smem>>
    %135 = vector.broadcast %134 : f32 to vector<1x256xf32>
    %136 = arith.mulf %133, %135 : vector<1x256xf32>
    %137 = vector.extract_strided_slice %1 {offsets = [1, 0], sizes = [1, 256], strides = [1, 1]} : vector<4x256xf32> to vector<1x256xf32>
    %c5_65 = arith.constant 5 : index
    %c1_66 = arith.constant 1 : index
    %138 = memref.load %arg2[%c5_65, %c1_66] : memref<6x4xf32, #tpu.memory_space<smem>>
    %139 = vector.broadcast %138 : f32 to vector<1x256xf32>
    %140 = arith.mulf %137, %139 : vector<1x256xf32>
    %141 = arith.addf %136, %140 : vector<1x256xf32>
    %142 = vector.extract_strided_slice %1 {offsets = [2, 0], sizes = [1, 256], strides = [1, 1]} : vector<4x256xf32> to vector<1x256xf32>
    %c5_67 = arith.constant 5 : index
    %c2_68 = arith.constant 2 : index
    %143 = memref.load %arg2[%c5_67, %c2_68] : memref<6x4xf32, #tpu.memory_space<smem>>
    %144 = vector.broadcast %143 : f32 to vector<1x256xf32>
    %145 = arith.mulf %142, %144 : vector<1x256xf32>
    %146 = arith.addf %141, %145 : vector<1x256xf32>
    %147 = vector.extract_strided_slice %1 {offsets = [3, 0], sizes = [1, 256], strides = [1, 1]} : vector<4x256xf32> to vector<1x256xf32>
    %c5_69 = arith.constant 5 : index
    %c3_70 = arith.constant 3 : index
    %148 = memref.load %arg2[%c5_69, %c3_70] : memref<6x4xf32, #tpu.memory_space<smem>>
    %149 = vector.broadcast %148 : f32 to vector<1x256xf32>
    %150 = arith.mulf %147, %149 : vector<1x256xf32>
    %151 = arith.addf %146, %150 : vector<1x256xf32>
    %c5_71 = arith.constant 5 : index
    %152 = memref.load %arg3[%c5_71] : memref<6xf32, #tpu.memory_space<smem>>
    %153 = vector.broadcast %152 : f32 to vector<1x256xf32>
    %154 = arith.addf %151, %153 : vector<1x256xf32>
    %c5_72 = arith.constant 5 : index
    %c0_73 = arith.constant 0 : index
    %c0_74 = arith.constant 0 : index
    %155 = vector.load %arg5[%c5_72, %c0_73, %c0_74] : memref<6x256x462xf32, #tpu.memory_space<vmem>>, vector<1x256x462xf32>
    %156 = vector.shape_cast %155 : vector<1x256x462xf32> to vector<256x462xf32>
    %cst_75 = arith.constant dense<0.000000e+00> : vector<1x462xf32>
    %157 = tpu.matmul %154, %156, %cst_75 {dimension_numbers = #tpu.dot_dimension_numbers<[1], [0], [0], [1], [0, 0, 1, 1], [], []>} : vector<1x256xf32>, vector<256x462xf32>, vector<1x462xf32> -> vector<1x462xf32>
    %158 = arith.addf %132, %157 : vector<1x462xf32>
    %c0_76 = arith.constant 0 : index
    %c0_77 = arith.constant 0 : index
    %c0_78 = arith.constant 0 : index
    %159 = vector.load %arg6[%c0_76, %c0_77, %c0_78] : memref<1x1x462xf32, #tpu.memory_space<vmem>>, vector<1x1x462xf32>
    %160 = vector.shape_cast %159 : vector<1x1x462xf32> to vector<1x462xf32>
    %161 = vector.shape_cast %158 : vector<1x462xf32> to vector<1x1x462xf32>
    tpu.vector_store %arg6[%c0_76, %c0_77, %c0_78], %161 {strides = array<i32>} : memref<1x1x462xf32, #tpu.memory_space<vmem>>, vector<1x1x462xf32>,
    return
  }
  func.func @transform_0(%arg0: i32) -> (i32, i32, i32) {
    %c0_i32 = arith.constant 0 : i32
    %c0_i32_0 = arith.constant 0 : i32
    %c0_i32_1 = arith.constant 0 : i32
    return %arg0, %c0_i32, %c0_i32_0 : i32, i32, i32
  }
  func.func @transform_1(%arg0: i32) -> (i32, i32) {
    %c0_i32 = arith.constant 0 : i32
    %c0_i32_0 = arith.constant 0 : i32
    %c0_i32_1 = arith.constant 0 : i32
    return %c0_i32, %c0_i32_0 : i32, i32
  }
  func.func @transform_2(%arg0: i32) -> i32 {
    %c0_i32 = arith.constant 0 : i32
    %c0_i32_0 = arith.constant 0 : i32
    return %c0_i32 : i32
  }
  func.func @transform_3(%arg0: i32) -> (i32, i32) {
    %c0_i32 = arith.constant 0 : i32
    %c0_i32_0 = arith.constant 0 : i32
    %c0_i32_1 = arith.constant 0 : i32
    return %c0_i32, %c0_i32_0 : i32, i32
  }
  func.func @transform_4(%arg0: i32) -> (i32, i32, i32) {
    %c0_i32 = arith.constant 0 : i32
    %c0_i32_0 = arith.constant 0 : i32
    %c0_i32_1 = arith.constant 0 : i32
    %c0_i32_2 = arith.constant 0 : i32
    return %c0_i32, %c0_i32_0, %c0_i32_1 : i32, i32, i32
  }
  func.func @transform_5(%arg0: i32) -> (i32, i32, i32) {
    %c0_i32 = arith.constant 0 : i32
    %c0_i32_0 = arith.constant 0 : i32
    %c0_i32_1 = arith.constant 0 : i32
    return %arg0, %c0_i32, %c0_i32_0 : i32, i32, i32
  }
}

</mosaic_0001>

<bundles_post_ra>
// kernel: model_forward.1
= control target key start
LH: loop header
LB: loop body
LE: loop exit
PB: predicated region body
PF: predicated region fallthrough
CT: control target
= control target key end

     0   :  { %10 = vsyncpa [#allocation3], 0  ;;  %s5712_s0 = inlined_call_operand.vmem [shape: f32[2,4,256], index: 0, kind: input, shape index: {}]   ;;  %s5713_s1 = inlined_call_operand.vmem [shape: f32[6,4], index: 1, kind: input, shape index: {}]   ;;  %s5714_s2 = inlined_call_operand.vmem [shape: f32[6], index: 2, kind: input, shape index: {}]   ;;  %s5715_s3 = inlined_call_operand.vmem [shape: f32[1,462], index: 3, kind: input, shape index: {}]   ;;  %s5716_s4 = inlined_call_operand.vmem [shape: f32[6,256,462], index: 4, kind: input, shape index: {}]   ;;  %s5717_s5 = inlined_call_operand.vmem [shape: f32[2,1,462], index: 5, kind: output, shape index: {}]  }
   0x1   :  { %11 = vsyncpa [#allocation5], 0  ;;  %s3195_s18 = smov 0  }
   0x2 LB: > { %s3201_s19 = sadd.s32 4294967295, %s3160_s18   ;;  %p2385_p0 = scmp.ge.s32.totalorder %s3160_s18, 1  ;;  %s3160_s18 = sphi %s3195_s18, %s17_s18  }
   0x3   : > { %p158_p1 = scmp.lt.s32.totalorder %s3160_s18, 3  ;;  %s171_s22 = sshll.u32 %s5713_s1, 4  ;;  %s172_s22 = int_to_ptr.vmem [resolvable:$true] %s171_s22 }
   0x4   : > { %p5718_p3 = scmp.eq.s32.totalorder %s3201_s19, 0  ;;  %s182_s26 = sshll.u32 %s5714_s2, 4  ;;  %s183_s26 = int_to_ptr.vmem [resolvable:$true] %s182_s26 }
   0x5   : > { %p3208_p2 = pnand %p2385_p0, %p158_p1  ;;  %s3116_s28 = scalar_lea.vmem %s172_s22, 128 }
   0x6   : > { %p3117_p6 = scmp.ne.s32.totalorder %s172_s22, %s3116_s28  ;;  %p3124_p10 = scmp.lt.s32.totalorder %s172_s22, %s172_s22 }
   0x7   : > { %s5720_s23 = scalar_select %p3208_p2, 1, 0 }
   0x8   : > { %p3092_p4 = pneg %p3208_p2  ;;  %p3125_p11 = scmp.lt.s32.totalorder %s3116_s28, %s3116_s28 }
   0xa   : > { %p3220_p5 = pnand %p5718_p3, %p3092_p4  ;;  %p3126_p12 = por %p3125_p11, %p3124_p10 }
   0xc   : > { %p3118_p7 = pneg %p3220_p5 }
   0xe   : > { %p3119_p8 = pnand %p3118_p7, %p3117_p6 }
  0x10   : > { %p3120_p9 = pneg %p3119_p8 }
  0x12   : > { %p3127_p13 = pnand %p3126_p12, %p3120_p9 }
  0x14   : > { %3130 = shalt.err (!%p3127_p13)
}
  0x15   : > { %s3162_s29 = smov [#allocation2]   ;;  %s3131_s30 = scalar_lea.vmem %s183_s26, 16 }
  0x16   : > { %3095 = dma.vmem_to_smem (!%p3220_p5), %s172_s22, 128, %s3162_s29, [#allocation3]  }
  0x17   : > { %p3132_p0 = scmp.ne.s32.totalorder %s183_s26, %s3131_s30  ;;  %p3139_p3 = scmp.lt.s32.totalorder %s183_s26, %s183_s26 }
  0x18   : > { %p3140_p2 = scmp.lt.s32.totalorder %s3131_s30, %s3131_s30 }
  0x19   : > { %p3134_p1 = pnand %p3132_p0, %p3118_p7 }
  0x1a   : > { %p3141_p6 = por %p3140_p2, %p3139_p3 }
  0x1b   : > { %p3135_p4 = pneg %p3134_p1 }
  0x1d   : > { %p3142_p8 = pnand %p3141_p6, %p3135_p4 }
  0x1f   : > { %3145 = shalt.err (!%p3142_p8)
}
  0x20   : > { %s3163_s6 = smov [#allocation4]   ;;  %p5722_p9 = scmp.ne.s32.totalorder %s5720_s23, 0 }
  0x21   : > { %3098 = dma.vmem_to_smem (!%p3220_p5), %s183_s26, 16, %s3163_s6, [#allocation5]  }
  0x22   : > { %209 = sbr.rel (%p5722_p9) target bundleno = 648 (0x288), region = 40  ;;  %p5723_p10 = scmp.eq.s32.totalorder (!%p5722_p9), %s3201_s19, 0 }
  0x27   : > { %3151 = dma.done.wait (%p5723_p10), [#allocation3], 128   ;;  %p5724_p11 = pmov %p5723_p10 }
  0x28   : > { %p5725_p7 = pmov %p5723_p10 }
  0x29   : > { %3153 = vsyncadd (%p5724_p11), [#allocation3], 4294967168 }
  0x2a   : > { %3155 = dma.done.wait (%p5725_p7), [#allocation5], 16   ;;  %p5726_p2 = pmov %p5725_p7 }
  0x2c   : > { %3157 = vsyncadd (%p5726_p2), [#allocation5], 4294967280 }
  0x2d   : > { %219 = sfence }
  0x2e   : > { %v343_v0 = vld [vmem:[%s5716_s4 + $0x1e8] sm:$0xff]  ;;  %v345_v1 = vld [vmem:[%s5716_s4 + $0x1f8] sm:$0xff]  ;;  %v342_v2 = vld [vmem:[%s5716_s4 + $0x1e0] sm:$0xff]  ;;  %p241_p3 = scmp.lt.s32.totalorder %s3201_s19, 1  ;;  %s3433_s22 = sld [smem:[#allocation2]] }
  0x2f   : > { %421 = vmatprep.subr.mxu0 %v343_v0  ;;  %492 = vmatprep.subr.mxu1 %v345_v1  ;;  %v344_v3 = vld [vmem:[%s5716_s4 + $0x1f0] sm:$0xff]  ;;  %v339_v4 = vld [vmem:[%s5716_s4 + $0x1c8] sm:$0xff]  ;;  %v341_v5 = vld [vmem:[%s5716_s4 + $0x1d8] sm:$0xff]  ;;  %s3441_s27 = sld [smem:[#allocation2 + $0x1]] }
  0x30   : > { %422 = vmatpush1.msra.mxu0 %v342_v2  ;;  %493 = vmatpush1.msra.mxu1 %v344_v3  ;;  %v338_v6 = vld [vmem:[%s5716_s4 + $0x1c0] sm:$0xff]  ;;  %v340_v7 = vld [vmem:[%s5716_s4 + $0x1d0] sm:$0xff]  ;;  %v335_v8 = vld [vmem:[%s5716_s4 + $0x1a8] sm:$0xff]  ;;  %s5728_s19 = smov (!%p241_p3, %s3201_s19), 1  ;;  %s3460_s11 = sld [smem:[#allocation2 + $0x2]] }
  0x31   : > { %423 = vmatprep.subr.mxu0 %v339_v4  ;;  %494 = vmatprep.subr.mxu1 %v341_v5  ;;  %v337_v9 = vld [vmem:[%s5716_s4 + $0x1b8] sm:$0xff]  ;;  %v334_v10 = vld [vmem:[%s5716_s4 + $0x1a0] sm:$0xff]  ;;  %v336_v11 = vld [vmem:[%s5716_s4 + $0x1b0] sm:$0xff]  ;;  %s3468_s16 = sld [smem:[#allocation2 + $0x3]]  ;;  %s3083_s8 = sshll.u32 %s5728_s19, 3 }
  0x32   : > { %424 = vmatpush1.msra.mxu0 %v338_v6  ;;  %495 = vmatpush1.msra.mxu1 %v340_v7  ;;  %v331_v12 = vld [vmem:[%s5716_s4 + $0x188] sm:$0xff]  ;;  %v333_v13 = vld [vmem:[%s5716_s4 + $0x198] sm:$0xff]  ;;  %v330_v14 = vld [vmem:[%s5716_s4 + $0x180] sm:$0xff]  ;;  %s3510_s29 = scalar_lea.vmem %s5712_s0, %s3083_s8  ;;  %s3559_s7 = sld [smem:[#allocation4]] }
  0x33   : > { %425 = vmatprep.subr.mxu0 %v335_v8  ;;  %496 = vmatprep.subr.mxu1 %v337_v9  ;;  %v332_v15 = vld [vmem:[%s5716_s4 + $0x190] sm:$0xff]  ;;  %v327_v16 = vld [vmem:[%s5716_s4 + $0x168] sm:$0xff]  ;;  %v329_v17 = vld [vmem:[%s5716_s4 + $0x178] sm:$0xff]  ;;  %s3837_s10 = sld [smem:[#allocation2 + $0x81]] }
  0x34   : > { %426 = vmatpush1.msra.mxu0 %v334_v10  ;;  %497 = vmatpush1.msra.mxu1 %v336_v11  ;;  %v326_v18 = vld [vmem:[%s5716_s4 + $0x160] sm:$0xff]  ;;  %v328_v19 = vld [vmem:[%s5716_s4 + $0x170] sm:$0xff]  ;;  %v323_v20 = vld [vmem:[%s5716_s4 + $0x148] sm:$0xff]  ;;  %s3857_s23 = sld [smem:[#allocation2 + $0x80]] }
  0x35   : > { %427 = vmatprep.subr.mxu0 %v331_v12  ;;  %498 = vmatprep.subr.mxu1 %v333_v13  ;;  %v325_v21 = vld [vmem:[%s5716_s4 + $0x158] sm:$0xff]  ;;  %v322_v22 = vld [vmem:[%s5716_s4 + $0x140] sm:$0xff]  ;;  %v324_v23 = vld [vmem:[%s5716_s4 + $0x150] sm:$0xff]  ;;  %s3892_s25 = sld [smem:[#allocation2 + $0x83]] }
  0x36   : > { %428 = vmatpush1.msra.mxu0 %v330_v14  ;;  %499 = vmatpush1.msra.mxu1 %v332_v15  ;;  %v319_v24 = vld [vmem:[%s5716_s4 + $0x128] sm:$0xff]  ;;  %v321_v25 = vld [vmem:[%s5716_s4 + $0x138] sm:$0xff]  ;;  %v318_v26 = vld [vmem:[%s5716_s4 + $0x120] sm:$0xff]  ;;  %s3973_s12 = sld [smem:[#allocation4 + $0x1]] }
  0x37   : > { %429 = vmatprep.subr.mxu0 %v327_v16  ;;  %500 = vmatprep.subr.mxu1 %v329_v17  ;;  %v320_v27 = vld [vmem:[%s5716_s4 + $0x130] sm:$0xff]  ;;  %v315_v28 = vld [vmem:[%s5716_s4 + $0x108] sm:$0xff]  ;;  %v317_v29 = vld [vmem:[%s5716_s4 + $0x118] sm:$0xff]  ;;  %s4262_s26 = sld [smem:[#allocation2 + $0x100]] }
  0x38   : > { %430 = vmatpush1.msra.mxu0 %v326_v18  ;;  %501 = vmatpush1.msra.mxu1 %v328_v19  ;;  %v314_v30 = vld [vmem:[%s5716_s4 + $0x100] sm:$0xff]  ;;  %v316_v31 = vld [vmem:[%s5716_s4 + $0x110] sm:$0xff]  ;;  %v311_v32 = vld [vmem:[%s5716_s4 + $0xe8] sm:$0xff]  ;;  %s4297_s30 = sld [smem:[#allocation2 + $0x103]] }
  0x39   : > { %431 = vmatprep.subr.mxu0 %v323_v20  ;;  %502 = vmatprep.subr.mxu1 %v325_v21  ;;  %v313_v33 = vld [vmem:[%s5716_s4 + $0xf8] sm:$0xff]  ;;  %v310_v34 = vld [vmem:[%s5716_s4 + $0xe0] sm:$0xff]  ;;  %v312_v35 = vld [vmem:[%s5716_s4 + $0xf0] sm:$0xff]  ;;  %v253_v20 = vstv %s3433_s22  ;;  %s4242_s22 = sld [smem:[#allocation2 + $0x101]] }
  0x3a   : > { %432 = vmatpush1.msra.mxu0 %v322_v22  ;;  %503 = vmatpush1.msra.mxu1 %v324_v23  ;;  %v307_v36 = vld [vmem:[%s5716_s4 + $0xc8] sm:$0xff]  ;;  %v309_v37 = vld [vmem:[%s5716_s4 + $0xd8] sm:$0xff]  ;;  %v306_v38 = vld [vmem:[%s5716_s4 + $0xc0] sm:$0xff]  ;;  %v256_v23 = vstv %s3441_s27  ;;  %s4381_s8 = sld [smem:[#allocation4 + $0x2]] }
  0x3b   : > { %433 = vmatprep.subr.mxu0 %v319_v24  ;;  %504 = vmatprep.subr.mxu1 %v321_v25  ;;  %v308_v39 = vld [vmem:[%s5716_s4 + $0xd0] sm:$0xff]  ;;  %v303_v40 = vld [vmem:[%s5716_s4 + $0xa8] sm:$0xff]  ;;  %v305_v41 = vld [vmem:[%s5716_s4 + $0xb8] sm:$0xff]  ;;  %v264_v24 = vstv %s3460_s11  ;;  %s4650_s13 = sld [smem:[#allocation2 + $0x181]] }
  0x3c   : > { %434 = vmatpush1.msra.mxu0 %v318_v26  ;;  %505 = vmatpush1.msra.mxu1 %v320_v27  ;;  %v302_v42 = vld [vmem:[%s5716_s4 + $0xa0] sm:$0xff]  ;;  %v304_v43 = vld [vmem:[%s5716_s4 + $0xb0] sm:$0xff]  ;;  %v299_v44 = vld [vmem:[%s5716_s4 + $0x88] sm:$0xff]  ;;  %v272_v27 = vstv %s3468_s16  ;;  %s4670_s6 = sld [smem:[#allocation2 + $0x180]] }
  0x3d   : > { %435 = vmatprep.subr.mxu0 %v315_v28  ;;  %506 = vmatprep.subr.mxu1 %v317_v29  ;;  %v301_v45 = vld [vmem:[%s5716_s4 + $0x98] sm:$0xff]  ;;  %v298_v46 = vld [vmem:[%s5716_s4 + $0x80] sm:$0xff]  ;;  %v300_v47 = vld [vmem:[%s5716_s4 + $0x90] sm:$0xff]  ;;  %s4786_s14 = sld [smem:[#allocation4 + $0x3]] }
  0x3e   : > { %436 = vmatpush1.msra.mxu0 %v314_v30  ;;  %507 = vmatpush1.msra.mxu1 %v316_v31  ;;  %v295_v48 = vld [vmem:[%s5716_s4 + $0x68] sm:$0xff]  ;;  %v297_v49 = vld [vmem:[%s5716_s4 + $0x78] sm:$0xff]  ;;  %v294_v50 = vld [vmem:[%s5716_s4 + $0x60] sm:$0xff]  ;;  %s5055_s15 = sld [smem:[#allocation2 + $0x201]] }
  0x3f   : > { %437 = vmatprep.subr.mxu0 %v311_v32  ;;  %508 = vmatprep.subr.mxu1 %v313_v33  ;;  %v296_v51 = vld [vmem:[%s5716_s4 + $0x70] sm:$0xff]  ;;  %v291_v52 = vld [vmem:[%s5716_s4 + $0x48] sm:$0xff]  ;;  %v293_v53 = vld [vmem:[%s5716_s4 + $0x58] sm:$0xff]  ;;  %s5075_s9 = sld [smem:[#allocation2 + $0x200]] }
  0x40   : > { %438 = vmatpush1.msra.mxu0 %v310_v34  ;;  %509 = vmatpush1.msra.mxu1 %v312_v35  ;;  %v290_v54 = vld [vmem:[%s5716_s4 + $0x40] sm:$0xff]  ;;  %v292_v55 = vld [vmem:[%s5716_s4 + $0x50] sm:$0xff]  ;;  %v287_v56 = vld [vmem:[%s5716_s4 + $0x28] sm:$0xff]  ;;  %s5483_s16 = sld [smem:[#allocation2 + $0x280]] }
  0x41   : > { %439 = vmatprep.subr.mxu0 %v307_v36  ;;  %510 = vmatprep.subr.mxu1 %v309_v37  ;;  %v289_v57 = vld [vmem:[%s5716_s4 + $0x38] sm:$0xff]  ;;  %v286_v58 = vld [vmem:[%s5716_s4 + $0x20] sm:$0xff]  ;;  %v288_v59 = vld [vmem:[%s5716_s4 + $0x30] sm:$0xff]  ;;  %s5518_s21 = sld [smem:[#allocation2 + $0x283]] }
  0x42   : > { %440 = vmatpush1.msra.mxu0 %v306_v38  ;;  %511 = vmatpush1.msra.mxu1 %v308_v39  ;;  %v283_v60 = vld [vmem:[%s5716_s4 + $0x8] sm:$0xff]  ;;  %v285_v61 = vld [vmem:[%s5716_s4 + $0x18] sm:$0xff]  ;;  %v282_v62 = vld [vmem:[%s5716_s4] sm:$0xff] }
  0x43   : > { %441 = vmatprep.subr.mxu0 %v303_v40  ;;  %512 = vmatprep.subr.mxu1 %v305_v41  ;;  %v284_v63 = vld [vmem:[%s5716_s4 + $0x10] sm:$0xff]  ;;  %v407_v0 = vld [vmem:[%s5716_s4 + $0x3e8] sm:$0xff]  ;;  %v409_v1 = vld [vmem:[%s5716_s4 + $0x3f8] sm:$0xff] }
  0x44   : > { %442 = vmatpush1.msra.mxu0 %v302_v42  ;;  %513 = vmatpush1.msra.mxu1 %v304_v43  ;;  %v406_v2 = vld [vmem:[%s5716_s4 + $0x3e0] sm:$0xff]  ;;  %v408_v3 = vld [vmem:[%s5716_s4 + $0x3f0] sm:$0xff]  ;;  %v403_v4 = vld [vmem:[%s5716_s4 + $0x3c8] sm:$0xff] }
  0x45   : > { %443 = vmatprep.subr.mxu0 %v299_v44  ;;  %514 = vmatprep.subr.mxu1 %v301_v45  ;;  %v405_v5 = vld [vmem:[%s5716_s4 + $0x3d8] sm:$0xff]  ;;  %v402_v6 = vld [vmem:[%s5716_s4 + $0x3c0] sm:$0xff]  ;;  %v404_v7 = vld [vmem:[%s5716_s4 + $0x3d0] sm:$0xff] }
  0x46   : > { %444 = vmatpush1.msra.mxu0 %v298_v46  ;;  %515 = vmatpush1.msra.mxu1 %v300_v47  ;;  %v399_v8 = vld [vmem:[%s5716_s4 + $0x3a8] sm:$0xff]  ;;  %v401_v9 = vld [vmem:[%s5716_s4 + $0x3b8] sm:$0xff]  ;;  %v398_v10 = vld [vmem:[%s5716_s4 + $0x3a0] sm:$0xff] }
  0x47   : > { %445 = vmatprep.subr.mxu0 %v295_v48  ;;  %516 = vmatprep.subr.mxu1 %v297_v49  ;;  %v400_v11 = vld [vmem:[%s5716_s4 + $0x3b0] sm:$0xff]  ;;  %v395_v12 = vld [vmem:[%s5716_s4 + $0x388] sm:$0xff]  ;;  %v397_v13 = vld [vmem:[%s5716_s4 + $0x398] sm:$0xff] }
  0x48   : > { %446 = vmatpush1.msra.mxu0 %v294_v50  ;;  %517 = vmatpush1.msra.mxu1 %v296_v51  ;;  %v394_v14 = vld [vmem:[%s5716_s4 + $0x380] sm:$0xff]  ;;  %v396_v15 = vld [vmem:[%s5716_s4 + $0x390] sm:$0xff]  ;;  %v391_v16 = vld [vmem:[%s5716_s4 + $0x368] sm:$0xff]  ;;  %v411_v51 = vlaneseq }
  0x49   : > { %447 = vmatprep.subr.mxu0 %v291_v52  ;;  %518 = vmatprep.subr.mxu1 %v293_v53  ;;  %v393_v17 = vld [vmem:[%s5716_s4 + $0x378] sm:$0xff]  ;;  %v390_v18 = vld [vmem:[%s5716_s4 + $0x360] sm:$0xff]  ;;  %v392_v19 = vld [vmem:[%s5716_s4 + $0x370] sm:$0xff] }
  0x4a   : > { %448 = vmatpush1.msra.mxu0 %v290_v54  ;;  %519 = vmatpush1.msra.mxu1 %v292_v55  ;;  %v387_v21 = vld [vmem:[%s5716_s4 + $0x348] sm:$0xff]  ;;  %v389_v22 = vld [vmem:[%s5716_s4 + $0x358] sm:$0xff]  ;;  %v386_v25 = vld [vmem:[%s5716_s4 + $0x340] sm:$0xff]  ;;  %vm2305_vm0 = vcmp.lt.s32.totalorder %v411_v51, 462 }
  0x4b   : > { %449 = vmatprep.subr.mxu0 %v287_v56  ;;  %520 = vmatprep.subr.mxu1 %v289_v57  ;;  %v388_v26 = vld [vmem:[%s5716_s4 + $0x350] sm:$0xff]  ;;  %v383_v28 = vld [vmem:[%s5716_s4 + $0x328] sm:$0xff]  ;;  %v385_v29 = vld [vmem:[%s5716_s4 + $0x338] sm:$0xff] }
  0x4c   : > { %450 = vmatpush1.msra.mxu0 %v286_v58  ;;  %521 = vmatpush1.msra.mxu1 %v288_v59  ;;  %v3535_v30 = vld [vmem:[%s3510_s29] sm:$0xff]  ;;  %v384_v32 = vld [vmem:[%s5716_s4 + $0x330] sm:$0xff]  ;;  %v379_v36 = vld [vmem:[%s5716_s4 + $0x308] sm:$0xff] }
  0x4d   : > { %451 = vmatprep.subr.mxu0 %v283_v60  ;;  %522 = vmatprep.subr.mxu1 %v285_v61  ;;  %v382_v31 = vld [vmem:[%s5716_s4 + $0x320] sm:$0xff]  ;;  %v254_v33 = vmul.f32 %v253_v20, %v3535_v30  ;;  %v257_v34 = vmul.f32 %v256_v23, %v3535_v30  ;;  %v265_v35 = vmul.f32 %v264_v24, %v3535_v30  ;;  %v381_v37 = vld [vmem:[%s5716_s4 + $0x318] sm:$0xff]  ;;  %v380_v40 = vld [vmem:[%s5716_s4 + $0x310] sm:$0xff] }
  0x4e   : > { %452 = vmatpush1.msra.mxu0 %v282_v62  ;;  %523 = vmatpush1.msra.mxu1 %v284_v63  ;;  %v273_v38 = vmul.f32 %v272_v27, %v3535_v30  ;;  %v378_v39 = vld [vmem:[%s5716_s4 + $0x300] sm:$0xff]  ;;  %v375_v43 = vld [vmem:[%s5716_s4 + $0x2e8] sm:$0xff]  ;;  %v377_v44 = vld [vmem:[%s5716_s4 + $0x2f8] sm:$0xff]  ;;  %v3604_v62 = vshrl.u32 %v411_v51, 7 }
  0x4f   : > { %453 = vmatprep.subr.mxu0 %v407_v0  ;;  %524 = vmatprep.subr.mxu1 %v409_v1  ;;  %v2396_v41 = vrot.slane %v257_v34, 9  ;;  %v2398_v42 = vrot.slane %v265_v35, 10  ;;  %v374_v45 = vld [vmem:[%s5716_s4 + $0x2e0] sm:$0xff]  ;;  %v376_v46 = vld [vmem:[%s5716_s4 + $0x2f0] sm:$0xff]  ;;  %v371_v48 = vld [vmem:[%s5716_s4 + $0x2c8] sm:$0xff]  ;;  %v280_v1 = vstv %s3559_s7  ;;  %s3865_s7 = sld [smem:[#allocation2 + $0x82]] }
  0x50   : > { %454 = vmatpush2.msra.mxu0 %v406_v2  ;;  %525 = vmatpush2.msra.mxu1 %v408_v3  ;;  %v373_v49 = vld [vmem:[%s5716_s4 + $0x2d8] sm:$0xff]  ;;  %v2400_v50 = vrot.slane %v273_v38, 11  ;;  %v370_v52 = vld [vmem:[%s5716_s4 + $0x2c0] sm:$0xff]  ;;  %v372_v53 = vld [vmem:[%s5716_s4 + $0x2d0] sm:$0xff] }
  0x51   : > { %455 = vmatprep.subr.mxu0 %v403_v4  ;;  %526 = vmatprep.subr.mxu1 %v405_v5  ;;  %v262_v47 = vadd.f32 %v2396_v41, %v254_v33  ;;  %v367_v55 = vld [vmem:[%s5716_s4 + $0x2a8] sm:$0xff]  ;;  %v369_v56 = vld [vmem:[%s5716_s4 + $0x2b8] sm:$0xff]  ;;  %v366_v57 = vld [vmem:[%s5716_s4 + $0x2a0] sm:$0xff] }
  0x52   : > { %456 = vmatpush2.msra.mxu0 %v402_v6  ;;  %527 = vmatpush2.msra.mxu1 %v404_v7  ;;  %v368_v58 = vld [vmem:[%s5716_s4 + $0x2b0] sm:$0xff]  ;;  %v363_v59 = vld [vmem:[%s5716_s4 + $0x288] sm:$0xff]  ;;  %v365_v60 = vld [vmem:[%s5716_s4 + $0x298] sm:$0xff] }
  0x53   : > { %457 = vmatprep.subr.mxu0 %v399_v8  ;;  %528 = vmatprep.subr.mxu1 %v401_v9  ;;  %v270_v54 = vadd.f32 %v2398_v42, %v262_v47  ;;  %v362_v63 = vld [vmem:[%s5716_s4 + $0x280] sm:$0xff]  ;;  %v364_v0 = vld [vmem:[%s5716_s4 + $0x290] sm:$0xff]  ;;  %v359_v2 = vld [vmem:[%s5716_s4 + $0x268] sm:$0xff]  ;;  %v3632_v9 = vsub.s32 4, %v3604_v62 }
  0x54   : > { %458 = vmatpush2.msra.mxu0 %v398_v10  ;;  %529 = vmatpush2.msra.mxu1 %v400_v11  ;;  %v361_v3 = vld [vmem:[%s5716_s4 + $0x278] sm:$0xff]  ;;  %v358_v4 = vld [vmem:[%s5716_s4 + $0x260] sm:$0xff]  ;;  %v360_v5 = vld [vmem:[%s5716_s4 + $0x270] sm:$0xff] }
  0x55   : > { %459 = vmatprep.subr.mxu0 %v395_v12  ;;  %530 = vmatprep.subr.mxu1 %v397_v13  ;;  %v278_v61 = vadd.f32 %v2400_v50, %v270_v54  ;;  %v355_v6 = vld [vmem:[%s5716_s4 + $0x248] sm:$0xff]  ;;  %v357_v7 = vld [vmem:[%s5716_s4 + $0x258] sm:$0xff]  ;;  %v354_v10 = vld [vmem:[%s5716_s4 + $0x240] sm:$0xff] }
  0x56   : > { %460 = vmatpush2.msra.mxu0 %v394_v14  ;;  %531 = vmatpush2.msra.mxu1 %v396_v15  ;;  %v356_v11 = vld [vmem:[%s5716_s4 + $0x250] sm:$0xff]  ;;  %v351_v12 = vld [vmem:[%s5716_s4 + $0x228] sm:$0xff]  ;;  %v353_v13 = vld [vmem:[%s5716_s4 + $0x238] sm:$0xff]  ;;  %v3647_v14 = vsub.s32 0, %v3604_v62 }
  0x57   : > { %461 = vmatprep.subr.mxu0 %v391_v16  ;;  %532 = vmatprep.subr.mxu1 %v393_v17  ;;  %v281_v8 = vadd.f32 %v280_v1, %v278_v61  ;;  %v350_v15 = vld [vmem:[%s5716_s4 + $0x220] sm:$0xff]  ;;  %v352_v16 = vld [vmem:[%s5716_s4 + $0x230] sm:$0xff]  ;;  %v347_v17 = vld [vmem:[%s5716_s4 + $0x208] sm:$0xff] }
  0x58   : > { %462 = vmatpush2.msra.mxu0 %v390_v18  ;;  %533 = vmatpush2.msra.mxu1 %v392_v19  ;;  %v349_v18 = vld [vmem:[%s5716_s4 + $0x218] sm:$0xff]  ;;  %v346_v20 = vld [vmem:[%s5716_s4 + $0x200] sm:$0xff]  ;;  %v2470_v23 = vld [vmem:[%s5716_s4 + $0x5e8] sm:$0xff] }
  0x59   : > { %463 = vmatprep.subr.mxu0 %v387_v21  ;;  %534 = vmatprep.subr.mxu1 %v389_v22  ;;  %v418_v19 = vrot.slane %v281_v8, %v3632_v9  ;;  %v348_v21 = vld [vmem:[%s5716_s4 + $0x210] sm:$0xff]  ;;  %v414_v22 = vrot.slane %v281_v8, %v3647_v14  ;;  %v2472_v24 = vld [vmem:[%s5716_s4 + $0x5f8] sm:$0xff]  ;;  %v2466_v27 = vld [vmem:[%s5716_s4 + $0x5c8] sm:$0xff] }
  0x5a   : > { %464 = vmatpush2.msra.mxu0 %v386_v25  ;;  %535 = vmatpush2.msra.mxu1 %v388_v26  ;;  %v2469_v25 = vld [vmem:[%s5716_s4 + $0x5e0] sm:$0xff]  ;;  %v2471_v26 = vld [vmem:[%s5716_s4 + $0x5f0] sm:$0xff]  ;;  %v2464_v33 = vld [vmem:[%s5716_s4 + $0x5b8] sm:$0xff] }
  0x5b   : > { %465 = vmatprep.subr.mxu0 %v383_v28  ;;  %536 = vmatprep.subr.mxu1 %v385_v29  ;;  %v2468_v28 = vld [vmem:[%s5716_s4 + $0x5d8] sm:$0xff]  ;;  %v2465_v29 = vld [vmem:[%s5716_s4 + $0x5c0] sm:$0xff]  ;;  %v2463_v35 = vld [vmem:[%s5716_s4 + $0x5b0] sm:$0xff] }
  0x5c   : > { %466 = vmatpush2.msra.mxu0 %v382_v31  ;;  %537 = vmatpush2.msra.mxu1 %v384_v32  ;;  %v2467_v31 = vld [vmem:[%s5716_s4 + $0x5d0] sm:$0xff]  ;;  %v2462_v32 = vld [vmem:[%s5716_s4 + $0x5a8] sm:$0xff]  ;;  %v2461_v34 = vld [vmem:[%s5716_s4 + $0x5a0] sm:$0xff] }
  0x5d   : > { %467 = vmatprep.subr.mxu0 %v379_v36  ;;  %538 = vmatprep.subr.mxu1 %v381_v37  ;;  %v2458_v36 = vld [vmem:[%s5716_s4 + $0x588] sm:$0xff]  ;;  %v2460_v37 = vld [vmem:[%s5716_s4 + $0x598] sm:$0xff]  ;;  %v2457_v38 = vld [vmem:[%s5716_s4 + $0x580] sm:$0xff] }
  0x5e   : > { %468 = vmatpush2.msra.mxu0 %v378_v39  ;;  %539 = vmatpush2.msra.mxu1 %v380_v40  ;;  %v2459_v39 = vld [vmem:[%s5716_s4 + $0x590] sm:$0xff]  ;;  %v2454_v40 = vld [vmem:[%s5716_s4 + $0x568] sm:$0xff]  ;;  %v2456_v41 = vld [vmem:[%s5716_s4 + $0x578] sm:$0xff] }
  0x5f   : > { %469 = vmatprep.subr.mxu0 %v375_v43  ;;  %540 = vmatprep.subr.mxu1 %v377_v44  ;;  %v2453_v42 = vld [vmem:[%s5716_s4 + $0x560] sm:$0xff]  ;;  %v2455_v43 = vld [vmem:[%s5716_s4 + $0x570] sm:$0xff]  ;;  %v2450_v44 = vld [vmem:[%s5716_s4 + $0x548] sm:$0xff] }
  0x60   : > { %470 = vmatpush2.msra.mxu0 %v374_v45  ;;  %541 = vmatpush2.msra.mxu1 %v376_v46  ;;  %v2452_v45 = vld [vmem:[%s5716_s4 + $0x558] sm:$0xff]  ;;  %v2449_v46 = vld [vmem:[%s5716_s4 + $0x540] sm:$0xff]  ;;  %v2451_v47 = vld [vmem:[%s5716_s4 + $0x550] sm:$0xff] }
  0x61   : > { %471 = vmatprep.subr.mxu0 %v371_v48  ;;  %542 = vmatprep.subr.mxu1 %v373_v49  ;;  %v2446_v48 = vld [vmem:[%s5716_s4 + $0x528] sm:$0xff]  ;;  %v2448_v49 = vld [vmem:[%s5716_s4 + $0x538] sm:$0xff]  ;;  %v2445_v50 = vld [vmem:[%s5716_s4 + $0x520] sm:$0xff] }
  0x62   : > { %472 = vmatpush2.msra.mxu0 %v370_v52  ;;  %543 = vmatpush2.msra.mxu1 %v372_v53  ;;  %v2447_v52 = vld [vmem:[%s5716_s4 + $0x530] sm:$0xff]  ;;  %v2442_v53 = vld [vmem:[%s5716_s4 + $0x508] sm:$0xff]  ;;  %v2444_v54 = vld [vmem:[%s5716_s4 + $0x518] sm:$0xff] }
  0x63   : > { %473 = vmatprep.subr.mxu0 %v367_v55  ;;  %544 = vmatprep.subr.mxu1 %v369_v56  ;;  %v2441_v55 = vld [vmem:[%s5716_s4 + $0x500] sm:$0xff]  ;;  %v2443_v56 = vld [vmem:[%s5716_s4 + $0x510] sm:$0xff]  ;;  %v2434_v61 = vld [vmem:[%s5716_s4 + $0x4c8] sm:$0xff] }
  0x64   : > { %474 = vmatpush2.msra.mxu0 %v366_v57  ;;  %545 = vmatpush2.msra.mxu1 %v368_v58  ;;  %v2438_v57 = vld [vmem:[%s5716_s4 + $0x4e8] sm:$0xff]  ;;  %v2440_v58 = vld [vmem:[%s5716_s4 + $0x4f8] sm:$0xff]  ;;  %v2435_v1 = vld [vmem:[%s5716_s4 + $0x4d0] sm:$0xff] }
  0x65   : > { %475 = vmatprep.subr.mxu0 %v363_v59  ;;  %546 = vmatprep.subr.mxu1 %v365_v60  ;;  %v2437_v59 = vld [vmem:[%s5716_s4 + $0x4e0] sm:$0xff]  ;;  %v2439_v60 = vld [vmem:[%s5716_s4 + $0x4f0] sm:$0xff] }
  0x66   : > { %476 = vmatpush2.msra.mxu0 %v362_v63  ;;  %547 = vmatpush2.msra.mxu1 %v364_v0  ;;  %v2436_v63 = vld [vmem:[%s5716_s4 + $0x4d8] sm:$0xff]  ;;  %v2433_v0 = vld [vmem:[%s5716_s4 + $0x4c0] sm:$0xff] }
  0x67   : > { %477 = vmatprep.subr.mxu0 %v359_v2  ;;  %548 = vmatprep.subr.mxu1 %v361_v3  ;;  %v2430_v2 = vld [vmem:[%s5716_s4 + $0x4a8] sm:$0xff]  ;;  %v2432_v3 = vld [vmem:[%s5716_s4 + $0x4b8] sm:$0xff]  ;;  %v2425_v8 = vld [vmem:[%s5716_s4 + $0x480] sm:$0xff] }
  0x68   : > { %478 = vmatpush2.msra.mxu0 %v358_v4  ;;  %549 = vmatpush2.msra.mxu1 %v360_v5  ;;  %v2429_v4 = vld [vmem:[%s5716_s4 + $0x4a0] sm:$0xff]  ;;  %v2431_v5 = vld [vmem:[%s5716_s4 + $0x4b0] sm:$0xff] }
  0x69   : > { %479 = vmatprep.subr.mxu0 %v355_v6  ;;  %550 = vmatprep.subr.mxu1 %v357_v7  ;;  %v2426_v6 = vld [vmem:[%s5716_s4 + $0x488] sm:$0xff]  ;;  %v2428_v7 = vld [vmem:[%s5716_s4 + $0x498] sm:$0xff] }
  0x6a   : > { %480 = vmatpush2.msra.mxu0 %v354_v10  ;;  %551 = vmatpush2.msra.mxu1 %v356_v11  ;;  %v2427_v10 = vld [vmem:[%s5716_s4 + $0x490] sm:$0xff]  ;;  %v2422_v11 = vld [vmem:[%s5716_s4 + $0x468] sm:$0xff] }
  0x6b   : > { %481 = vmatprep.subr.mxu0 %v351_v12  ;;  %552 = vmatprep.subr.mxu1 %v353_v13  ;;  %v2424_v12 = vld [vmem:[%s5716_s4 + $0x478] sm:$0xff]  ;;  %v2421_v13 = vld [vmem:[%s5716_s4 + $0x460] sm:$0xff] }
  0x6c   : > { %482 = vmatpush2.msra.mxu0 %v350_v15  ;;  %553 = vmatpush2.msra.mxu1 %v352_v16  ;;  %v2423_v15 = vld [vmem:[%s5716_s4 + $0x470] sm:$0xff]  ;;  %v2418_v16 = vld [vmem:[%s5716_s4 + $0x448] sm:$0xff] }
  0x6d   : > { %483 = vmatprep.subr.mxu0 %v347_v17  ;;  %554 = vmatprep.subr.mxu1 %v349_v18  ;;  %v2420_v17 = vld [vmem:[%s5716_s4 + $0x458] sm:$0xff]  ;;  %v2417_v18 = vld [vmem:[%s5716_s4 + $0x440] sm:$0xff] }
  0x6e   : > { %484 = vmatpush2.msra.mxu0 %v346_v20  ;;  %485 = vmatprep.mubr.f32.mxu0 %v418_v19  ;;  %v2414_v20 = vld [vmem:[%s5716_s4 + $0x428] sm:$0xff] }
  0x6f   : > { %555 = vmatpush2.msra.mxu1 %v348_v21  ;;  %556 = vmatprep.mubr.f32.mxu1 %v418_v19  ;;  %v2419_v19 = vld [vmem:[%s5716_s4 + $0x450] sm:$0xff]  ;;  %v2416_v21 = vld [vmem:[%s5716_s4 + $0x438] sm:$0xff] }
  0x70   : > { %486 = vmatmul.mubr.f32.vlgmr.msra.gmra.mxu0 %v414_v22  ;;  %557 = vmatmul.mubr.f32.vlgmr.msra.gmra.mxu1 %v414_v22  ;;  %v2413_v22 = vld [vmem:[%s5716_s4 + $0x420] sm:$0xff] }
  0x71   : > { %763 = vmatprep.subr.mxu0 %v2470_v23  ;;  %834 = vmatprep.subr.mxu1 %v2472_v24  ;;  %v2415_v23 = vld [vmem:[%s5716_s4 + $0x430] sm:$0xff]  ;;  %v2410_v24 = vld [vmem:[%s5716_s4 + $0x408] sm:$0xff] }
  0x72   : > { %764 = vmatpush1.msra.mxu0 %v2469_v25  ;;  %835 = vmatpush1.msra.mxu1 %v2471_v26  ;;  %v2412_v25 = vld [vmem:[%s5716_s4 + $0x418] sm:$0xff]  ;;  %v2409_v26 = vld [vmem:[%s5716_s4 + $0x400] sm:$0xff] }
  0x73   : > { %765 = vmatprep.subr.mxu0 %v2466_v27  ;;  %836 = vmatprep.subr.mxu1 %v2468_v28  ;;  %v2411_v27 = vld [vmem:[%s5716_s4 + $0x410] sm:$0xff]  ;;  %v2534_v28 = vld [vmem:[%s5716_s4 + $0x7e8] sm:$0xff] }
  0x74   : > { %766 = vmatpush1.msra.mxu0 %v2465_v29  ;;  %837 = vmatpush1.msra.mxu1 %v2467_v31  ;;  %v2536_v29 = vld [vmem:[%s5716_s4 + $0x7f8] sm:$0xff]  ;;  %v2533_v31 = vld [vmem:[%s5716_s4 + $0x7e0] sm:$0xff] }
  0x75   : > { %767 = vmatprep.subr.mxu0 %v2462_v32  ;;  %838 = vmatprep.subr.mxu1 %v2464_v33  ;;  %v2535_v32 = vld [vmem:[%s5716_s4 + $0x7f0] sm:$0xff]  ;;  %v2530_v33 = vld [vmem:[%s5716_s4 + $0x7c8] sm:$0xff] }
  0x76   : > { %768 = vmatpush1.msra.mxu0 %v2461_v34  ;;  %839 = vmatpush1.msra.mxu1 %v2463_v35  ;;  %v2532_v34 = vld [vmem:[%s5716_s4 + $0x7d8] sm:$0xff]  ;;  %v2529_v35 = vld [vmem:[%s5716_s4 + $0x7c0] sm:$0xff] }
  0x77   : > { %769 = vmatprep.subr.mxu0 %v2458_v36  ;;  %840 = vmatprep.subr.mxu1 %v2460_v37  ;;  %v2531_v36 = vld [vmem:[%s5716_s4 + $0x7d0] sm:$0xff]  ;;  %v597_v37 = vstv %s3837_s10 }
  0x78   : > { %770 = vmatpush1.msra.mxu0 %v2457_v38  ;;  %841 = vmatpush1.msra.mxu1 %v2459_v39  ;;  %v2526_v38 = vld [vmem:[%s5716_s4 + $0x7a8] sm:$0xff]  ;;  %v2528_v39 = vld [vmem:[%s5716_s4 + $0x7b8] sm:$0xff] }
  0x79   : > { %771 = vmatprep.subr.mxu0 %v2454_v40  ;;  %842 = vmatprep.subr.mxu1 %v2456_v41  ;;  %v2525_v40 = vld [vmem:[%s5716_s4 + $0x7a0] sm:$0xff]  ;;  %v2527_v41 = vld [vmem:[%s5716_s4 + $0x7b0] sm:$0xff] }
  0x7a   : > { %772 = vmatpush1.msra.mxu0 %v2453_v42  ;;  %843 = vmatpush1.msra.mxu1 %v2455_v43  ;;  %v2522_v42 = vld [vmem:[%s5716_s4 + $0x788] sm:$0xff]  ;;  %v2524_v43 = vld [vmem:[%s5716_s4 + $0x798] sm:$0xff] }
  0x7b   : > { %773 = vmatprep.subr.mxu0 %v2450_v44  ;;  %844 = vmatprep.subr.mxu1 %v2452_v45  ;;  %v598_v44 = vmul.f32 %v597_v37, %v3535_v30  ;;  %v2521_v45 = vld [vmem:[%s5716_s4 + $0x780] sm:$0xff]  ;;  %v2484_v37 = vld [vmem:[%s5716_s4 + $0x658] sm:$0xff] }
  0x7c   : > { %774 = vmatpush1.msra.mxu0 %v2449_v46  ;;  %845 = vmatpush1.msra.mxu1 %v2451_v47  ;;  %v2523_v46 = vld [vmem:[%s5716_s4 + $0x790] sm:$0xff]  ;;  %v594_v47 = vstv %s3857_s23  ;;  %s5599_s23 = sld [smem:[#allocation4 + $0x5]] }
  0x7d   : > { %775 = vmatprep.subr.mxu0 %v2446_v48  ;;  %846 = vmatprep.subr.mxu1 %v2448_v49  ;;  %v605_v48 = vstv %s3865_s7  ;;  %v2518_v49 = vld [vmem:[%s5716_s4 + $0x768] sm:$0xff]  ;;  %s4705_s7 = sld [smem:[#allocation2 + $0x183]] }
  0x7e   : > { %776 = vmatpush1.msra.mxu0 %v2445_v50  ;;  %847 = vmatpush1.msra.mxu1 %v2447_v52  ;;  %v2520_v50 = vld [vmem:[%s5716_s4 + $0x778] sm:$0xff]  ;;  %v2517_v52 = vld [vmem:[%s5716_s4 + $0x760] sm:$0xff] }
  0x7f   : > { %777 = vmatprep.subr.mxu0 %v2442_v53  ;;  %848 = vmatprep.subr.mxu1 %v2444_v54  ;;  %v2519_v53 = vld [vmem:[%s5716_s4 + $0x770] sm:$0xff]  ;;  %v2514_v54 = vld [vmem:[%s5716_s4 + $0x748] sm:$0xff] }
  0x80   : > { %778 = vmatpush1.msra.mxu0 %v2441_v55  ;;  %849 = vmatpush1.msra.mxu1 %v2443_v56  ;;  %v2516_v55 = vld [vmem:[%s5716_s4 + $0x758] sm:$0xff]  ;;  %v595_v56 = vmul.f32 %v594_v47, %v3535_v30 }
  0x81   : > { %779 = vmatprep.subr.mxu0 %v2438_v57  ;;  %850 = vmatprep.subr.mxu1 %v2440_v58  ;;  %v2403_v57 = vrot.slane %v598_v44, 9  ;;  %v606_v58 = vmul.f32 %v605_v48, %v3535_v30  ;;  %v2479_v44 = vld [vmem:[%s5716_s4 + $0x630] sm:$0xff]  ;;  %v2473_v48 = vld [vmem:[%s5716_s4 + $0x600] sm:$0xff] }
  0x82   : > { %780 = vmatpush1.msra.mxu0 %v2437_v59  ;;  %851 = vmatpush1.msra.mxu1 %v2439_v60  ;;  %v2513_v59 = vld [vmem:[%s5716_s4 + $0x740] sm:$0xff]  ;;  %v2515_v60 = vld [vmem:[%s5716_s4 + $0x750] sm:$0xff] }
  0x83   : > { %781 = vmatprep.subr.mxu0 %v2434_v61  ;;  %852 = vmatprep.subr.mxu1 %v2436_v63  ;;  %v613_v61 = vstv %s3892_s25  ;;  %v2510_v63 = vld [vmem:[%s5716_s4 + $0x728] sm:$0xff] }
  0x84   : > { %782 = vmatpush1.msra.mxu0 %v2433_v0  ;;  %853 = vmatpush1.msra.mxu1 %v2435_v1  ;;  %v2512_v0 = vld [vmem:[%s5716_s4 + $0x738] sm:$0xff]  ;;  %v2509_v1 = vld [vmem:[%s5716_s4 + $0x720] sm:$0xff] }
  0x85   : > { %783 = vmatprep.subr.mxu0 %v2430_v2  ;;  %854 = vmatprep.subr.mxu1 %v2432_v3  ;;  %v2511_v2 = vld [vmem:[%s5716_s4 + $0x730] sm:$0xff]  ;;  %v2506_v3 = vld [vmem:[%s5716_s4 + $0x708] sm:$0xff] }
  0x86   : > { %784 = vmatpush1.msra.mxu0 %v2429_v4  ;;  %855 = vmatpush1.msra.mxu1 %v2431_v5  ;;  %v2508_v4 = vld [vmem:[%s5716_s4 + $0x718] sm:$0xff]  ;;  %v603_v5 = vadd.f32 %v2403_v57, %v595_v56  ;;  %v2602_v56 = vld [vmem:[%s5716_s4 + $0x9c8] sm:$0xff] }
  0x87   : > { %785 = vmatprep.subr.mxu0 %v2426_v6  ;;  %856 = vmatprep.subr.mxu1 %v2428_v7  ;;  %v2405_v6 = vrot.slane %v606_v58, 10  ;;  %v614_v7 = vmul.f32 %v613_v61, %v3535_v30  ;;  %v2504_v30 = vld [vmem:[%s5716_s4 + $0x6f8] sm:$0xff]  ;;  %v2601_v58 = vld [vmem:[%s5716_s4 + $0x9c0] sm:$0xff] }
  0x88   : > { %786 = vmatpush1.msra.mxu0 %v2425_v8  ;;  %857 = vmatpush1.msra.mxu1 %v2427_v10  ;;  %v2505_v8 = vld [vmem:[%s5716_s4 + $0x700] sm:$0xff]  ;;  %v2507_v10 = vld [vmem:[%s5716_s4 + $0x710] sm:$0xff]  ;;  %v2604_v57 = vld [vmem:[%s5716_s4 + $0x9d8] sm:$0xff] }
  0x89   : > { %787 = vmatprep.subr.mxu0 %v2422_v11  ;;  %858 = vmatprep.subr.mxu1 %v2424_v12  ;;  %v2502_v11 = vld [vmem:[%s5716_s4 + $0x6e8] sm:$0xff]  ;;  %v2501_v12 = vld [vmem:[%s5716_s4 + $0x6e0] sm:$0xff]  ;;  %v2600_v61 = vld [vmem:[%s5716_s4 + $0x9b8] sm:$0xff] }
  0x8a   : > { %788 = vmatpush1.msra.mxu0 %v2421_v13  ;;  %859 = vmatpush1.msra.mxu1 %v2423_v15  ;;  %v2503_v13 = vld [vmem:[%s5716_s4 + $0x6f0] sm:$0xff]  ;;  %v2498_v15 = vld [vmem:[%s5716_s4 + $0x6c8] sm:$0xff] }
  0x8b   : > { %789 = vmatprep.subr.mxu0 %v2418_v16  ;;  %860 = vmatprep.subr.mxu1 %v2420_v17  ;;  %v2500_v16 = vld [vmem:[%s5716_s4 + $0x6d8] sm:$0xff]  ;;  %v611_v17 = vadd.f32 %v2405_v6, %v603_v5  ;;  %v2590_v5 = vld [vmem:[%s5716_s4 + $0x968] sm:$0xff] }
  0x8c   : > { %790 = vmatpush1.msra.mxu0 %v2417_v18  ;;  %861 = vmatpush1.msra.mxu1 %v2419_v19  ;;  %v2407_v18 = vrot.slane %v614_v7, 11  ;;  %v2497_v19 = vld [vmem:[%s5716_s4 + $0x6c0] sm:$0xff]  ;;  %v2592_v6 = vld [vmem:[%s5716_s4 + $0x978] sm:$0xff] }
  0x8d   : > { %791 = vmatprep.subr.mxu0 %v2414_v20  ;;  %862 = vmatprep.subr.mxu1 %v2416_v21  ;;  %v2499_v20 = vld [vmem:[%s5716_s4 + $0x6d0] sm:$0xff]  ;;  %v2494_v21 = vld [vmem:[%s5716_s4 + $0x6a8] sm:$0xff]  ;;  %v2589_v7 = vld [vmem:[%s5716_s4 + $0x960] sm:$0xff] }
  0x8e   : > { %792 = vmatpush1.msra.mxu0 %v2413_v22  ;;  %863 = vmatpush1.msra.mxu1 %v2415_v23  ;;  %v2496_v22 = vld [vmem:[%s5716_s4 + $0x6b8] sm:$0xff]  ;;  %v2493_v23 = vld [vmem:[%s5716_s4 + $0x6a0] sm:$0xff] }
  0x8f   : > { %793 = vmatprep.subr.mxu0 %v2410_v24  ;;  %864 = vmatprep.subr.mxu1 %v2412_v25  ;;  %v2495_v24 = vld [vmem:[%s5716_s4 + $0x6b0] sm:$0xff]  ;;  %v2490_v25 = vld [vmem:[%s5716_s4 + $0x688] sm:$0xff] }
  0x90   : > { %794 = vmatpush1.msra.mxu0 %v2409_v26  ;;  %865 = vmatpush1.msra.mxu1 %v2411_v27  ;;  %v2492_v26 = vld [vmem:[%s5716_s4 + $0x698] sm:$0xff]  ;;  %v619_v27 = vadd.f32 %v2407_v18, %v611_v17  ;;  %v2583_v17 = vld [vmem:[%s5716_s4 + $0x930] sm:$0xff]  ;;  %v2578_v18 = vld [vmem:[%s5716_s4 + $0x908] sm:$0xff] }
  0x91   : > { %795 = vmatprep.subr.mxu0 %v2534_v28  ;;  %866 = vmatprep.subr.mxu1 %v2536_v29  ;;  %v2489_v28 = vld [vmem:[%s5716_s4 + $0x680] sm:$0xff]  ;;  %v2491_v29 = vld [vmem:[%s5716_s4 + $0x690] sm:$0xff] }
  0x92   : > { %796 = vmatpush2.msra.mxu0 %v2533_v31  ;;  %867 = vmatpush2.msra.mxu1 %v2535_v32  ;;  %v621_v31 = vstv %s3973_s12  ;;  %v2486_v32 = vld [vmem:[%s5716_s4 + $0x668] sm:$0xff]  ;;  %s4270_s12 = sld [smem:[#allocation2 + $0x102]] }
  0x93   : > { %797 = vmatprep.subr.mxu0 %v2530_v33  ;;  %868 = vmatprep.subr.mxu1 %v2532_v34  ;;  %v2488_v33 = vld [vmem:[%s5716_s4 + $0x678] sm:$0xff]  ;;  %v2485_v34 = vld [vmem:[%s5716_s4 + $0x660] sm:$0xff] }
  0x94   : > { %798 = vmatpush2.msra.mxu0 %v2529_v35  ;;  %869 = vmatpush2.msra.mxu1 %v2531_v36  ;;  %v2487_v35 = vld [vmem:[%s5716_s4 + $0x670] sm:$0xff]  ;;  %v2482_v36 = vld [vmem:[%s5716_s4 + $0x648] sm:$0xff] }
  0x95   : > { %799 = vmatprep.subr.mxu0 %v2526_v38  ;;  %870 = vmatprep.subr.mxu1 %v2528_v39  ;;  %v622_v38 = vadd.f32 %v621_v31, %v619_v27  ;;  %v2481_v39 = vld [vmem:[%s5716_s4 + $0x640] sm:$0xff]  ;;  %v2572_v27 = vld [vmem:[%s5716_s4 + $0x8d8] sm:$0xff]  ;;  %v2566_v31 = vld [vmem:[%s5716_s4 + $0x8a8] sm:$0xff] }
  0x96   : > { %800 = vmatpush2.msra.mxu0 %v2525_v40  ;;  %871 = vmatpush2.msra.mxu1 %v2527_v41  ;;  %v2483_v40 = vld [vmem:[%s5716_s4 + $0x650] sm:$0xff]  ;;  %v2478_v41 = vld [vmem:[%s5716_s4 + $0x628] sm:$0xff] }
  0x97   : > { %801 = vmatprep.subr.mxu0 %v2522_v42  ;;  %872 = vmatprep.subr.mxu1 %v2524_v43  ;;  %v2480_v42 = vld [vmem:[%s5716_s4 + $0x638] sm:$0xff]  ;;  %v2477_v43 = vld [vmem:[%s5716_s4 + $0x620] sm:$0xff]  ;;  %v760_v47 = vrot.slane %v622_v38, %v3632_v9 }
  0x98   : > { %802 = vmatpush2.msra.mxu0 %v2521_v45  ;;  %873 = vmatpush2.msra.mxu1 %v2523_v46  ;;  %v2474_v45 = vld [vmem:[%s5716_s4 + $0x608] sm:$0xff]  ;;  %v2476_v46 = vld [vmem:[%s5716_s4 + $0x618] sm:$0xff] }
  0x99   : > { %803 = vmatprep.subr.mxu0 %v2518_v49  ;;  %874 = vmatprep.subr.mxu1 %v2520_v50  ;;  %v2475_v49 = vld [vmem:[%s5716_s4 + $0x610] sm:$0xff]  ;;  %v756_v50 = vrot.slane %v622_v38, %v3647_v14 }
  0x9a   : > { %804 = vmatpush2.msra.mxu0 %v2517_v52  ;;  %875 = vmatpush2.msra.mxu1 %v2519_v53  ;;  %v2606_v52 = vld [vmem:[%s5716_s4 + $0x9e8] sm:$0xff]  ;;  %v2608_v53 = vld [vmem:[%s5716_s4 + $0x9f8] sm:$0xff]  ;;  %v2563_v38 = vld [vmem:[%s5716_s4 + $0x890] sm:$0xff] }
  0x9b   : > { %805 = vmatprep.subr.mxu0 %v2514_v54  ;;  %876 = vmatprep.subr.mxu1 %v2516_v55  ;;  %v2605_v54 = vld [vmem:[%s5716_s4 + $0x9e0] sm:$0xff]  ;;  %v2607_v55 = vld [vmem:[%s5716_s4 + $0x9f0] sm:$0xff] }
  0x9c   : > { %806 = vmatpush2.msra.mxu0 %v2513_v59  ;;  %877 = vmatpush2.msra.mxu1 %v2515_v60  ;;  %v2603_v59 = vld [vmem:[%s5716_s4 + $0x9d0] sm:$0xff]  ;;  %v2598_v60 = vld [vmem:[%s5716_s4 + $0x9a8] sm:$0xff] }
  0x9d   : > { %807 = vmatprep.subr.mxu0 %v2510_v63  ;;  %878 = vmatprep.subr.mxu1 %v2512_v0  ;;  %v2597_v63 = vld [vmem:[%s5716_s4 + $0x9a0] sm:$0xff]  ;;  %v2599_v0 = vld [vmem:[%s5716_s4 + $0x9b0] sm:$0xff] }
  0x9e   : > { %808 = vmatpush2.msra.mxu0 %v2509_v1  ;;  %879 = vmatpush2.msra.mxu1 %v2511_v2  ;;  %v2594_v1 = vld [vmem:[%s5716_s4 + $0x988] sm:$0xff]  ;;  %v2596_v2 = vld [vmem:[%s5716_s4 + $0x998] sm:$0xff] }
  0x9f   : > { %809 = vmatprep.subr.mxu0 %v2506_v3  ;;  %880 = vmatprep.subr.mxu1 %v2508_v4  ;;  %v2593_v3 = vld [vmem:[%s5716_s4 + $0x980] sm:$0xff]  ;;  %v2595_v4 = vld [vmem:[%s5716_s4 + $0x990] sm:$0xff] }
  0xa0   : > { %810 = vmatpush2.msra.mxu0 %v2505_v8  ;;  %881 = vmatpush2.msra.mxu1 %v2507_v10  ;;  %v2591_v8 = vld [vmem:[%s5716_s4 + $0x970] sm:$0xff]  ;;  %v2586_v10 = vld [vmem:[%s5716_s4 + $0x948] sm:$0xff] }
  0xa1   : > { %811 = vmatprep.subr.mxu0 %v2502_v11  ;;  %882 = vmatprep.subr.mxu1 %v2504_v30  ;;  %v2588_v11 = vld [vmem:[%s5716_s4 + $0x958] sm:$0xff]  ;;  %v2585_v30 = vld [vmem:[%s5716_s4 + $0x940] sm:$0xff] }
  0xa2   : > { %812 = vmatpush2.msra.mxu0 %v2501_v12  ;;  %883 = vmatpush2.msra.mxu1 %v2503_v13  ;;  %v2587_v12 = vld [vmem:[%s5716_s4 + $0x950] sm:$0xff]  ;;  %v2582_v13 = vld [vmem:[%s5716_s4 + $0x928] sm:$0xff] }
  0xa3   : > { %813 = vmatprep.subr.mxu0 %v2498_v15  ;;  %884 = vmatprep.subr.mxu1 %v2500_v16  ;;  %v2584_v15 = vld [vmem:[%s5716_s4 + $0x938] sm:$0xff]  ;;  %v2581_v16 = vld [vmem:[%s5716_s4 + $0x920] sm:$0xff] }
  0xa4   : > { %814 = vmatpush2.msra.mxu0 %v2497_v19  ;;  %885 = vmatpush2.msra.mxu1 %v2499_v20  ;;  %v2580_v19 = vld [vmem:[%s5716_s4 + $0x918] sm:$0xff]  ;;  %v2577_v20 = vld [vmem:[%s5716_s4 + $0x900] sm:$0xff] }
  0xa5   : > { %815 = vmatprep.subr.mxu0 %v2494_v21  ;;  %886 = vmatprep.subr.mxu1 %v2496_v22  ;;  %v2579_v21 = vld [vmem:[%s5716_s4 + $0x910] sm:$0xff]  ;;  %v2574_v22 = vld [vmem:[%s5716_s4 + $0x8e8] sm:$0xff] }
  0xa6   : > { %816 = vmatpush2.msra.mxu0 %v2493_v23  ;;  %887 = vmatpush2.msra.mxu1 %v2495_v24  ;;  %v2576_v23 = vld [vmem:[%s5716_s4 + $0x8f8] sm:$0xff]  ;;  %v2573_v24 = vld [vmem:[%s5716_s4 + $0x8e0] sm:$0xff] }
  0xa7   : > { %817 = vmatprep.subr.mxu0 %v2490_v25  ;;  %888 = vmatprep.subr.mxu1 %v2492_v26  ;;  %v2575_v25 = vld [vmem:[%s5716_s4 + $0x8f0] sm:$0xff]  ;;  %v2570_v26 = vld [vmem:[%s5716_s4 + $0x8c8] sm:$0xff] }
  0xa8   : > { %818 = vmatpush2.msra.mxu0 %v2489_v28  ;;  %889 = vmatpush2.msra.mxu1 %v2491_v29  ;;  %v2569_v28 = vld [vmem:[%s5716_s4 + $0x8c0] sm:$0xff]  ;;  %v2571_v29 = vld [vmem:[%s5716_s4 + $0x8d0] sm:$0xff] }
  0xa9   : > { %819 = vmatprep.subr.mxu0 %v2486_v32  ;;  %890 = vmatprep.subr.mxu1 %v2488_v33  ;;  %v2568_v32 = vld [vmem:[%s5716_s4 + $0x8b8] sm:$0xff]  ;;  %v2565_v33 = vld [vmem:[%s5716_s4 + $0x8a0] sm:$0xff] }
  0xaa   : > { %820 = vmatpush2.msra.mxu0 %v2485_v34  ;;  %891 = vmatpush2.msra.mxu1 %v2487_v35  ;;  %v2567_v34 = vld [vmem:[%s5716_s4 + $0x8b0] sm:$0xff]  ;;  %v2562_v35 = vld [vmem:[%s5716_s4 + $0x888] sm:$0xff] }
  0xab   : > { %821 = vmatprep.subr.mxu0 %v2482_v36  ;;  %892 = vmatprep.subr.mxu1 %v2484_v37  ;;  %v2564_v36 = vld [vmem:[%s5716_s4 + $0x898] sm:$0xff]  ;;  %v2561_v37 = vld [vmem:[%s5716_s4 + $0x880] sm:$0xff] }
  0xac   : > { %822 = vmatpush2.msra.mxu0 %v2481_v39  ;;  %893 = vmatpush2.msra.mxu1 %v2483_v40  ;;  %v2558_v39 = vld [vmem:[%s5716_s4 + $0x868] sm:$0xff]  ;;  %v2560_v40 = vld [vmem:[%s5716_s4 + $0x878] sm:$0xff] }
  0xad   : > { %823 = vmatprep.subr.mxu0 %v2478_v41  ;;  %894 = vmatprep.subr.mxu1 %v2480_v42  ;;  %v2557_v41 = vld [vmem:[%s5716_s4 + $0x860] sm:$0xff]  ;;  %v2559_v42 = vld [vmem:[%s5716_s4 + $0x870] sm:$0xff] }
  0xae   : > { %824 = vmatpush2.msra.mxu0 %v2477_v43  ;;  %895 = vmatpush2.msra.mxu1 %v2479_v44  ;;  %v2554_v43 = vld [vmem:[%s5716_s4 + $0x848] sm:$0xff]  ;;  %v2556_v44 = vld [vmem:[%s5716_s4 + $0x858] sm:$0xff] }
  0xaf   : > { %825 = vmatprep.subr.mxu0 %v2474_v45  ;;  %896 = vmatprep.subr.mxu1 %v2476_v46  ;;  %v2553_v45 = vld [vmem:[%s5716_s4 + $0x840] sm:$0xff]  ;;  %v2555_v46 = vld [vmem:[%s5716_s4 + $0x850] sm:$0xff] }
  0xb0   : > { %826 = vmatpush2.msra.mxu0 %v2473_v48  ;;  %827 = vmatprep.mubr.f32.mxu0 %v760_v47  ;;  %v2552_v48 = vld [vmem:[%s5716_s4 + $0x838] sm:$0xff] }
  0xb1   : > { %897 = vmatpush2.msra.mxu1 %v2475_v49  ;;  %898 = vmatprep.mubr.f32.mxu1 %v760_v47  ;;  %v2550_v47 = vld [vmem:[%s5716_s4 + $0x828] sm:$0xff]  ;;  %v2549_v49 = vld [vmem:[%s5716_s4 + $0x820] sm:$0xff] }
  0xb2   : > { %828 = vmatmul.mubr.f32.vlgmr.msra.gmra.mxu0 %v756_v50  ;;  %899 = vmatmul.mubr.f32.vlgmr.msra.gmra.mxu1 %v756_v50  ;;  %v2551_v50 = vld [vmem:[%s5716_s4 + $0x830] sm:$0xff] }
  0xb3   : > { %1105 = vmatprep.subr.mxu0 %v2606_v52  ;;  %1176 = vmatprep.subr.mxu1 %v2608_v53  ;;  %v2546_v52 = vld [vmem:[%s5716_s4 + $0x808] sm:$0xff]  ;;  %v2548_v53 = vld [vmem:[%s5716_s4 + $0x818] sm:$0xff] }
  0xb4   : > { %1106 = vmatpush1.msra.mxu0 %v2605_v54  ;;  %1177 = vmatpush1.msra.mxu1 %v2607_v55  ;;  %v2545_v54 = vld [vmem:[%s5716_s4 + $0x800] sm:$0xff]  ;;  %v2547_v55 = vld [vmem:[%s5716_s4 + $0x810] sm:$0xff] }
  0xb5   : > { %1107 = vmatprep.subr.mxu0 %v2602_v56  ;;  %1178 = vmatprep.subr.mxu1 %v2604_v57  ;;  %v2670_v56 = vld [vmem:[%s5716_s4 + $0xbe8] sm:$0xff]  ;;  %v2672_v57 = vld [vmem:[%s5716_s4 + $0xbf8] sm:$0xff] }
  0xb6   : > { %1108 = vmatpush1.msra.mxu0 %v2601_v58  ;;  %1179 = vmatpush1.msra.mxu1 %v2603_v59  ;;  %v2669_v58 = vld [vmem:[%s5716_s4 + $0xbe0] sm:$0xff]  ;;  %v2671_v59 = vld [vmem:[%s5716_s4 + $0xbf0] sm:$0xff] }
  0xb7   : > { %1109 = vmatprep.subr.mxu0 %v2598_v60  ;;  %1180 = vmatprep.subr.mxu1 %v2600_v61  ;;  %v2666_v60 = vld [vmem:[%s5716_s4 + $0xbc8] sm:$0xff]  ;;  %v2668_v61 = vld [vmem:[%s5716_s4 + $0xbd8] sm:$0xff] }
  0xb8   : > { %1110 = vmatpush1.msra.mxu0 %v2597_v63  ;;  %1181 = vmatpush1.msra.mxu1 %v2599_v0  ;;  %v2665_v63 = vld [vmem:[%s5716_s4 + $0xbc0] sm:$0xff]  ;;  %v2667_v0 = vld [vmem:[%s5716_s4 + $0xbd0] sm:$0xff] }
  0xb9   : > { %1111 = vmatprep.subr.mxu0 %v2594_v1  ;;  %1182 = vmatprep.subr.mxu1 %v2596_v2  ;;  %v939_v1 = vstv %s4242_s22  ;;  %v2662_v2 = vld [vmem:[%s5716_s4 + $0xba8] sm:$0xff]  ;;  %s5194_s22 = sld [smem:[#allocation4 + $0x4]] }
  0xba   : > { %1112 = vmatpush1.msra.mxu0 %v2593_v3  ;;  %1183 = vmatpush1.msra.mxu1 %v2595_v4  ;;  %v2664_v3 = vld [vmem:[%s5716_s4 + $0xbb8] sm:$0xff]  ;;  %v2661_v4 = vld [vmem:[%s5716_s4 + $0xba0] sm:$0xff] }
  0xbb   : > { %1113 = vmatprep.subr.mxu0 %v2590_v5  ;;  %1184 = vmatprep.subr.mxu1 %v2592_v6  ;;  %v2663_v5 = vld [vmem:[%s5716_s4 + $0xbb0] sm:$0xff]  ;;  %v2658_v6 = vld [vmem:[%s5716_s4 + $0xb88] sm:$0xff] }
  0xbc   : > { %1114 = vmatpush1.msra.mxu0 %v2589_v7  ;;  %1185 = vmatpush1.msra.mxu1 %v2591_v8  ;;  %v2660_v7 = vld [vmem:[%s5716_s4 + $0xb98] sm:$0xff]  ;;  %v4318_v8 = vld [vmem:[%s3510_s29] sm:$0xff] }
  0xbd   : > { %1115 = vmatprep.subr.mxu0 %v2586_v10  ;;  %1186 = vmatprep.subr.mxu1 %v2588_v11  ;;  %v940_v10 = vmul.f32 %v4318_v8, %v939_v1  ;;  %v2657_v11 = vld [vmem:[%s5716_s4 + $0xb80] sm:$0xff]  ;;  %v2618_v1 = vld [vmem:[%s5716_s4 + $0xa48] sm:$0xff] }
  0xbe   : > { %1116 = vmatpush1.msra.mxu0 %v2585_v30  ;;  %1187 = vmatpush1.msra.mxu1 %v2587_v12  ;;  %v2659_v30 = vld [vmem:[%s5716_s4 + $0xb90] sm:$0xff]  ;;  %v936_v12 = vstv %s4262_s26  ;;  %s5463_s26 = sld [smem:[#allocation2 + $0x281]] }
  0xbf   : > { %1117 = vmatprep.subr.mxu0 %v2582_v13  ;;  %1188 = vmatprep.subr.mxu1 %v2584_v15  ;;  %v947_v13 = vstv %s4270_s12  ;;  %v2654_v15 = vld [vmem:[%s5716_s4 + $0xb68] sm:$0xff]  ;;  %s5110_s12 = sld [smem:[#allocation2 + $0x203]] }
  0xc0   : > { %1118 = vmatpush1.msra.mxu0 %v2581_v16  ;;  %1189 = vmatpush1.msra.mxu1 %v2583_v17  ;;  %v2656_v16 = vld [vmem:[%s5716_s4 + $0xb78] sm:$0xff]  ;;  %v2653_v17 = vld [vmem:[%s5716_s4 + $0xb60] sm:$0xff] }
  0xc1   : > { %1119 = vmatprep.subr.mxu0 %v2578_v18  ;;  %1190 = vmatprep.subr.mxu1 %v2580_v19  ;;  %v2655_v18 = vld [vmem:[%s5716_s4 + $0xb70] sm:$0xff]  ;;  %v2650_v19 = vld [vmem:[%s5716_s4 + $0xb48] sm:$0xff] }
  0xc2   : > { %1120 = vmatpush1.msra.mxu0 %v2577_v20  ;;  %1191 = vmatpush1.msra.mxu1 %v2579_v21  ;;  %v2652_v20 = vld [vmem:[%s5716_s4 + $0xb58] sm:$0xff]  ;;  %v937_v21 = vmul.f32 %v4318_v8, %v936_v12 }
  0xc3   : > { %1121 = vmatprep.subr.mxu0 %v2574_v22  ;;  %1192 = vmatprep.subr.mxu1 %v2576_v23  ;;  %v2539_v22 = vrot.slane %v940_v10, 9  ;;  %v948_v23 = vmul.f32 %v4318_v8, %v947_v13  ;;  %v2613_v10 = vld [vmem:[%s5716_s4 + $0xa20] sm:$0xff]  ;;  %v2612_v12 = vld [vmem:[%s5716_s4 + $0xa18] sm:$0xff] }
  0xc4   : > { %1122 = vmatpush1.msra.mxu0 %v2573_v24  ;;  %1193 = vmatpush1.msra.mxu1 %v2575_v25  ;;  %v2649_v24 = vld [vmem:[%s5716_s4 + $0xb40] sm:$0xff]  ;;  %v2651_v25 = vld [vmem:[%s5716_s4 + $0xb50] sm:$0xff] }
  0xc5   : > { %1123 = vmatprep.subr.mxu0 %v2570_v26  ;;  %1194 = vmatprep.subr.mxu1 %v2572_v27  ;;  %v955_v26 = vstv %s4297_s30  ;;  %v2646_v27 = vld [vmem:[%s5716_s4 + $0xb28] sm:$0xff]  ;;  %s5491_s30 = sld [smem:[#allocation2 + $0x282]] }
  0xc6   : > { %1124 = vmatpush1.msra.mxu0 %v2569_v28  ;;  %1195 = vmatpush1.msra.mxu1 %v2571_v29  ;;  %v2648_v28 = vld [vmem:[%s5716_s4 + $0xb38] sm:$0xff]  ;;  %v2645_v29 = vld [vmem:[%s5716_s4 + $0xb20] sm:$0xff] }
  0xc7   : > { %1125 = vmatprep.subr.mxu0 %v2566_v31  ;;  %1196 = vmatprep.subr.mxu1 %v2568_v32  ;;  %v2647_v31 = vld [vmem:[%s5716_s4 + $0xb30] sm:$0xff]  ;;  %v2642_v32 = vld [vmem:[%s5716_s4 + $0xb08] sm:$0xff] }
  0xc8   : > { %1126 = vmatpush1.msra.mxu0 %v2565_v33  ;;  %1197 = vmatpush1.msra.mxu1 %v2567_v34  ;;  %v2644_v33 = vld [vmem:[%s5716_s4 + $0xb18] sm:$0xff]  ;;  %v945_v34 = vadd.f32 %v2539_v22, %v937_v21  ;;  %v2743_v21 = vld [vmem:[%s5716_s4 + $0xdf0] sm:$0xff]  ;;  %v2738_v22 = vld [vmem:[%s5716_s4 + $0xdc8] sm:$0xff] }
  0xc9   : > { %1127 = vmatprep.subr.mxu0 %v2562_v35  ;;  %1198 = vmatprep.subr.mxu1 %v2564_v36  ;;  %v2541_v35 = vrot.slane %v948_v23, 10  ;;  %v956_v36 = vmul.f32 %v4318_v8, %v955_v26  ;;  %v2740_v23 = vld [vmem:[%s5716_s4 + $0xdd8] sm:$0xff]  ;;  %v2734_v26 = vld [vmem:[%s5716_s4 + $0xda8] sm:$0xff] }
  0xca   : > { %1128 = vmatpush1.msra.mxu0 %v2561_v37  ;;  %1199 = vmatpush1.msra.mxu1 %v2563_v38  ;;  %v2641_v37 = vld [vmem:[%s5716_s4 + $0xb00] sm:$0xff]  ;;  %v2643_v38 = vld [vmem:[%s5716_s4 + $0xb10] sm:$0xff] }
  0xcb   : > { %1129 = vmatprep.subr.mxu0 %v2558_v39  ;;  %1200 = vmatprep.subr.mxu1 %v2560_v40  ;;  %v2638_v39 = vld [vmem:[%s5716_s4 + $0xae8] sm:$0xff]  ;;  %v2640_v40 = vld [vmem:[%s5716_s4 + $0xaf8] sm:$0xff] }
  0xcc   : > { %1130 = vmatpush1.msra.mxu0 %v2557_v41  ;;  %1201 = vmatpush1.msra.mxu1 %v2559_v42  ;;  %v2637_v41 = vld [vmem:[%s5716_s4 + $0xae0] sm:$0xff]  ;;  %v2639_v42 = vld [vmem:[%s5716_s4 + $0xaf0] sm:$0xff] }
  0xcd   : > { %1131 = vmatprep.subr.mxu0 %v2554_v43  ;;  %1202 = vmatprep.subr.mxu1 %v2556_v44  ;;  %v2634_v43 = vld [vmem:[%s5716_s4 + $0xac8] sm:$0xff]  ;;  %v2636_v44 = vld [vmem:[%s5716_s4 + $0xad8] sm:$0xff] }
  0xce   : > { %1132 = vmatpush1.msra.mxu0 %v2553_v45  ;;  %1203 = vmatpush1.msra.mxu1 %v2555_v46  ;;  %v953_v45 = vadd.f32 %v2541_v35, %v945_v34  ;;  %v2543_v46 = vrot.slane %v956_v36, 11  ;;  %v2731_v34 = vld [vmem:[%s5716_s4 + $0xd90] sm:$0xff]  ;;  %v2726_v35 = vld [vmem:[%s5716_s4 + $0xd68] sm:$0xff]  ;;  %v2728_v36 = vld [vmem:[%s5716_s4 + $0xd78] sm:$0xff] }
  0xcf   : > { %1133 = vmatprep.subr.mxu0 %v2550_v47  ;;  %1204 = vmatprep.subr.mxu1 %v2552_v48  ;;  %v2633_v47 = vld [vmem:[%s5716_s4 + $0xac0] sm:$0xff]  ;;  %v2635_v48 = vld [vmem:[%s5716_s4 + $0xad0] sm:$0xff] }
  0xd0   : > { %1134 = vmatpush1.msra.mxu0 %v2549_v49  ;;  %1205 = vmatpush1.msra.mxu1 %v2551_v50  ;;  %v2630_v49 = vld [vmem:[%s5716_s4 + $0xaa8] sm:$0xff]  ;;  %v2632_v50 = vld [vmem:[%s5716_s4 + $0xab8] sm:$0xff] }
  0xd1   : > { %1135 = vmatprep.subr.mxu0 %v2546_v52  ;;  %1206 = vmatprep.subr.mxu1 %v2548_v53  ;;  %v2629_v52 = vld [vmem:[%s5716_s4 + $0xaa0] sm:$0xff]  ;;  %v2631_v53 = vld [vmem:[%s5716_s4 + $0xab0] sm:$0xff] }
  0xd2   : > { %1136 = vmatpush1.msra.mxu0 %v2545_v54  ;;  %1207 = vmatpush1.msra.mxu1 %v2547_v55  ;;  %v2626_v54 = vld [vmem:[%s5716_s4 + $0xa88] sm:$0xff]  ;;  %v2628_v55 = vld [vmem:[%s5716_s4 + $0xa98] sm:$0xff] }
  0xd3   : > { %1137 = vmatprep.subr.mxu0 %v2670_v56  ;;  %1208 = vmatprep.subr.mxu1 %v2672_v57  ;;  %v961_v56 = vadd.f32 %v2543_v46, %v953_v45  ;;  %v2625_v57 = vld [vmem:[%s5716_s4 + $0xa80] sm:$0xff]  ;;  %v2719_v46 = vld [vmem:[%s5716_s4 + $0xd30] sm:$0xff] }
  0xd4   : > { %1138 = vmatpush2.msra.mxu0 %v2669_v58  ;;  %1209 = vmatpush2.msra.mxu1 %v2671_v59  ;;  %v2627_v58 = vld [vmem:[%s5716_s4 + $0xa90] sm:$0xff]  ;;  %v963_v59 = vstv %s4381_s8  ;;  %v2717_v45 = vld [vmem:[%s5716_s4 + $0xd20] sm:$0xff]  ;;  %s4678_s8 = sld [smem:[#allocation2 + $0x182]] }
  0xd5   : > { %1139 = vmatprep.subr.mxu0 %v2666_v60  ;;  %1210 = vmatprep.subr.mxu1 %v2668_v61  ;;  %v2622_v60 = vld [vmem:[%s5716_s4 + $0xa68] sm:$0xff]  ;;  %v2624_v61 = vld [vmem:[%s5716_s4 + $0xa78] sm:$0xff] }
  0xd6   : > { %1140 = vmatpush2.msra.mxu0 %v2665_v63  ;;  %1211 = vmatpush2.msra.mxu1 %v2667_v0  ;;  %v2621_v63 = vld [vmem:[%s5716_s4 + $0xa60] sm:$0xff]  ;;  %v2623_v0 = vld [vmem:[%s5716_s4 + $0xa70] sm:$0xff] }
  0xd7   : > { %1141 = vmatprep.subr.mxu0 %v2662_v2  ;;  %1212 = vmatprep.subr.mxu1 %v2664_v3  ;;  %v2620_v2 = vld [vmem:[%s5716_s4 + $0xa58] sm:$0xff]  ;;  %v964_v3 = vadd.f32 %v963_v59, %v961_v56  ;;  %v2706_v56 = vld [vmem:[%s5716_s4 + $0xcc8] sm:$0xff]  ;;  %v2707_v59 = vld [vmem:[%s5716_s4 + $0xcd0] sm:$0xff] }
  0xd8   : > { %1142 = vmatpush2.msra.mxu0 %v2661_v4  ;;  %1213 = vmatpush2.msra.mxu1 %v2663_v5  ;;  %v2617_v4 = vld [vmem:[%s5716_s4 + $0xa40] sm:$0xff]  ;;  %v2619_v5 = vld [vmem:[%s5716_s4 + $0xa50] sm:$0xff] }
  0xd9   : > { %1143 = vmatprep.subr.mxu0 %v2658_v6  ;;  %1214 = vmatprep.subr.mxu1 %v2660_v7  ;;  %v2614_v6 = vld [vmem:[%s5716_s4 + $0xa28] sm:$0xff]  ;;  %v2616_v7 = vld [vmem:[%s5716_s4 + $0xa38] sm:$0xff]  ;;  %v1102_v13 = vrot.slane %v964_v3, %v3632_v9 }
  0xda   : > { %1144 = vmatpush2.msra.mxu0 %v2657_v11  ;;  %1215 = vmatpush2.msra.mxu1 %v2659_v30  ;;  %v2615_v11 = vld [vmem:[%s5716_s4 + $0xa30] sm:$0xff]  ;;  %v2610_v30 = vld [vmem:[%s5716_s4 + $0xa08] sm:$0xff] }
  0xdb   : > { %1145 = vmatprep.subr.mxu0 %v2654_v15  ;;  %1216 = vmatprep.subr.mxu1 %v2656_v16  ;;  %v2609_v15 = vld [vmem:[%s5716_s4 + $0xa00] sm:$0xff]  ;;  %v2611_v16 = vld [vmem:[%s5716_s4 + $0xa10] sm:$0xff] }
  0xdc   : > { %1146 = vmatpush2.msra.mxu0 %v2653_v17  ;;  %1217 = vmatpush2.msra.mxu1 %v2655_v18  ;;  %v1098_v17 = vrot.slane %v964_v3, %v3647_v14  ;;  %v2742_v18 = vld [vmem:[%s5716_s4 + $0xde8] sm:$0xff]  ;;  %v2697_v3 = vld [vmem:[%s5716_s4 + $0xc80] sm:$0xff] }
  0xdd   : > { %1147 = vmatprep.subr.mxu0 %v2650_v19  ;;  %1218 = vmatprep.subr.mxu1 %v2652_v20  ;;  %v2744_v19 = vld [vmem:[%s5716_s4 + $0xdf8] sm:$0xff]  ;;  %v2741_v20 = vld [vmem:[%s5716_s4 + $0xde0] sm:$0xff] }
  0xde   : > { %1148 = vmatpush2.msra.mxu0 %v2649_v24  ;;  %1219 = vmatpush2.msra.mxu1 %v2651_v25  ;;  %v2737_v24 = vld [vmem:[%s5716_s4 + $0xdc0] sm:$0xff]  ;;  %v2739_v25 = vld [vmem:[%s5716_s4 + $0xdd0] sm:$0xff] }
  0xdf   : > { %1149 = vmatprep.subr.mxu0 %v2646_v27  ;;  %1220 = vmatprep.subr.mxu1 %v2648_v28  ;;  %v2736_v27 = vld [vmem:[%s5716_s4 + $0xdb8] sm:$0xff]  ;;  %v2733_v28 = vld [vmem:[%s5716_s4 + $0xda0] sm:$0xff] }
  0xe0   : > { %1150 = vmatpush2.msra.mxu0 %v2645_v29  ;;  %1221 = vmatpush2.msra.mxu1 %v2647_v31  ;;  %v2735_v29 = vld [vmem:[%s5716_s4 + $0xdb0] sm:$0xff]  ;;  %v2730_v31 = vld [vmem:[%s5716_s4 + $0xd88] sm:$0xff] }
  0xe1   : > { %1151 = vmatprep.subr.mxu0 %v2642_v32  ;;  %1222 = vmatprep.subr.mxu1 %v2644_v33  ;;  %v2732_v32 = vld [vmem:[%s5716_s4 + $0xd98] sm:$0xff]  ;;  %v2729_v33 = vld [vmem:[%s5716_s4 + $0xd80] sm:$0xff] }
  0xe2   : > { %1152 = vmatpush2.msra.mxu0 %v2641_v37  ;;  %1223 = vmatpush2.msra.mxu1 %v2643_v38  ;;  %v2725_v37 = vld [vmem:[%s5716_s4 + $0xd60] sm:$0xff]  ;;  %v2727_v38 = vld [vmem:[%s5716_s4 + $0xd70] sm:$0xff] }
  0xe3   : > { %1153 = vmatprep.subr.mxu0 %v2638_v39  ;;  %1224 = vmatprep.subr.mxu1 %v2640_v40  ;;  %v2722_v39 = vld [vmem:[%s5716_s4 + $0xd48] sm:$0xff]  ;;  %v2724_v40 = vld [vmem:[%s5716_s4 + $0xd58] sm:$0xff] }
  0xe4   : > { %1154 = vmatpush2.msra.mxu0 %v2637_v41  ;;  %1225 = vmatpush2.msra.mxu1 %v2639_v42  ;;  %v2721_v41 = vld [vmem:[%s5716_s4 + $0xd40] sm:$0xff]  ;;  %v2723_v42 = vld [vmem:[%s5716_s4 + $0xd50] sm:$0xff] }
  0xe5   : > { %1155 = vmatprep.subr.mxu0 %v2634_v43  ;;  %1226 = vmatprep.subr.mxu1 %v2636_v44  ;;  %v2718_v43 = vld [vmem:[%s5716_s4 + $0xd28] sm:$0xff]  ;;  %v2720_v44 = vld [vmem:[%s5716_s4 + $0xd38] sm:$0xff] }
  0xe6   : > { %1156 = vmatpush2.msra.mxu0 %v2633_v47  ;;  %1227 = vmatpush2.msra.mxu1 %v2635_v48  ;;  %v2714_v47 = vld [vmem:[%s5716_s4 + $0xd08] sm:$0xff]  ;;  %v2716_v48 = vld [vmem:[%s5716_s4 + $0xd18] sm:$0xff] }
  0xe7   : > { %1157 = vmatprep.subr.mxu0 %v2630_v49  ;;  %1228 = vmatprep.subr.mxu1 %v2632_v50  ;;  %v2713_v49 = vld [vmem:[%s5716_s4 + $0xd00] sm:$0xff]  ;;  %v2715_v50 = vld [vmem:[%s5716_s4 + $0xd10] sm:$0xff] }
  0xe8   : > { %1158 = vmatpush2.msra.mxu0 %v2629_v52  ;;  %1229 = vmatpush2.msra.mxu1 %v2631_v53  ;;  %v2710_v52 = vld [vmem:[%s5716_s4 + $0xce8] sm:$0xff]  ;;  %v2712_v53 = vld [vmem:[%s5716_s4 + $0xcf8] sm:$0xff] }
  0xe9   : > { %1159 = vmatprep.subr.mxu0 %v2626_v54  ;;  %1230 = vmatprep.subr.mxu1 %v2628_v55  ;;  %v2709_v54 = vld [vmem:[%s5716_s4 + $0xce0] sm:$0xff]  ;;  %v2711_v55 = vld [vmem:[%s5716_s4 + $0xcf0] sm:$0xff] }
  0xea   : > { %1160 = vmatpush2.msra.mxu0 %v2625_v57  ;;  %1231 = vmatpush2.msra.mxu1 %v2627_v58  ;;  %v2708_v57 = vld [vmem:[%s5716_s4 + $0xcd8] sm:$0xff]  ;;  %v2705_v58 = vld [vmem:[%s5716_s4 + $0xcc0] sm:$0xff] }
  0xeb   : > { %1161 = vmatprep.subr.mxu0 %v2622_v60  ;;  %1232 = vmatprep.subr.mxu1 %v2624_v61  ;;  %v2702_v60 = vld [vmem:[%s5716_s4 + $0xca8] sm:$0xff]  ;;  %v2704_v61 = vld [vmem:[%s5716_s4 + $0xcb8] sm:$0xff] }
  0xec   : > { %1162 = vmatpush2.msra.mxu0 %v2621_v63  ;;  %1233 = vmatpush2.msra.mxu1 %v2623_v0  ;;  %v2701_v63 = vld [vmem:[%s5716_s4 + $0xca0] sm:$0xff]  ;;  %v2703_v0 = vld [vmem:[%s5716_s4 + $0xcb0] sm:$0xff] }
  0xed   : > { %1163 = vmatprep.subr.mxu0 %v2618_v1  ;;  %1234 = vmatprep.subr.mxu1 %v2620_v2  ;;  %v2698_v1 = vld [vmem:[%s5716_s4 + $0xc88] sm:$0xff]  ;;  %v2700_v2 = vld [vmem:[%s5716_s4 + $0xc98] sm:$0xff] }
  0xee   : > { %1164 = vmatpush2.msra.mxu0 %v2617_v4  ;;  %1235 = vmatpush2.msra.mxu1 %v2619_v5  ;;  %v2699_v4 = vld [vmem:[%s5716_s4 + $0xc90] sm:$0xff]  ;;  %v2694_v5 = vld [vmem:[%s5716_s4 + $0xc68] sm:$0xff] }
  0xef   : > { %1165 = vmatprep.subr.mxu0 %v2614_v6  ;;  %1236 = vmatprep.subr.mxu1 %v2616_v7  ;;  %v2696_v6 = vld [vmem:[%s5716_s4 + $0xc78] sm:$0xff]  ;;  %v2693_v7 = vld [vmem:[%s5716_s4 + $0xc60] sm:$0xff] }
  0xf0   : > { %1166 = vmatpush2.msra.mxu0 %v2613_v10  ;;  %1237 = vmatpush2.msra.mxu1 %v2615_v11  ;;  %v2695_v10 = vld [vmem:[%s5716_s4 + $0xc70] sm:$0xff]  ;;  %v2690_v11 = vld [vmem:[%s5716_s4 + $0xc48] sm:$0xff] }
  0xf1   : > { %1167 = vmatprep.subr.mxu0 %v2610_v30  ;;  %1238 = vmatprep.subr.mxu1 %v2612_v12  ;;  %v2692_v30 = vld [vmem:[%s5716_s4 + $0xc58] sm:$0xff]  ;;  %v2689_v12 = vld [vmem:[%s5716_s4 + $0xc40] sm:$0xff] }
  0xf2   : > { %1168 = vmatpush2.msra.mxu0 %v2609_v15  ;;  %1169 = vmatprep.mubr.f32.mxu0 %v1102_v13  ;;  %v2686_v15 = vld [vmem:[%s5716_s4 + $0xc28] sm:$0xff] }
  0xf3   : > { %1239 = vmatpush2.msra.mxu1 %v2611_v16  ;;  %1240 = vmatprep.mubr.f32.mxu1 %v1102_v13  ;;  %v2691_v13 = vld [vmem:[%s5716_s4 + $0xc50] sm:$0xff]  ;;  %v2688_v16 = vld [vmem:[%s5716_s4 + $0xc38] sm:$0xff] }
  0xf4   : > { %1170 = vmatmul.mubr.f32.vlgmr.msra.gmra.mxu0 %v1098_v17  ;;  %1241 = vmatmul.mubr.f32.vlgmr.msra.gmra.mxu1 %v1098_v17  ;;  %v2685_v17 = vld [vmem:[%s5716_s4 + $0xc20] sm:$0xff] }
  0xf5   : > { %1447 = vmatprep.subr.mxu0 %v2742_v18  ;;  %1518 = vmatprep.subr.mxu1 %v2744_v19  ;;  %v2687_v18 = vld [vmem:[%s5716_s4 + $0xc30] sm:$0xff]  ;;  %v2682_v19 = vld [vmem:[%s5716_s4 + $0xc08] sm:$0xff] }
  0xf6   : > { %1448 = vmatpush1.msra.mxu0 %v2741_v20  ;;  %1519 = vmatpush1.msra.mxu1 %v2743_v21  ;;  %v2684_v20 = vld [vmem:[%s5716_s4 + $0xc18] sm:$0xff]  ;;  %v2681_v21 = vld [vmem:[%s5716_s4 + $0xc00] sm:$0xff] }
  0xf7   : > { %1449 = vmatprep.subr.mxu0 %v2738_v22  ;;  %1520 = vmatprep.subr.mxu1 %v2740_v23  ;;  %v2683_v22 = vld [vmem:[%s5716_s4 + $0xc10] sm:$0xff]  ;;  %v2806_v23 = vld [vmem:[%s5716_s4 + $0xfe8] sm:$0xff] }
  0xf8   : > { %1450 = vmatpush1.msra.mxu0 %v2737_v24  ;;  %1521 = vmatpush1.msra.mxu1 %v2739_v25  ;;  %v2808_v24 = vld [vmem:[%s5716_s4 + $0xff8] sm:$0xff]  ;;  %v2805_v25 = vld [vmem:[%s5716_s4 + $0xfe0] sm:$0xff] }
  0xf9   : > { %1451 = vmatprep.subr.mxu0 %v2734_v26  ;;  %1522 = vmatprep.subr.mxu1 %v2736_v27  ;;  %v2807_v26 = vld [vmem:[%s5716_s4 + $0xff0] sm:$0xff]  ;;  %v2802_v27 = vld [vmem:[%s5716_s4 + $0xfc8] sm:$0xff] }
  0xfa   : > { %1452 = vmatpush1.msra.mxu0 %v2733_v28  ;;  %1523 = vmatpush1.msra.mxu1 %v2735_v29  ;;  %v2804_v28 = vld [vmem:[%s5716_s4 + $0xfd8] sm:$0xff]  ;;  %v2801_v29 = vld [vmem:[%s5716_s4 + $0xfc0] sm:$0xff] }
  0xfb   : > { %1453 = vmatprep.subr.mxu0 %v2730_v31  ;;  %1524 = vmatprep.subr.mxu1 %v2732_v32  ;;  %v2803_v31 = vld [vmem:[%s5716_s4 + $0xfd0] sm:$0xff]  ;;  %v1281_v32 = vstv %s4650_s13 }
  0xfc   : > { %1454 = vmatpush1.msra.mxu0 %v2729_v33  ;;  %1525 = vmatpush1.msra.mxu1 %v2731_v34  ;;  %v2798_v33 = vld [vmem:[%s5716_s4 + $0xfa8] sm:$0xff]  ;;  %v2800_v34 = vld [vmem:[%s5716_s4 + $0xfb8] sm:$0xff] }
  0xfd   : > { %1455 = vmatprep.subr.mxu0 %v2726_v35  ;;  %1526 = vmatprep.subr.mxu1 %v2728_v36  ;;  %v2797_v35 = vld [vmem:[%s5716_s4 + $0xfa0] sm:$0xff]  ;;  %v2799_v36 = vld [vmem:[%s5716_s4 + $0xfb0] sm:$0xff] }
  0xfe   : > { %1456 = vmatpush1.msra.mxu0 %v2725_v37  ;;  %1527 = vmatpush1.msra.mxu1 %v2727_v38  ;;  %v2794_v37 = vld [vmem:[%s5716_s4 + $0xf88] sm:$0xff]  ;;  %v2796_v38 = vld [vmem:[%s5716_s4 + $0xf98] sm:$0xff] }
  0xff   : > { %1457 = vmatprep.subr.mxu0 %v2722_v39  ;;  %1528 = vmatprep.subr.mxu1 %v2724_v40  ;;  %v1282_v39 = vmul.f32 %v4318_v8, %v1281_v32  ;;  %v2793_v40 = vld [vmem:[%s5716_s4 + $0xf80] sm:$0xff]  ;;  %v2756_v32 = vld [vmem:[%s5716_s4 + $0xe58] sm:$0xff] }
 0x100   : > { %1458 = vmatpush1.msra.mxu0 %v2721_v41  ;;  %1529 = vmatpush1.msra.mxu1 %v2723_v42  ;;  %v2795_v41 = vld [vmem:[%s5716_s4 + $0xf90] sm:$0xff]  ;;  %v1278_v42 = vstv %s4670_s6 }
 0x101   : > { %1459 = vmatprep.subr.mxu0 %v2718_v43  ;;  %1530 = vmatprep.subr.mxu1 %v2720_v44  ;;  %v1289_v43 = vstv %s4678_s8  ;;  %v2790_v44 = vld [vmem:[%s5716_s4 + $0xf68] sm:$0xff] }
 0x102   : > { %1460 = vmatpush1.msra.mxu0 %v2717_v45  ;;  %1531 = vmatpush1.msra.mxu1 %v2719_v46  ;;  %v2792_v45 = vld [vmem:[%s5716_s4 + $0xf78] sm:$0xff]  ;;  %v2789_v46 = vld [vmem:[%s5716_s4 + $0xf60] sm:$0xff] }
 0x103   : > { %1461 = vmatprep.subr.mxu0 %v2714_v47  ;;  %1532 = vmatprep.subr.mxu1 %v2716_v48  ;;  %v2791_v47 = vld [vmem:[%s5716_s4 + $0xf70] sm:$0xff]  ;;  %v2786_v48 = vld [vmem:[%s5716_s4 + $0xf48] sm:$0xff] }
 0x104   : > { %1462 = vmatpush1.msra.mxu0 %v2713_v49  ;;  %1533 = vmatpush1.msra.mxu1 %v2715_v50  ;;  %v2788_v49 = vld [vmem:[%s5716_s4 + $0xf58] sm:$0xff]  ;;  %v1279_v50 = vmul.f32 %v4318_v8, %v1278_v42 }
 0x105   : > { %1463 = vmatprep.subr.mxu0 %v2710_v52  ;;  %1534 = vmatprep.subr.mxu1 %v2712_v53  ;;  %v2675_v52 = vrot.slane %v1282_v39, 9  ;;  %v1290_v53 = vmul.f32 %v4318_v8, %v1289_v43  ;;  %v2751_v39 = vld [vmem:[%s5716_s4 + $0xe30] sm:$0xff]  ;;  %v2745_v43 = vld [vmem:[%s5716_s4 + $0xe00] sm:$0xff] }
 0x106   : > { %1464 = vmatpush1.msra.mxu0 %v2709_v54  ;;  %1535 = vmatpush1.msra.mxu1 %v2711_v55  ;;  %v2785_v54 = vld [vmem:[%s5716_s4 + $0xf40] sm:$0xff]  ;;  %v2787_v55 = vld [vmem:[%s5716_s4 + $0xf50] sm:$0xff] }
 0x107   : > { %1465 = vmatprep.subr.mxu0 %v2706_v56  ;;  %1536 = vmatprep.subr.mxu1 %v2708_v57  ;;  %v1297_v56 = vstv %s4705_s7  ;;  %v2782_v57 = vld [vmem:[%s5716_s4 + $0xf28] sm:$0xff] }
 0x108   : > { %1466 = vmatpush1.msra.mxu0 %v2705_v58  ;;  %1537 = vmatpush1.msra.mxu1 %v2707_v59  ;;  %v2784_v58 = vld [vmem:[%s5716_s4 + $0xf38] sm:$0xff]  ;;  %v2781_v59 = vld [vmem:[%s5716_s4 + $0xf20] sm:$0xff] }
 0x109   : > { %1467 = vmatprep.subr.mxu0 %v2702_v60  ;;  %1538 = vmatprep.subr.mxu1 %v2704_v61  ;;  %v2783_v60 = vld [vmem:[%s5716_s4 + $0xf30] sm:$0xff]  ;;  %v2778_v61 = vld [vmem:[%s5716_s4 + $0xf08] sm:$0xff] }
 0x10a   : > { %1468 = vmatpush1.msra.mxu0 %v2701_v63  ;;  %1539 = vmatpush1.msra.mxu1 %v2703_v0  ;;  %v2780_v63 = vld [vmem:[%s5716_s4 + $0xf18] sm:$0xff]  ;;  %v1287_v0 = vadd.f32 %v2675_v52, %v1279_v50  ;;  %v2874_v50 = vld [vmem:[%s5716_s4 + $0x11c8] sm:$0xff] }
 0x10b   : > { %1469 = vmatprep.subr.mxu0 %v2698_v1  ;;  %1540 = vmatprep.subr.mxu1 %v2700_v2  ;;  %v2677_v1 = vrot.slane %v1290_v53, 10  ;;  %v1298_v2 = vmul.f32 %v4318_v8, %v1297_v56  ;;  %v2776_v8 = vld [vmem:[%s5716_s4 + $0xef8] sm:$0xff]  ;;  %v2873_v53 = vld [vmem:[%s5716_s4 + $0x11c0] sm:$0xff] }
 0x10c   : > { %1470 = vmatpush1.msra.mxu0 %v2697_v3  ;;  %1541 = vmatpush1.msra.mxu1 %v2699_v4  ;;  %v2777_v3 = vld [vmem:[%s5716_s4 + $0xf00] sm:$0xff]  ;;  %v2779_v4 = vld [vmem:[%s5716_s4 + $0xf10] sm:$0xff]  ;;  %v2876_v52 = vld [vmem:[%s5716_s4 + $0x11d8] sm:$0xff] }
 0x10d   : > { %1471 = vmatprep.subr.mxu0 %v2694_v5  ;;  %1542 = vmatprep.subr.mxu1 %v2696_v6  ;;  %v2774_v5 = vld [vmem:[%s5716_s4 + $0xee8] sm:$0xff]  ;;  %v2773_v6 = vld [vmem:[%s5716_s4 + $0xee0] sm:$0xff]  ;;  %v2872_v56 = vld [vmem:[%s5716_s4 + $0x11b8] sm:$0xff] }
 0x10e   : > { %1472 = vmatpush1.msra.mxu0 %v2693_v7  ;;  %1543 = vmatpush1.msra.mxu1 %v2695_v10  ;;  %v2775_v7 = vld [vmem:[%s5716_s4 + $0xef0] sm:$0xff]  ;;  %v2770_v10 = vld [vmem:[%s5716_s4 + $0xec8] sm:$0xff] }
 0x10f   : > { %1473 = vmatprep.subr.mxu0 %v2690_v11  ;;  %1544 = vmatprep.subr.mxu1 %v2692_v30  ;;  %v2772_v11 = vld [vmem:[%s5716_s4 + $0xed8] sm:$0xff]  ;;  %v1295_v30 = vadd.f32 %v2677_v1, %v1287_v0  ;;  %v2862_v0 = vld [vmem:[%s5716_s4 + $0x1168] sm:$0xff] }
 0x110   : > { %1474 = vmatpush1.msra.mxu0 %v2689_v12  ;;  %1545 = vmatpush1.msra.mxu1 %v2691_v13  ;;  %v2679_v12 = vrot.slane %v1298_v2, 11  ;;  %v2769_v13 = vld [vmem:[%s5716_s4 + $0xec0] sm:$0xff]  ;;  %v2864_v1 = vld [vmem:[%s5716_s4 + $0x1178] sm:$0xff] }
 0x111   : > { %1475 = vmatprep.subr.mxu0 %v2686_v15  ;;  %1546 = vmatprep.subr.mxu1 %v2688_v16  ;;  %v2771_v15 = vld [vmem:[%s5716_s4 + $0xed0] sm:$0xff]  ;;  %v2766_v16 = vld [vmem:[%s5716_s4 + $0xea8] sm:$0xff]  ;;  %v2861_v2 = vld [vmem:[%s5716_s4 + $0x1160] sm:$0xff] }
 0x112   : > { %1476 = vmatpush1.msra.mxu0 %v2685_v17  ;;  %1547 = vmatpush1.msra.mxu1 %v2687_v18  ;;  %v2768_v17 = vld [vmem:[%s5716_s4 + $0xeb8] sm:$0xff]  ;;  %v2765_v18 = vld [vmem:[%s5716_s4 + $0xea0] sm:$0xff] }
 0x113   : > { %1477 = vmatprep.subr.mxu0 %v2682_v19  ;;  %1548 = vmatprep.subr.mxu1 %v2684_v20  ;;  %v2767_v19 = vld [vmem:[%s5716_s4 + $0xeb0] sm:$0xff]  ;;  %v2762_v20 = vld [vmem:[%s5716_s4 + $0xe88] sm:$0xff] }
 0x114   : > { %1478 = vmatpush1.msra.mxu0 %v2681_v21  ;;  %1549 = vmatpush1.msra.mxu1 %v2683_v22  ;;  %v2764_v21 = vld [vmem:[%s5716_s4 + $0xe98] sm:$0xff]  ;;  %v1303_v22 = vadd.f32 %v2679_v12, %v1295_v30  ;;  %v2855_v30 = vld [vmem:[%s5716_s4 + $0x1130] sm:$0xff]  ;;  %v2850_v12 = vld [vmem:[%s5716_s4 + $0x1108] sm:$0xff] }
 0x115   : > { %1479 = vmatprep.subr.mxu0 %v2806_v23  ;;  %1550 = vmatprep.subr.mxu1 %v2808_v24  ;;  %v2761_v23 = vld [vmem:[%s5716_s4 + $0xe80] sm:$0xff]  ;;  %v2763_v24 = vld [vmem:[%s5716_s4 + $0xe90] sm:$0xff] }
 0x116   : > { %1480 = vmatpush2.msra.mxu0 %v2805_v25  ;;  %1551 = vmatpush2.msra.mxu1 %v2807_v26  ;;  %v1305_v25 = vstv %s4786_s14  ;;  %v2758_v26 = vld [vmem:[%s5716_s4 + $0xe68] sm:$0xff]  ;;  %s5083_s14 = sld [smem:[#allocation2 + $0x202]] }
 0x117   : > { %1481 = vmatprep.subr.mxu0 %v2802_v27  ;;  %1552 = vmatprep.subr.mxu1 %v2804_v28  ;;  %v2760_v27 = vld [vmem:[%s5716_s4 + $0xe78] sm:$0xff]  ;;  %v2757_v28 = vld [vmem:[%s5716_s4 + $0xe60] sm:$0xff] }
 0x118   : > { %1482 = vmatpush2.msra.mxu0 %v2801_v29  ;;  %1553 = vmatpush2.msra.mxu1 %v2803_v31  ;;  %v2759_v29 = vld [vmem:[%s5716_s4 + $0xe70] sm:$0xff]  ;;  %v2754_v31 = vld [vmem:[%s5716_s4 + $0xe48] sm:$0xff] }
 0x119   : > { %1483 = vmatprep.subr.mxu0 %v2798_v33  ;;  %1554 = vmatprep.subr.mxu1 %v2800_v34  ;;  %v1306_v33 = vadd.f32 %v1305_v25, %v1303_v22  ;;  %v2753_v34 = vld [vmem:[%s5716_s4 + $0xe40] sm:$0xff]  ;;  %v2844_v22 = vld [vmem:[%s5716_s4 + $0x10d8] sm:$0xff]  ;;  %v2838_v25 = vld [vmem:[%s5716_s4 + $0x10a8] sm:$0xff] }
 0x11a   : > { %1484 = vmatpush2.msra.mxu0 %v2797_v35  ;;  %1555 = vmatpush2.msra.mxu1 %v2799_v36  ;;  %v2755_v35 = vld [vmem:[%s5716_s4 + $0xe50] sm:$0xff]  ;;  %v2750_v36 = vld [vmem:[%s5716_s4 + $0xe28] sm:$0xff] }
 0x11b   : > { %1485 = vmatprep.subr.mxu0 %v2794_v37  ;;  %1556 = vmatprep.subr.mxu1 %v2796_v38  ;;  %v2752_v37 = vld [vmem:[%s5716_s4 + $0xe38] sm:$0xff]  ;;  %v2749_v38 = vld [vmem:[%s5716_s4 + $0xe20] sm:$0xff]  ;;  %v1444_v42 = vrot.slane %v1306_v33, %v3632_v9 }
 0x11c   : > { %1486 = vmatpush2.msra.mxu0 %v2793_v40  ;;  %1557 = vmatpush2.msra.mxu1 %v2795_v41  ;;  %v2746_v40 = vld [vmem:[%s5716_s4 + $0xe08] sm:$0xff]  ;;  %v2748_v41 = vld [vmem:[%s5716_s4 + $0xe18] sm:$0xff] }
 0x11d   : > { %1487 = vmatprep.subr.mxu0 %v2790_v44  ;;  %1558 = vmatprep.subr.mxu1 %v2792_v45  ;;  %v2747_v44 = vld [vmem:[%s5716_s4 + $0xe10] sm:$0xff]  ;;  %v1440_v45 = vrot.slane %v1306_v33, %v3647_v14 }
 0x11e   : > { %1488 = vmatpush2.msra.mxu0 %v2789_v46  ;;  %1559 = vmatpush2.msra.mxu1 %v2791_v47  ;;  %v2878_v46 = vld [vmem:[%s5716_s4 + $0x11e8] sm:$0xff]  ;;  %v2880_v47 = vld [vmem:[%s5716_s4 + $0x11f8] sm:$0xff]  ;;  %v2835_v33 = vld [vmem:[%s5716_s4 + $0x1090] sm:$0xff] }
 0x11f   : > { %1489 = vmatprep.subr.mxu0 %v2786_v48  ;;  %1560 = vmatprep.subr.mxu1 %v2788_v49  ;;  %v2877_v48 = vld [vmem:[%s5716_s4 + $0x11e0] sm:$0xff]  ;;  %v2879_v49 = vld [vmem:[%s5716_s4 + $0x11f0] sm:$0xff] }
 0x120   : > { %1490 = vmatpush2.msra.mxu0 %v2785_v54  ;;  %1561 = vmatpush2.msra.mxu1 %v2787_v55  ;;  %v2875_v54 = vld [vmem:[%s5716_s4 + $0x11d0] sm:$0xff]  ;;  %v2870_v55 = vld [vmem:[%s5716_s4 + $0x11a8] sm:$0xff] }
 0x121   : > { %1491 = vmatprep.subr.mxu0 %v2782_v57  ;;  %1562 = vmatprep.subr.mxu1 %v2784_v58  ;;  %v2869_v57 = vld [vmem:[%s5716_s4 + $0x11a0] sm:$0xff]  ;;  %v2871_v58 = vld [vmem:[%s5716_s4 + $0x11b0] sm:$0xff] }
 0x122   : > { %1492 = vmatpush2.msra.mxu0 %v2781_v59  ;;  %1563 = vmatpush2.msra.mxu1 %v2783_v60  ;;  %v2866_v59 = vld [vmem:[%s5716_s4 + $0x1188] sm:$0xff]  ;;  %v2868_v60 = vld [vmem:[%s5716_s4 + $0x1198] sm:$0xff] }
 0x123   : > { %1493 = vmatprep.subr.mxu0 %v2778_v61  ;;  %1564 = vmatprep.subr.mxu1 %v2780_v63  ;;  %v2865_v61 = vld [vmem:[%s5716_s4 + $0x1180] sm:$0xff]  ;;  %v2867_v63 = vld [vmem:[%s5716_s4 + $0x1190] sm:$0xff] }
 0x124   : > { %1494 = vmatpush2.msra.mxu0 %v2777_v3  ;;  %1565 = vmatpush2.msra.mxu1 %v2779_v4  ;;  %v2863_v3 = vld [vmem:[%s5716_s4 + $0x1170] sm:$0xff]  ;;  %v2858_v4 = vld [vmem:[%s5716_s4 + $0x1148] sm:$0xff] }
 0x125   : > { %1495 = vmatprep.subr.mxu0 %v2774_v5  ;;  %1566 = vmatprep.subr.mxu1 %v2776_v8  ;;  %v2860_v5 = vld [vmem:[%s5716_s4 + $0x1158] sm:$0xff]  ;;  %v2857_v8 = vld [vmem:[%s5716_s4 + $0x1140] sm:$0xff] }
 0x126   : > { %1496 = vmatpush2.msra.mxu0 %v2773_v6  ;;  %1567 = vmatpush2.msra.mxu1 %v2775_v7  ;;  %v2859_v6 = vld [vmem:[%s5716_s4 + $0x1150] sm:$0xff]  ;;  %v2854_v7 = vld [vmem:[%s5716_s4 + $0x1128] sm:$0xff] }
 0x127   : > { %1497 = vmatprep.subr.mxu0 %v2770_v10  ;;  %1568 = vmatprep.subr.mxu1 %v2772_v11  ;;  %v2856_v10 = vld [vmem:[%s5716_s4 + $0x1138] sm:$0xff]  ;;  %v2853_v11 = vld [vmem:[%s5716_s4 + $0x1120] sm:$0xff] }
 0x128   : > { %1498 = vmatpush2.msra.mxu0 %v2769_v13  ;;  %1569 = vmatpush2.msra.mxu1 %v2771_v15  ;;  %v2852_v13 = vld [vmem:[%s5716_s4 + $0x1118] sm:$0xff]  ;;  %v2849_v15 = vld [vmem:[%s5716_s4 + $0x1100] sm:$0xff] }
 0x129   : > { %1499 = vmatprep.subr.mxu0 %v2766_v16  ;;  %1570 = vmatprep.subr.mxu1 %v2768_v17  ;;  %v2851_v16 = vld [vmem:[%s5716_s4 + $0x1110] sm:$0xff]  ;;  %v2846_v17 = vld [vmem:[%s5716_s4 + $0x10e8] sm:$0xff] }
 0x12a   : > { %1500 = vmatpush2.msra.mxu0 %v2765_v18  ;;  %1571 = vmatpush2.msra.mxu1 %v2767_v19  ;;  %v2848_v18 = vld [vmem:[%s5716_s4 + $0x10f8] sm:$0xff]  ;;  %v2845_v19 = vld [vmem:[%s5716_s4 + $0x10e0] sm:$0xff] }
 0x12b   : > { %1501 = vmatprep.subr.mxu0 %v2762_v20  ;;  %1572 = vmatprep.subr.mxu1 %v2764_v21  ;;  %v2847_v20 = vld [vmem:[%s5716_s4 + $0x10f0] sm:$0xff]  ;;  %v2842_v21 = vld [vmem:[%s5716_s4 + $0x10c8] sm:$0xff] }
 0x12c   : > { %1502 = vmatpush2.msra.mxu0 %v2761_v23  ;;  %1573 = vmatpush2.msra.mxu1 %v2763_v24  ;;  %v2841_v23 = vld [vmem:[%s5716_s4 + $0x10c0] sm:$0xff]  ;;  %v2843_v24 = vld [vmem:[%s5716_s4 + $0x10d0] sm:$0xff] }
 0x12d   : > { %1503 = vmatprep.subr.mxu0 %v2758_v26  ;;  %1574 = vmatprep.subr.mxu1 %v2760_v27  ;;  %v2840_v26 = vld [vmem:[%s5716_s4 + $0x10b8] sm:$0xff]  ;;  %v2837_v27 = vld [vmem:[%s5716_s4 + $0x10a0] sm:$0xff] }
 0x12e   : > { %1504 = vmatpush2.msra.mxu0 %v2757_v28  ;;  %1575 = vmatpush2.msra.mxu1 %v2759_v29  ;;  %v2839_v28 = vld [vmem:[%s5716_s4 + $0x10b0] sm:$0xff]  ;;  %v2834_v29 = vld [vmem:[%s5716_s4 + $0x1088] sm:$0xff] }
 0x12f   : > { %1505 = vmatprep.subr.mxu0 %v2754_v31  ;;  %1576 = vmatprep.subr.mxu1 %v2756_v32  ;;  %v2836_v31 = vld [vmem:[%s5716_s4 + $0x1098] sm:$0xff]  ;;  %v2833_v32 = vld [vmem:[%s5716_s4 + $0x1080] sm:$0xff] }
 0x130   : > { %1506 = vmatpush2.msra.mxu0 %v2753_v34  ;;  %1577 = vmatpush2.msra.mxu1 %v2755_v35  ;;  %v2830_v34 = vld [vmem:[%s5716_s4 + $0x1068] sm:$0xff]  ;;  %v2832_v35 = vld [vmem:[%s5716_s4 + $0x1078] sm:$0xff] }
 0x131   : > { %1507 = vmatprep.subr.mxu0 %v2750_v36  ;;  %1578 = vmatprep.subr.mxu1 %v2752_v37  ;;  %v2829_v36 = vld [vmem:[%s5716_s4 + $0x1060] sm:$0xff]  ;;  %v2831_v37 = vld [vmem:[%s5716_s4 + $0x1070] sm:$0xff] }
 0x132   : > { %1508 = vmatpush2.msra.mxu0 %v2749_v38  ;;  %1579 = vmatpush2.msra.mxu1 %v2751_v39  ;;  %v2826_v38 = vld [vmem:[%s5716_s4 + $0x1048] sm:$0xff]  ;;  %v2828_v39 = vld [vmem:[%s5716_s4 + $0x1058] sm:$0xff] }
 0x133   : > { %1509 = vmatprep.subr.mxu0 %v2746_v40  ;;  %1580 = vmatprep.subr.mxu1 %v2748_v41  ;;  %v2825_v40 = vld [vmem:[%s5716_s4 + $0x1040] sm:$0xff]  ;;  %v2827_v41 = vld [vmem:[%s5716_s4 + $0x1050] sm:$0xff] }
 0x134   : > { %1510 = vmatpush2.msra.mxu0 %v2745_v43  ;;  %1511 = vmatprep.mubr.f32.mxu0 %v1444_v42  ;;  %v2824_v43 = vld [vmem:[%s5716_s4 + $0x1038] sm:$0xff] }
 0x135   : > { %1581 = vmatpush2.msra.mxu1 %v2747_v44  ;;  %1582 = vmatprep.mubr.f32.mxu1 %v1444_v42  ;;  %v2822_v42 = vld [vmem:[%s5716_s4 + $0x1028] sm:$0xff]  ;;  %v2821_v44 = vld [vmem:[%s5716_s4 + $0x1020] sm:$0xff] }
 0x136   : > { %1512 = vmatmul.mubr.f32.vlgmr.msra.gmra.mxu0 %v1440_v45  ;;  %1583 = vmatmul.mubr.f32.vlgmr.msra.gmra.mxu1 %v1440_v45  ;;  %v2823_v45 = vld [vmem:[%s5716_s4 + $0x1030] sm:$0xff] }
 0x137   : > { %1789 = vmatprep.subr.mxu0 %v2878_v46  ;;  %1860 = vmatprep.subr.mxu1 %v2880_v47  ;;  %v2818_v46 = vld [vmem:[%s5716_s4 + $0x1008] sm:$0xff]  ;;  %v2820_v47 = vld [vmem:[%s5716_s4 + $0x1018] sm:$0xff] }
 0x138   : > { %1790 = vmatpush1.msra.mxu0 %v2877_v48  ;;  %1861 = vmatpush1.msra.mxu1 %v2879_v49  ;;  %v2817_v48 = vld [vmem:[%s5716_s4 + $0x1000] sm:$0xff]  ;;  %v2819_v49 = vld [vmem:[%s5716_s4 + $0x1010] sm:$0xff] }
 0x139   : > { %1791 = vmatprep.subr.mxu0 %v2874_v50  ;;  %1862 = vmatprep.subr.mxu1 %v2876_v52  ;;  %v2942_v50 = vld [vmem:[%s5716_s4 + $0x13e8] sm:$0xff]  ;;  %v2944_v52 = vld [vmem:[%s5716_s4 + $0x13f8] sm:$0xff] }
 0x13a   : > { %1792 = vmatpush1.msra.mxu0 %v2873_v53  ;;  %1863 = vmatpush1.msra.mxu1 %v2875_v54  ;;  %v2941_v53 = vld [vmem:[%s5716_s4 + $0x13e0] sm:$0xff]  ;;  %v2943_v54 = vld [vmem:[%s5716_s4 + $0x13f0] sm:$0xff] }
 0x13b   : > { %1793 = vmatprep.subr.mxu0 %v2870_v55  ;;  %1864 = vmatprep.subr.mxu1 %v2872_v56  ;;  %v2938_v55 = vld [vmem:[%s5716_s4 + $0x13c8] sm:$0xff]  ;;  %v2940_v56 = vld [vmem:[%s5716_s4 + $0x13d8] sm:$0xff] }
 0x13c   : > { %1794 = vmatpush1.msra.mxu0 %v2869_v57  ;;  %1865 = vmatpush1.msra.mxu1 %v2871_v58  ;;  %v2937_v57 = vld [vmem:[%s5716_s4 + $0x13c0] sm:$0xff]  ;;  %v2939_v58 = vld [vmem:[%s5716_s4 + $0x13d0] sm:$0xff] }
 0x13d   : > { %1795 = vmatprep.subr.mxu0 %v2866_v59  ;;  %1866 = vmatprep.subr.mxu1 %v2868_v60  ;;  %v1623_v59 = vstv %s5055_s15  ;;  %v2934_v60 = vld [vmem:[%s5716_s4 + $0x13a8] sm:$0xff] }
 0x13e   : > { %1796 = vmatpush1.msra.mxu0 %v2865_v61  ;;  %1867 = vmatpush1.msra.mxu1 %v2867_v63  ;;  %v2936_v61 = vld [vmem:[%s5716_s4 + $0x13b8] sm:$0xff]  ;;  %v2933_v63 = vld [vmem:[%s5716_s4 + $0x13a0] sm:$0xff] }
 0x13f   : > { %1797 = vmatprep.subr.mxu0 %v2862_v0  ;;  %1868 = vmatprep.subr.mxu1 %v2864_v1  ;;  %v2935_v0 = vld [vmem:[%s5716_s4 + $0x13b0] sm:$0xff]  ;;  %v2930_v1 = vld [vmem:[%s5716_s4 + $0x1388] sm:$0xff] }
 0x140   : > { %1798 = vmatpush1.msra.mxu0 %v2861_v2  ;;  %1869 = vmatpush1.msra.mxu1 %v2863_v3  ;;  %v2932_v2 = vld [vmem:[%s5716_s4 + $0x1398] sm:$0xff]  ;;  %v5131_v3 = vld [vmem:[%s3510_s29] sm:$0xff] }
 0x141   : > { %1799 = vmatprep.subr.mxu0 %v2858_v4  ;;  %1870 = vmatprep.subr.mxu1 %v2860_v5  ;;  %v1624_v4 = vmul.f32 %v5131_v3, %v1623_v59  ;;  %v2929_v5 = vld [vmem:[%s5716_s4 + $0x1380] sm:$0xff]  ;;  %v2890_v59 = vld [vmem:[%s5716_s4 + $0x1248] sm:$0xff] }
 0x142   : > { %1800 = vmatpush1.msra.mxu0 %v2857_v8  ;;  %1871 = vmatpush1.msra.mxu1 %v2859_v6  ;;  %v2931_v8 = vld [vmem:[%s5716_s4 + $0x1390] sm:$0xff]  ;;  %v1620_v6 = vstv %s5075_s9 }
 0x143   : > { %1801 = vmatprep.subr.mxu0 %v2854_v7  ;;  %1872 = vmatprep.subr.mxu1 %v2856_v10  ;;  %v1631_v7 = vstv %s5083_s14  ;;  %v2926_v10 = vld [vmem:[%s5716_s4 + $0x1368] sm:$0xff] }
 0x144   : > { %1802 = vmatpush1.msra.mxu0 %v2853_v11  ;;  %1873 = vmatpush1.msra.mxu1 %v2855_v30  ;;  %v2928_v11 = vld [vmem:[%s5716_s4 + $0x1378] sm:$0xff]  ;;  %v2925_v30 = vld [vmem:[%s5716_s4 + $0x1360] sm:$0xff] }
 0x145   : > { %1803 = vmatprep.subr.mxu0 %v2850_v12  ;;  %1874 = vmatprep.subr.mxu1 %v2852_v13  ;;  %v2927_v12 = vld [vmem:[%s5716_s4 + $0x1370] sm:$0xff]  ;;  %v2922_v13 = vld [vmem:[%s5716_s4 + $0x1348] sm:$0xff] }
 0x146   : > { %1804 = vmatpush1.msra.mxu0 %v2849_v15  ;;  %1875 = vmatpush1.msra.mxu1 %v2851_v16  ;;  %v2924_v15 = vld [vmem:[%s5716_s4 + $0x1358] sm:$0xff]  ;;  %v1621_v16 = vmul.f32 %v5131_v3, %v1620_v6 }
 0x147   : > { %1805 = vmatprep.subr.mxu0 %v2846_v17  ;;  %1876 = vmatprep.subr.mxu1 %v2848_v18  ;;  %v2811_v17 = vrot.slane %v1624_v4, 9  ;;  %v1632_v18 = vmul.f32 %v5131_v3, %v1631_v7  ;;  %v2885_v4 = vld [vmem:[%s5716_s4 + $0x1220] sm:$0xff]  ;;  %v2884_v6 = vld [vmem:[%s5716_s4 + $0x1218] sm:$0xff] }
 0x148   : > { %1806 = vmatpush1.msra.mxu0 %v2845_v19  ;;  %1877 = vmatpush1.msra.mxu1 %v2847_v20  ;;  %v2921_v19 = vld [vmem:[%s5716_s4 + $0x1340] sm:$0xff]  ;;  %v2923_v20 = vld [vmem:[%s5716_s4 + $0x1350] sm:$0xff] }
 0x149   : > { %1807 = vmatprep.subr.mxu0 %v2842_v21  ;;  %1878 = vmatprep.subr.mxu1 %v2844_v22  ;;  %v1639_v21 = vstv %s5110_s12  ;;  %v2918_v22 = vld [vmem:[%s5716_s4 + $0x1328] sm:$0xff] }
 0x14a   : > { %1808 = vmatpush1.msra.mxu0 %v2841_v23  ;;  %1879 = vmatpush1.msra.mxu1 %v2843_v24  ;;  %v2920_v23 = vld [vmem:[%s5716_s4 + $0x1338] sm:$0xff]  ;;  %v2917_v24 = vld [vmem:[%s5716_s4 + $0x1320] sm:$0xff] }
 0x14b   : > { %1809 = vmatprep.subr.mxu0 %v2838_v25  ;;  %1880 = vmatprep.subr.mxu1 %v2840_v26  ;;  %v2919_v25 = vld [vmem:[%s5716_s4 + $0x1330] sm:$0xff]  ;;  %v2914_v26 = vld [vmem:[%s5716_s4 + $0x1308] sm:$0xff] }
 0x14c   : > { %1810 = vmatpush1.msra.mxu0 %v2837_v27  ;;  %1881 = vmatpush1.msra.mxu1 %v2839_v28  ;;  %v2916_v27 = vld [vmem:[%s5716_s4 + $0x1318] sm:$0xff]  ;;  %v1629_v28 = vadd.f32 %v2811_v17, %v1621_v16  ;;  %v3015_v16 = vld [vmem:[%s5716_s4 + $0x15f0] sm:$0xff]  ;;  %v3010_v17 = vld [vmem:[%s5716_s4 + $0x15c8] sm:$0xff] }
 0x14d   : > { %1811 = vmatprep.subr.mxu0 %v2834_v29  ;;  %1882 = vmatprep.subr.mxu1 %v2836_v31  ;;  %v2813_v29 = vrot.slane %v1632_v18, 10  ;;  %v1640_v31 = vmul.f32 %v5131_v3, %v1639_v21  ;;  %v3012_v18 = vld [vmem:[%s5716_s4 + $0x15d8] sm:$0xff]  ;;  %v3006_v21 = vld [vmem:[%s5716_s4 + $0x15a8] sm:$0xff] }
 0x14e   : > { %1812 = vmatpush1.msra.mxu0 %v2833_v32  ;;  %1883 = vmatpush1.msra.mxu1 %v2835_v33  ;;  %v2913_v32 = vld [vmem:[%s5716_s4 + $0x1300] sm:$0xff]  ;;  %v2915_v33 = vld [vmem:[%s5716_s4 + $0x1310] sm:$0xff] }
 0x14f   : > { %1813 = vmatprep.subr.mxu0 %v2830_v34  ;;  %1884 = vmatprep.subr.mxu1 %v2832_v35  ;;  %v2910_v34 = vld [vmem:[%s5716_s4 + $0x12e8] sm:$0xff]  ;;  %v2912_v35 = vld [vmem:[%s5716_s4 + $0x12f8] sm:$0xff] }
 0x150   : > { %1814 = vmatpush1.msra.mxu0 %v2829_v36  ;;  %1885 = vmatpush1.msra.mxu1 %v2831_v37  ;;  %v2909_v36 = vld [vmem:[%s5716_s4 + $0x12e0] sm:$0xff]  ;;  %v2911_v37 = vld [vmem:[%s5716_s4 + $0x12f0] sm:$0xff] }
 0x151   : > { %1815 = vmatprep.subr.mxu0 %v2826_v38  ;;  %1886 = vmatprep.subr.mxu1 %v2828_v39  ;;  %v2906_v38 = vld [vmem:[%s5716_s4 + $0x12c8] sm:$0xff]  ;;  %v2908_v39 = vld [vmem:[%s5716_s4 + $0x12d8] sm:$0xff] }
 0x152   : > { %1816 = vmatpush1.msra.mxu0 %v2825_v40  ;;  %1887 = vmatpush1.msra.mxu1 %v2827_v41  ;;  %v1637_v40 = vadd.f32 %v2813_v29, %v1629_v28  ;;  %v2815_v41 = vrot.slane %v1640_v31, 11  ;;  %v3003_v28 = vld [vmem:[%s5716_s4 + $0x1590] sm:$0xff]  ;;  %v2998_v29 = vld [vmem:[%s5716_s4 + $0x1568] sm:$0xff]  ;;  %v3000_v31 = vld [vmem:[%s5716_s4 + $0x1578] sm:$0xff] }
 0x153   : > { %1817 = vmatprep.subr.mxu0 %v2822_v42  ;;  %1888 = vmatprep.subr.mxu1 %v2824_v43  ;;  %v2905_v42 = vld [vmem:[%s5716_s4 + $0x12c0] sm:$0xff]  ;;  %v2907_v43 = vld [vmem:[%s5716_s4 + $0x12d0] sm:$0xff] }
 0x154   : > { %1818 = vmatpush1.msra.mxu0 %v2821_v44  ;;  %1889 = vmatpush1.msra.mxu1 %v2823_v45  ;;  %v2902_v44 = vld [vmem:[%s5716_s4 + $0x12a8] sm:$0xff]  ;;  %v2904_v45 = vld [vmem:[%s5716_s4 + $0x12b8] sm:$0xff] }
 0x155   : > { %1819 = vmatprep.subr.mxu0 %v2818_v46  ;;  %1890 = vmatprep.subr.mxu1 %v2820_v47  ;;  %v2901_v46 = vld [vmem:[%s5716_s4 + $0x12a0] sm:$0xff]  ;;  %v2903_v47 = vld [vmem:[%s5716_s4 + $0x12b0] sm:$0xff] }
 0x156   : > { %1820 = vmatpush1.msra.mxu0 %v2817_v48  ;;  %1891 = vmatpush1.msra.mxu1 %v2819_v49  ;;  %v2898_v48 = vld [vmem:[%s5716_s4 + $0x1288] sm:$0xff]  ;;  %v2900_v49 = vld [vmem:[%s5716_s4 + $0x1298] sm:$0xff] }
 0x157   : > { %1821 = vmatprep.subr.mxu0 %v2942_v50  ;;  %1892 = vmatprep.subr.mxu1 %v2944_v52  ;;  %v1645_v50 = vadd.f32 %v2815_v41, %v1637_v40  ;;  %v2897_v52 = vld [vmem:[%s5716_s4 + $0x1280] sm:$0xff]  ;;  %v2991_v41 = vld [vmem:[%s5716_s4 + $0x1530] sm:$0xff] }
 0x158   : > { %1822 = vmatpush2.msra.mxu0 %v2941_v53  ;;  %1893 = vmatpush2.msra.mxu1 %v2943_v54  ;;  %v2899_v53 = vld [vmem:[%s5716_s4 + $0x1290] sm:$0xff]  ;;  %v1647_v54 = vstv %s5194_s22  ;;  %v2989_v40 = vld [vmem:[%s5716_s4 + $0x1520] sm:$0xff] }
 0x159   : > { %1823 = vmatprep.subr.mxu0 %v2938_v55  ;;  %1894 = vmatprep.subr.mxu1 %v2940_v56  ;;  %v2894_v55 = vld [vmem:[%s5716_s4 + $0x1268] sm:$0xff]  ;;  %v2896_v56 = vld [vmem:[%s5716_s4 + $0x1278] sm:$0xff] }
 0x15a   : > { %1824 = vmatpush2.msra.mxu0 %v2937_v57  ;;  %1895 = vmatpush2.msra.mxu1 %v2939_v58  ;;  %v2893_v57 = vld [vmem:[%s5716_s4 + $0x1260] sm:$0xff]  ;;  %v2895_v58 = vld [vmem:[%s5716_s4 + $0x1270] sm:$0xff] }
 0x15b   : > { %1825 = vmatprep.subr.mxu0 %v2934_v60  ;;  %1896 = vmatprep.subr.mxu1 %v2936_v61  ;;  %v2892_v60 = vld [vmem:[%s5716_s4 + $0x1258] sm:$0xff]  ;;  %v1648_v61 = vadd.f32 %v1647_v54, %v1645_v50  ;;  %v2978_v50 = vld [vmem:[%s5716_s4 + $0x14c8] sm:$0xff]  ;;  %v2979_v54 = vld [vmem:[%s5716_s4 + $0x14d0] sm:$0xff] }
 0x15c   : > { %1826 = vmatpush2.msra.mxu0 %v2933_v63  ;;  %1897 = vmatpush2.msra.mxu1 %v2935_v0  ;;  %v2889_v63 = vld [vmem:[%s5716_s4 + $0x1240] sm:$0xff]  ;;  %v2891_v0 = vld [vmem:[%s5716_s4 + $0x1250] sm:$0xff] }
 0x15d   : > { %1827 = vmatprep.subr.mxu0 %v2930_v1  ;;  %1898 = vmatprep.subr.mxu1 %v2932_v2  ;;  %v2886_v1 = vld [vmem:[%s5716_s4 + $0x1228] sm:$0xff]  ;;  %v2888_v2 = vld [vmem:[%s5716_s4 + $0x1238] sm:$0xff]  ;;  %v1786_v7 = vrot.slane %v1648_v61, %v3632_v9 }
 0x15e   : > { %1828 = vmatpush2.msra.mxu0 %v2929_v5  ;;  %1899 = vmatpush2.msra.mxu1 %v2931_v8  ;;  %v2887_v5 = vld [vmem:[%s5716_s4 + $0x1230] sm:$0xff]  ;;  %v2882_v8 = vld [vmem:[%s5716_s4 + $0x1208] sm:$0xff] }
 0x15f   : > { %1829 = vmatprep.subr.mxu0 %v2926_v10  ;;  %1900 = vmatprep.subr.mxu1 %v2928_v11  ;;  %v2881_v10 = vld [vmem:[%s5716_s4 + $0x1200] sm:$0xff]  ;;  %v2883_v11 = vld [vmem:[%s5716_s4 + $0x1210] sm:$0xff] }
 0x160   : > { %1830 = vmatpush2.msra.mxu0 %v2925_v30  ;;  %1901 = vmatpush2.msra.mxu1 %v2927_v12  ;;  %v1782_v30 = vrot.slane %v1648_v61, %v3647_v14  ;;  %v3014_v12 = vld [vmem:[%s5716_s4 + $0x15e8] sm:$0xff]  ;;  %v2969_v61 = vld [vmem:[%s5716_s4 + $0x1480] sm:$0xff] }
 0x161   : > { %1831 = vmatprep.subr.mxu0 %v2922_v13  ;;  %1902 = vmatprep.subr.mxu1 %v2924_v15  ;;  %v3016_v13 = vld [vmem:[%s5716_s4 + $0x15f8] sm:$0xff]  ;;  %v3013_v15 = vld [vmem:[%s5716_s4 + $0x15e0] sm:$0xff] }
 0x162   : > { %1832 = vmatpush2.msra.mxu0 %v2921_v19  ;;  %1903 = vmatpush2.msra.mxu1 %v2923_v20  ;;  %v3009_v19 = vld [vmem:[%s5716_s4 + $0x15c0] sm:$0xff]  ;;  %v3011_v20 = vld [vmem:[%s5716_s4 + $0x15d0] sm:$0xff] }
 0x163   : > { %1833 = vmatprep.subr.mxu0 %v2918_v22  ;;  %1904 = vmatprep.subr.mxu1 %v2920_v23  ;;  %v3008_v22 = vld [vmem:[%s5716_s4 + $0x15b8] sm:$0xff]  ;;  %v3005_v23 = vld [vmem:[%s5716_s4 + $0x15a0] sm:$0xff] }
 0x164   : > { %1834 = vmatpush2.msra.mxu0 %v2917_v24  ;;  %1905 = vmatpush2.msra.mxu1 %v2919_v25  ;;  %v3007_v24 = vld [vmem:[%s5716_s4 + $0x15b0] sm:$0xff]  ;;  %v3002_v25 = vld [vmem:[%s5716_s4 + $0x1588] sm:$0xff] }
 0x165   : > { %1835 = vmatprep.subr.mxu0 %v2914_v26  ;;  %1906 = vmatprep.subr.mxu1 %v2916_v27  ;;  %v3004_v26 = vld [vmem:[%s5716_s4 + $0x1598] sm:$0xff]  ;;  %v3001_v27 = vld [vmem:[%s5716_s4 + $0x1580] sm:$0xff] }
 0x166   : > { %1836 = vmatpush2.msra.mxu0 %v2913_v32  ;;  %1907 = vmatpush2.msra.mxu1 %v2915_v33  ;;  %v2997_v32 = vld [vmem:[%s5716_s4 + $0x1560] sm:$0xff]  ;;  %v2999_v33 = vld [vmem:[%s5716_s4 + $0x1570] sm:$0xff] }
 0x167   : > { %1837 = vmatprep.subr.mxu0 %v2910_v34  ;;  %1908 = vmatprep.subr.mxu1 %v2912_v35  ;;  %v2994_v34 = vld [vmem:[%s5716_s4 + $0x1548] sm:$0xff]  ;;  %v2996_v35 = vld [vmem:[%s5716_s4 + $0x1558] sm:$0xff] }
 0x168   : > { %1838 = vmatpush2.msra.mxu0 %v2909_v36  ;;  %1909 = vmatpush2.msra.mxu1 %v2911_v37  ;;  %v2993_v36 = vld [vmem:[%s5716_s4 + $0x1540] sm:$0xff]  ;;  %v2995_v37 = vld [vmem:[%s5716_s4 + $0x1550] sm:$0xff] }
 0x169   : > { %1839 = vmatprep.subr.mxu0 %v2906_v38  ;;  %1910 = vmatprep.subr.mxu1 %v2908_v39  ;;  %v2990_v38 = vld [vmem:[%s5716_s4 + $0x1528] sm:$0xff]  ;;  %v2992_v39 = vld [vmem:[%s5716_s4 + $0x1538] sm:$0xff] }
 0x16a   : > { %1840 = vmatpush2.msra.mxu0 %v2905_v42  ;;  %1911 = vmatpush2.msra.mxu1 %v2907_v43  ;;  %v2986_v42 = vld [vmem:[%s5716_s4 + $0x1508] sm:$0xff]  ;;  %v2988_v43 = vld [vmem:[%s5716_s4 + $0x1518] sm:$0xff] }
 0x16b   : > { %1841 = vmatprep.subr.mxu0 %v2902_v44  ;;  %1912 = vmatprep.subr.mxu1 %v2904_v45  ;;  %v2985_v44 = vld [vmem:[%s5716_s4 + $0x1500] sm:$0xff]  ;;  %v2987_v45 = vld [vmem:[%s5716_s4 + $0x1510] sm:$0xff] }
 0x16c   : > { %1842 = vmatpush2.msra.mxu0 %v2901_v46  ;;  %1913 = vmatpush2.msra.mxu1 %v2903_v47  ;;  %v2982_v46 = vld [vmem:[%s5716_s4 + $0x14e8] sm:$0xff]  ;;  %v2984_v47 = vld [vmem:[%s5716_s4 + $0x14f8] sm:$0xff] }
 0x16d   : > { %1843 = vmatprep.subr.mxu0 %v2898_v48  ;;  %1914 = vmatprep.subr.mxu1 %v2900_v49  ;;  %v2981_v48 = vld [vmem:[%s5716_s4 + $0x14e0] sm:$0xff]  ;;  %v2983_v49 = vld [vmem:[%s5716_s4 + $0x14f0] sm:$0xff] }
 0x16e   : > { %1844 = vmatpush2.msra.mxu0 %v2897_v52  ;;  %1915 = vmatpush2.msra.mxu1 %v2899_v53  ;;  %v2980_v52 = vld [vmem:[%s5716_s4 + $0x14d8] sm:$0xff]  ;;  %v2977_v53 = vld [vmem:[%s5716_s4 + $0x14c0] sm:$0xff] }
 0x16f   : > { %1845 = vmatprep.subr.mxu0 %v2894_v55  ;;  %1916 = vmatprep.subr.mxu1 %v2896_v56  ;;  %v2974_v55 = vld [vmem:[%s5716_s4 + $0x14a8] sm:$0xff]  ;;  %v2976_v56 = vld [vmem:[%s5716_s4 + $0x14b8] sm:$0xff] }
 0x170   : > { %1846 = vmatpush2.msra.mxu0 %v2893_v57  ;;  %1917 = vmatpush2.msra.mxu1 %v2895_v58  ;;  %v2973_v57 = vld [vmem:[%s5716_s4 + $0x14a0] sm:$0xff]  ;;  %v2975_v58 = vld [vmem:[%s5716_s4 + $0x14b0] sm:$0xff] }
 0x171   : > { %1847 = vmatprep.subr.mxu0 %v2890_v59  ;;  %1918 = vmatprep.subr.mxu1 %v2892_v60  ;;  %v2970_v59 = vld [vmem:[%s5716_s4 + $0x1488] sm:$0xff]  ;;  %v2972_v60 = vld [vmem:[%s5716_s4 + $0x1498] sm:$0xff] }
 0x172   : > { %1848 = vmatpush2.msra.mxu0 %v2889_v63  ;;  %1919 = vmatpush2.msra.mxu1 %v2891_v0  ;;  %v2971_v63 = vld [vmem:[%s5716_s4 + $0x1490] sm:$0xff]  ;;  %v2966_v0 = vld [vmem:[%s5716_s4 + $0x1468] sm:$0xff] }
 0x173   : > { %1849 = vmatprep.subr.mxu0 %v2886_v1  ;;  %1920 = vmatprep.subr.mxu1 %v2888_v2  ;;  %v2968_v1 = vld [vmem:[%s5716_s4 + $0x1478] sm:$0xff]  ;;  %v2965_v2 = vld [vmem:[%s5716_s4 + $0x1460] sm:$0xff] }
 0x174   : > { %1850 = vmatpush2.msra.mxu0 %v2885_v4  ;;  %1921 = vmatpush2.msra.mxu1 %v2887_v5  ;;  %v2967_v4 = vld [vmem:[%s5716_s4 + $0x1470] sm:$0xff]  ;;  %v2962_v5 = vld [vmem:[%s5716_s4 + $0x1448] sm:$0xff] }
 0x175   : > { %1851 = vmatprep.subr.mxu0 %v2882_v8  ;;  %1922 = vmatprep.subr.mxu1 %v2884_v6  ;;  %v2964_v8 = vld [vmem:[%s5716_s4 + $0x1458] sm:$0xff]  ;;  %v2961_v6 = vld [vmem:[%s5716_s4 + $0x1440] sm:$0xff] }
 0x176   : > { %1852 = vmatpush2.msra.mxu0 %v2881_v10  ;;  %1853 = vmatprep.mubr.f32.mxu0 %v1786_v7  ;;  %v2958_v10 = vld [vmem:[%s5716_s4 + $0x1428] sm:$0xff] }
 0x177   : > { %1923 = vmatpush2.msra.mxu1 %v2883_v11  ;;  %1924 = vmatprep.mubr.f32.mxu1 %v1786_v7  ;;  %v2963_v7 = vld [vmem:[%s5716_s4 + $0x1450] sm:$0xff]  ;;  %v2960_v11 = vld [vmem:[%s5716_s4 + $0x1438] sm:$0xff] }
 0x178   : > { %1854 = vmatmul.mubr.f32.vlgmr.msra.gmra.mxu0 %v1782_v30  ;;  %1925 = vmatmul.mubr.f32.vlgmr.msra.gmra.mxu1 %v1782_v30  ;;  %v2957_v30 = vld [vmem:[%s5716_s4 + $0x1420] sm:$0xff] }
 0x179   : > { %2131 = vmatprep.subr.mxu0 %v3014_v12  ;;  %2202 = vmatprep.subr.mxu1 %v3016_v13  ;;  %v2959_v12 = vld [vmem:[%s5716_s4 + $0x1430] sm:$0xff]  ;;  %v2954_v13 = vld [vmem:[%s5716_s4 + $0x1408] sm:$0xff] }
 0x17a   : > { %2132 = vmatpush1.msra.mxu0 %v3013_v15  ;;  %2203 = vmatpush1.msra.mxu1 %v3015_v16  ;;  %v2956_v15 = vld [vmem:[%s5716_s4 + $0x1418] sm:$0xff]  ;;  %v2953_v16 = vld [vmem:[%s5716_s4 + $0x1400] sm:$0xff] }
 0x17b   : > { %2133 = vmatprep.subr.mxu0 %v3010_v17  ;;  %2204 = vmatprep.subr.mxu1 %v3012_v18  ;;  %v2955_v17 = vld [vmem:[%s5716_s4 + $0x1410] sm:$0xff]  ;;  %v3078_v18 = vld [vmem:[%s5716_s4 + $0x17e8] sm:$0xff] }
 0x17c   : > { %2134 = vmatpush1.msra.mxu0 %v3009_v19  ;;  %2205 = vmatpush1.msra.mxu1 %v3011_v20  ;;  %v3080_v19 = vld [vmem:[%s5716_s4 + $0x17f8] sm:$0xff]  ;;  %v3077_v20 = vld [vmem:[%s5716_s4 + $0x17e0] sm:$0xff] }
 0x17d   : > { %2135 = vmatprep.subr.mxu0 %v3006_v21  ;;  %2206 = vmatprep.subr.mxu1 %v3008_v22  ;;  %v3079_v21 = vld [vmem:[%s5716_s4 + $0x17f0] sm:$0xff]  ;;  %v3074_v22 = vld [vmem:[%s5716_s4 + $0x17c8] sm:$0xff] }
 0x17e   : > { %2136 = vmatpush1.msra.mxu0 %v3005_v23  ;;  %2207 = vmatpush1.msra.mxu1 %v3007_v24  ;;  %v3076_v23 = vld [vmem:[%s5716_s4 + $0x17d8] sm:$0xff]  ;;  %v3073_v24 = vld [vmem:[%s5716_s4 + $0x17c0] sm:$0xff] }
 0x17f   : > { %2137 = vmatprep.subr.mxu0 %v3002_v25  ;;  %2208 = vmatprep.subr.mxu1 %v3004_v26  ;;  %v3075_v25 = vld [vmem:[%s5716_s4 + $0x17d0] sm:$0xff]  ;;  %v1965_v26 = vstv %s5463_s26 }
 0x180   : > { %2138 = vmatpush1.msra.mxu0 %v3001_v27  ;;  %2209 = vmatpush1.msra.mxu1 %v3003_v28  ;;  %v3070_v27 = vld [vmem:[%s5716_s4 + $0x17a8] sm:$0xff]  ;;  %v3072_v28 = vld [vmem:[%s5716_s4 + $0x17b8] sm:$0xff] }
 0x181   : > { %2139 = vmatprep.subr.mxu0 %v2998_v29  ;;  %2210 = vmatprep.subr.mxu1 %v3000_v31  ;;  %v3069_v29 = vld [vmem:[%s5716_s4 + $0x17a0] sm:$0xff]  ;;  %v3071_v31 = vld [vmem:[%s5716_s4 + $0x17b0] sm:$0xff] }
 0x182   : > { %2140 = vmatpush1.msra.mxu0 %v2997_v32  ;;  %2211 = vmatpush1.msra.mxu1 %v2999_v33  ;;  %v3066_v32 = vld [vmem:[%s5716_s4 + $0x1788] sm:$0xff]  ;;  %v3068_v33 = vld [vmem:[%s5716_s4 + $0x1798] sm:$0xff] }
 0x183   : > { %2141 = vmatprep.subr.mxu0 %v2994_v34  ;;  %2212 = vmatprep.subr.mxu1 %v2996_v35  ;;  %v1966_v34 = vmul.f32 %v5131_v3, %v1965_v26  ;;  %v3065_v35 = vld [vmem:[%s5716_s4 + $0x1780] sm:$0xff]  ;;  %v3028_v26 = vld [vmem:[%s5716_s4 + $0x1658] sm:$0xff] }
 0x184   : > { %2142 = vmatpush1.msra.mxu0 %v2993_v36  ;;  %2213 = vmatpush1.msra.mxu1 %v2995_v37  ;;  %v3067_v36 = vld [vmem:[%s5716_s4 + $0x1790] sm:$0xff]  ;;  %v1962_v37 = vstv %s5483_s16  ;;  %s2394_s16 = sshll.u32 %s5728_s19, 2 }
 0x185   : > { %2143 = vmatprep.subr.mxu0 %v2990_v38  ;;  %2214 = vmatprep.subr.mxu1 %v2992_v39  ;;  %v1973_v38 = vstv %s5491_s30  ;;  %v3062_v39 = vld [vmem:[%s5716_s4 + $0x1768] sm:$0xff]  ;;  %s249_s12 = scalar_lea.vmem %s5717_s5, %s2394_s16 }
 0x186   : > { %2144 = vmatpush1.msra.mxu0 %v2989_v40  ;;  %2215 = vmatpush1.msra.mxu1 %v2991_v41  ;;  %v3064_v40 = vld [vmem:[%s5716_s4 + $0x1778] sm:$0xff]  ;;  %v3061_v41 = vld [vmem:[%s5716_s4 + $0x1760] sm:$0xff] }
 0x187   : > { %2145 = vmatprep.subr.mxu0 %v2986_v42  ;;  %2216 = vmatprep.subr.mxu1 %v2988_v43  ;;  %v3063_v42 = vld [vmem:[%s5716_s4 + $0x1770] sm:$0xff]  ;;  %v3058_v43 = vld [vmem:[%s5716_s4 + $0x1748] sm:$0xff] }
 0x188   : > { %2146 = vmatpush1.msra.mxu0 %v2985_v44  ;;  %2217 = vmatpush1.msra.mxu1 %v2987_v45  ;;  %v3060_v44 = vld [vmem:[%s5716_s4 + $0x1758] sm:$0xff]  ;;  %v1963_v45 = vmul.f32 %v5131_v3, %v1962_v37 }
 0x189   : > { %2147 = vmatprep.subr.mxu0 %v2982_v46  ;;  %2218 = vmatprep.subr.mxu1 %v2984_v47  ;;  %v2947_v46 = vrot.slane %v1966_v34, 9  ;;  %v1974_v47 = vmul.f32 %v5131_v3, %v1973_v38  ;;  %v3023_v34 = vld [vmem:[%s5716_s4 + $0x1630] sm:$0xff]  ;;  %v3017_v38 = vld [vmem:[%s5716_s4 + $0x1600] sm:$0xff] }
 0x18a   : > { %2148 = vmatpush1.msra.mxu0 %v2981_v48  ;;  %2219 = vmatpush1.msra.mxu1 %v2983_v49  ;;  %v3057_v48 = vld [vmem:[%s5716_s4 + $0x1740] sm:$0xff]  ;;  %v3059_v49 = vld [vmem:[%s5716_s4 + $0x1750] sm:$0xff] }
 0x18b   : > { %2149 = vmatprep.subr.mxu0 %v2978_v50  ;;  %2220 = vmatprep.subr.mxu1 %v2980_v52  ;;  %v1981_v50 = vstv %s5518_s21  ;;  %v3054_v52 = vld [vmem:[%s5716_s4 + $0x1728] sm:$0xff] }
 0x18c   : > { %2150 = vmatpush1.msra.mxu0 %v2977_v53  ;;  %2221 = vmatpush1.msra.mxu1 %v2979_v54  ;;  %v3056_v53 = vld [vmem:[%s5716_s4 + $0x1738] sm:$0xff]  ;;  %v3053_v54 = vld [vmem:[%s5716_s4 + $0x1720] sm:$0xff] }
 0x18d   : > { %2151 = vmatprep.subr.mxu0 %v2974_v55  ;;  %2222 = vmatprep.subr.mxu1 %v2976_v56  ;;  %v3055_v55 = vld [vmem:[%s5716_s4 + $0x1730] sm:$0xff]  ;;  %v3050_v56 = vld [vmem:[%s5716_s4 + $0x1708] sm:$0xff] }
 0x18e   : > { %2152 = vmatpush1.msra.mxu0 %v2973_v57  ;;  %2223 = vmatpush1.msra.mxu1 %v2975_v58  ;;  %v3052_v57 = vld [vmem:[%s5716_s4 + $0x1718] sm:$0xff]  ;;  %v1971_v58 = vadd.f32 %v2947_v46, %v1963_v45 }
 0x18f   : > { %2153 = vmatprep.subr.mxu0 %v2970_v59  ;;  %2224 = vmatprep.subr.mxu1 %v2972_v60  ;;  %v2949_v59 = vrot.slane %v1974_v47, 10  ;;  %v1982_v60 = vmul.f32 %v5131_v3, %v1981_v50  ;;  %v3048_v3 = vld [vmem:[%s5716_s4 + $0x16f8] sm:$0xff]  ;;  %v3164_v50 = vmov 1966171168  }
 0x190   : > { %2154 = vmatpush1.msra.mxu0 %v2969_v61  ;;  %2225 = vmatpush1.msra.mxu1 %v2971_v63  ;;  %v3049_v61 = vld [vmem:[%s5716_s4 + $0x1700] sm:$0xff]  ;;  %v3051_v63 = vld [vmem:[%s5716_s4 + $0x1710] sm:$0xff] }
 0x191   : > { %2155 = vmatprep.subr.mxu0 %v2966_v0  ;;  %2226 = vmatprep.subr.mxu1 %v2968_v1  ;;  %v3046_v0 = vld [vmem:[%s5716_s4 + $0x16e8] sm:$0xff]  ;;  %v3045_v1 = vld [vmem:[%s5716_s4 + $0x16e0] sm:$0xff] }
 0x192   : > { %2156 = vmatpush1.msra.mxu0 %v2965_v2  ;;  %2227 = vmatpush1.msra.mxu1 %v2967_v4  ;;  %v3047_v2 = vld [vmem:[%s5716_s4 + $0x16f0] sm:$0xff]  ;;  %v3042_v4 = vld [vmem:[%s5716_s4 + $0x16c8] sm:$0xff] }
 0x193   : > { %2157 = vmatprep.subr.mxu0 %v2962_v5  ;;  %2228 = vmatprep.subr.mxu1 %v2964_v8  ;;  %v3044_v5 = vld [vmem:[%s5716_s4 + $0x16d8] sm:$0xff]  ;;  %v1979_v8 = vadd.f32 %v2949_v59, %v1971_v58 }
 0x194   : > { %2158 = vmatpush1.msra.mxu0 %v2961_v6  ;;  %2229 = vmatpush1.msra.mxu1 %v2963_v7  ;;  %v2951_v6 = vrot.slane %v1982_v60, 11  ;;  %v3041_v7 = vld [vmem:[%s5716_s4 + $0x16c0] sm:$0xff] }
 0x195   : > { %2159 = vmatprep.subr.mxu0 %v2958_v10  ;;  %2230 = vmatprep.subr.mxu1 %v2960_v11  ;;  %v3043_v10 = vld [vmem:[%s5716_s4 + $0x16d0] sm:$0xff]  ;;  %v3038_v11 = vld [vmem:[%s5716_s4 + $0x16a8] sm:$0xff] }
 0x196   : > { %2160 = vmatpush1.msra.mxu0 %v2957_v30  ;;  %2231 = vmatpush1.msra.mxu1 %v2959_v12  ;;  %v3040_v30 = vld [vmem:[%s5716_s4 + $0x16b8] sm:$0xff]  ;;  %v3037_v12 = vld [vmem:[%s5716_s4 + $0x16a0] sm:$0xff] }
 0x197   : > { %2161 = vmatprep.subr.mxu0 %v2954_v13  ;;  %2232 = vmatprep.subr.mxu1 %v2956_v15  ;;  %v3039_v13 = vld [vmem:[%s5716_s4 + $0x16b0] sm:$0xff]  ;;  %v3034_v15 = vld [vmem:[%s5716_s4 + $0x1688] sm:$0xff] }
 0x198   : > { %2162 = vmatpush1.msra.mxu0 %v2953_v16  ;;  %2233 = vmatpush1.msra.mxu1 %v2955_v17  ;;  %v3036_v16 = vld [vmem:[%s5716_s4 + $0x1698] sm:$0xff]  ;;  %v1987_v17 = vadd.f32 %v2951_v6, %v1979_v8 }
 0x199   : > { %2163 = vmatprep.subr.mxu0 %v3078_v18  ;;  %2234 = vmatprep.subr.mxu1 %v3080_v19  ;;  %v3033_v18 = vld [vmem:[%s5716_s4 + $0x1680] sm:$0xff]  ;;  %v3035_v19 = vld [vmem:[%s5716_s4 + $0x1690] sm:$0xff] }
 0x19a   : > { %2164 = vmatpush2.msra.mxu0 %v3077_v20  ;;  %2235 = vmatpush2.msra.mxu1 %v3079_v21  ;;  %v1989_v20 = vstv %s5599_s23  ;;  %v3030_v21 = vld [vmem:[%s5716_s4 + $0x1668] sm:$0xff] }
 0x19b   : > { %2165 = vmatprep.subr.mxu0 %v3074_v22  ;;  %2236 = vmatprep.subr.mxu1 %v3076_v23  ;;  %v3032_v22 = vld [vmem:[%s5716_s4 + $0x1678] sm:$0xff]  ;;  %v3029_v23 = vld [vmem:[%s5716_s4 + $0x1660] sm:$0xff] }
 0x19c   : > { %2166 = vmatpush2.msra.mxu0 %v3073_v24  ;;  %2237 = vmatpush2.msra.mxu1 %v3075_v25  ;;  %v3031_v24 = vld [vmem:[%s5716_s4 + $0x1670] sm:$0xff]  ;;  %v3026_v25 = vld [vmem:[%s5716_s4 + $0x1648] sm:$0xff] }
 0x19d   : > { %2167 = vmatprep.subr.mxu0 %v3070_v27  ;;  %2238 = vmatprep.subr.mxu1 %v3072_v28  ;;  %v1990_v27 = vadd.f32 %v1989_v20, %v1987_v17  ;;  %v3025_v28 = vld [vmem:[%s5716_s4 + $0x1640] sm:$0xff] }
 0x19e   : > { %2168 = vmatpush2.msra.mxu0 %v3069_v29  ;;  %2239 = vmatpush2.msra.mxu1 %v3071_v31  ;;  %v3027_v29 = vld [vmem:[%s5716_s4 + $0x1650] sm:$0xff]  ;;  %v3022_v31 = vld [vmem:[%s5716_s4 + $0x1628] sm:$0xff] }
 0x19f   : > { %2169 = vmatprep.subr.mxu0 %v3066_v32  ;;  %2240 = vmatprep.subr.mxu1 %v3068_v33  ;;  %v3024_v32 = vld [vmem:[%s5716_s4 + $0x1638] sm:$0xff]  ;;  %v3021_v33 = vld [vmem:[%s5716_s4 + $0x1620] sm:$0xff]  ;;  %v2128_v37 = vrot.slane %v1990_v27, %v3632_v9  ;;  %v487_v9 = vpop.f32.mrf.mxu0 }
 0x1a0   : > { %2170 = vmatpush2.msra.mxu0 %v3065_v35  ;;  %2241 = vmatpush2.msra.mxu1 %v3067_v36  ;;  %v3018_v35 = vld [vmem:[%s5716_s4 + $0x1608] sm:$0xff]  ;;  %v3020_v36 = vld [vmem:[%s5716_s4 + $0x1618] sm:$0xff] }
 0x1a1   : > { %2171 = vmatprep.subr.mxu0 %v3062_v39  ;;  %2242 = vmatprep.subr.mxu1 %v3064_v40  ;;  %v3019_v39 = vld [vmem:[%s5716_s4 + $0x1610] sm:$0xff]  ;;  %v2124_v40 = vrot.slane %v1990_v27, %v3647_v14  ;;  %v570_v14 = vunpack.c.l.s4 %v3164_v50 }
 0x1a2   : > { %2172 = vmatpush2.msra.mxu0 %v3061_v41  ;;  %2243 = vmatpush2.msra.mxu1 %v3063_v42  ;;  %v558_v41 = vpop.f32.mrf.mxu1  ;;  %v489_v42 = vpop.f32.mrf.mxu0 }
 0x1a3   : > { %2173 = vmatprep.subr.mxu0 %v3058_v43  ;;  %2244 = vmatprep.subr.mxu1 %v3060_v44  ;;  %v567_v58 = vcombine.low %v487_v9, %v489_v42 }
 0x1a4   : > { %2174 = vmatpush2.msra.mxu0 %v3057_v48  ;;  %2245 = vmatpush2.msra.mxu1 %v3059_v49  ;;  %v560_v43 = vpop.f32.mrf.mxu1  ;;  %v829_v44 = vpop.f32.mrf.mxu0 }
 0x1a5   : > { %2175 = vmatprep.subr.mxu0 %v3054_v52  ;;  %2246 = vmatprep.subr.mxu1 %v3056_v53  ;;  %v568_v59 = vcombine.low %v558_v41, %v560_v43 }
 0x1a6   : > { %2176 = vmatpush2.msra.mxu0 %v3053_v54  ;;  %2247 = vmatpush2.msra.mxu1 %v3055_v55  ;;  %v900_v45 = vpop.f32.mrf.mxu1  ;;  %v831_v46 = vpop.f32.mrf.mxu0  ;;  %v571_v54 = vunpack.c.0.s8 %v570_v14 }
 0x1a7   : > { %2177 = vmatprep.subr.mxu0 %v3050_v56  ;;  %2248 = vmatprep.subr.mxu1 %v3052_v57 }
 0x1a8   : > { %2178 = vmatpush2.msra.mxu0 %v3049_v61  ;;  %2249 = vmatpush2.msra.mxu1 %v3051_v63  ;;  %v902_v47 = vpop.f32.mrf.mxu1  ;;  %v574_v57 = vsub.s32 %v571_v54, %v3604_v62 }
 0x1a9   : > { %2179 = vmatprep.subr.mxu0 %v3046_v0  ;;  %2250 = vmatprep.subr.mxu1 %v3048_v3  ;;  %v909_v3 = vcombine.low %v829_v44, %v831_v46 }
 0x1aa   : > { %2180 = vmatpush2.msra.mxu0 %v3045_v1  ;;  %2251 = vmatpush2.msra.mxu1 %v3047_v2  ;;  %v910_v1 = vcombine.low %v900_v45, %v902_v47  ;;  %v575_v2 = vrot.slane %v567_v58, %v574_v57 }
 0x1ab   : > { %2181 = vmatprep.subr.mxu0 %v3042_v4  ;;  %2252 = vmatprep.subr.mxu1 %v3044_v5  ;;  %v582_v4 = vrot.slane %v568_v59, %v574_v57 }
 0x1ac   : > { %2182 = vmatpush2.msra.mxu0 %v3041_v7  ;;  %2253 = vmatpush2.msra.mxu1 %v3043_v10  ;;  %v917_v10 = vrot.slane %v909_v3, %v574_v57 }
 0x1ad   : > { %2183 = vmatprep.subr.mxu0 %v3038_v11  ;;  %2254 = vmatprep.subr.mxu1 %v3040_v30  ;;  %v924_v11 = vrot.slane %v910_v1, %v574_v57 }
 0x1ae   : > { %2184 = vmatpush2.msra.mxu0 %v3037_v12  ;;  %2255 = vmatpush2.msra.mxu1 %v3039_v13  ;;  %v583_v13 = vcombine.low %v575_v2, %v582_v4 }
 0x1af   : > { %2185 = vmatprep.subr.mxu0 %v3034_v15  ;;  %2256 = vmatprep.subr.mxu1 %v3036_v16 }
 0x1b0   : > { %2186 = vmatpush2.msra.mxu0 %v3033_v18  ;;  %2257 = vmatpush2.msra.mxu1 %v3035_v19  ;;  %v925_v18 = vcombine.low %v917_v10, %v924_v11 }
 0x1b1   : > { %2187 = vmatprep.subr.mxu0 %v3030_v21  ;;  %2258 = vmatprep.subr.mxu1 %v3032_v22  ;;  %v590_v21 = vrot.slane %v583_v13, %v574_v57 }
 0x1b2   : > { %2188 = vmatpush2.msra.mxu0 %v3029_v23  ;;  %2259 = vmatpush2.msra.mxu1 %v3031_v24 }
 0x1b3   : > { %2189 = vmatprep.subr.mxu0 %v3026_v25  ;;  %2260 = vmatprep.subr.mxu1 %v3028_v26  ;;  %v251_v25 = vld [vmem:[%s5715_s3] sm:$0xf]  ;;  %v932_v26 = vrot.slane %v925_v18, %v574_v57 }
 0x1b4   : > { %2190 = vmatpush2.msra.mxu0 %v3025_v28  ;;  %2261 = vmatpush2.msra.mxu1 %v3027_v29  ;;  %v1171_v48 = vpop.f32.mrf.mxu0  ;;  %v1242_v49 = vpop.f32.mrf.mxu1 }
 0x1b5   : > { %2191 = vmatprep.subr.mxu0 %v3022_v31  ;;  %2262 = vmatprep.subr.mxu1 %v3024_v32  ;;  %v592_v31 = vadd.f32 %v590_v21, %v251_v25 }
 0x1b6   : > { %2192 = vmatpush2.msra.mxu0 %v3021_v33  ;;  %2263 = vmatpush2.msra.mxu1 %v3023_v34  ;;  %v1173_v52 = vpop.f32.mrf.mxu0  ;;  %v1244_v53 = vpop.f32.mrf.mxu1 }
 0x1b7   : > { %2193 = vmatprep.subr.mxu0 %v3018_v35  ;;  %2264 = vmatprep.subr.mxu1 %v3020_v36  ;;  %v1251_v5 = vcombine.low %v1171_v48, %v1173_v52  ;;  %v1252_v8 = vcombine.low %v1242_v49, %v1244_v53  ;;  %v934_v36 = vadd.f32 %v932_v26, %v592_v31 }
 0x1b8   : > { %2194 = vmatpush2.msra.mxu0 %v3017_v38  ;;  %2195 = vmatprep.mubr.f32.mxu0 %v2128_v37 }
 0x1b9   : > { %2265 = vmatpush2.msra.mxu1 %v3019_v39  ;;  %2266 = vmatprep.mubr.f32.mxu1 %v2128_v37  ;;  %v1259_v62 = vrot.slane %v1251_v5, %v574_v57  ;;  %v1266_v15 = vrot.slane %v1252_v8, %v574_v57 }
 0x1ba   : > { %2196 = vmatmul.mubr.f32.vlgmr.msra.gmra.mxu0 %v2124_v40  ;;  %2267 = vmatmul.mubr.f32.vlgmr.msra.gmra.mxu1 %v2124_v40 }
 0x1bb   : > { %v1267_v22 = vcombine.low %v1259_v62, %v1266_v15 }
 0x1bd   : > { %v1274_v32 = vrot.slane %v1267_v22, %v574_v57 }
 0x1bf   : > { %v1276_v40 = vadd.f32 %v1274_v32, %v934_v36 }
 0x1f6   : > { %v1513_v55 = vpop.f32.mrf.mxu0  ;;  %v1584_v56 = vpop.f32.mrf.mxu1 }
 0x1f8   : > { %v1515_v60 = vpop.f32.mrf.mxu0  ;;  %v1586_v61 = vpop.f32.mrf.mxu1 }
 0x1f9   : > { %v1593_v30 = vcombine.low %v1513_v55, %v1515_v60  ;;  %v1594_v12 = vcombine.low %v1584_v56, %v1586_v61 }
 0x1fb   : > { %v1601_v19 = vrot.slane %v1593_v30, %v574_v57  ;;  %v1608_v20 = vrot.slane %v1594_v12, %v574_v57 }
 0x1fd   : > { %v1609_v27 = vcombine.low %v1601_v19, %v1608_v20 }
 0x1ff   : > { %v1616_v37 = vrot.slane %v1609_v27, %v574_v57 }
 0x201   : > { %v1618_v43 = vadd.f32 %v1616_v37, %v1276_v40 }
 0x238   : > { %v1855_v63 = vpop.f32.mrf.mxu0  ;;  %v1926_v0 = vpop.f32.mrf.mxu1 }
 0x23a   : > { %v1857_v6 = vpop.f32.mrf.mxu0  ;;  %v1928_v7 = vpop.f32.mrf.mxu1 }
 0x23b   : > { %v1935_v16 = vcombine.low %v1855_v63, %v1857_v6  ;;  %v1936_v17 = vcombine.low %v1926_v0, %v1928_v7 }
 0x23d   : > { %v1943_v23 = vrot.slane %v1935_v16, %v574_v57  ;;  %v1950_v24 = vrot.slane %v1936_v17, %v574_v57 }
 0x23f   : > { %v1951_v33 = vcombine.low %v1943_v23, %v1950_v24 }
 0x241   : > { %v1958_v9 = vrot.slane %v1951_v33, %v574_v57 }
 0x243   : > { %v1960_v45 = vadd.f32 %v1958_v9, %v1618_v43 }
 0x27a   : > { %v2197_v28 = vpop.f32.mrf.mxu0  ;;  %v2268_v29 = vpop.f32.mrf.mxu1 }
 0x27c   : > { %v2199_v34 = vpop.f32.mrf.mxu0  ;;  %v2270_v35 = vpop.f32.mrf.mxu1 }
 0x27d   : > { %v2277_v38 = vcombine.low %v2197_v28, %v2199_v34  ;;  %v2278_v39 = vcombine.low %v2268_v29, %v2270_v35 }
 0x27f   : > { %v2285_v41 = vrot.slane %v2277_v38, %v574_v57  ;;  %v2292_v42 = vrot.slane %v2278_v39, %v574_v57 }
 0x281   : > { %v2293_v44 = vcombine.low %v2285_v41, %v2292_v42 }
 0x283   : > { %v2300_v46 = vrot.slane %v2293_v44, %v574_v57 }
 0x285   : > { %v2302_v47 = vadd.f32 %v2300_v46, %v1960_v45 }
 0x287   : > { %2307 = vst.msk [vmem:[%s249_s12] sm:$0xf] %vm2305_vm0, %v2302_v47 }
 0x288 PF: > { %s17_s18 = sadd.s32 1, %s3160_s18  }
 0x289   : > { %p14_p5 = scmp.ge.s32.totalorder %s17_s18, 4  }
 0x28b   :  { %16 = sbr.rel (!%p14_p5) target bundleno = 2 (0x2), region = 84 }
 0x290   :  { %2327 = vsyncpa [#allocation3], 1 }
 0x291   :  { %2329 = vsyncpa [#allocation3 + $0x1], 1 }
 0x292   :  { %2330 = vsyncpa [#allocation5], 1 }

</bundles_post_ra>
